<compile_context>
chip_gen: v7x
topology: tpu7x:2x2x1
jax: 0.10.0
libtpu: 0.0.40
codegen_flags: <defaults>
</compile_context>

<pallas_src>
import functools
import math

import jax
import jax.numpy as jnp
from jax import lax
from jax.experimental import pallas as pl
from jax.experimental.pallas import tpu as pltpu


# ----------------------------------------------------------------------------
# helpers
# ----------------------------------------------------------------------------
def _round_up(x, m):
    return -(-x // m) * m


def _pick_tile(dim, candidates):
    for c in candidates:
        if dim % c == 0:
            return c
    return candidates[-1]


def _pad_rows(x, rows_p):
    rows = x.shape[0]
    if rows == rows_p:
        return x
    return jnp.pad(x, ((0, rows_p - rows), (0, 0)))


_SQRT_2_OVER_PI = math.sqrt(2.0 / math.pi)


def _gelu_tanh(x):
    return 0.5 * x * (1.0 + jnp.tanh(_SQRT_2_OVER_PI * (x + 0.044715 * x * x * x)))


# ----------------------------------------------------------------------------
# Kernel 1: LayerNorm over the last dim on (tm, D) tiles (bf16 in/out, f32 math).
# ----------------------------------------------------------------------------
def _layernorm_kernel(x_ref, g_ref, b_ref, o_ref, *, eps):
    x = x_ref[...].astype(jnp.float32)
    mean = jnp.mean(x, axis=-1, keepdims=True)
    xc = x - mean
    var = jnp.mean(xc * xc, axis=-1, keepdims=True)
    y = xc * lax.rsqrt(var + eps) * g_ref[...] + b_ref[...]
    o_ref[...] = y.astype(o_ref.dtype)


def pallas_layernorm(x, gamma2d, beta2d, eps=1e-5, out_dtype=jnp.bfloat16):
    """x: (M, D) bf16, M % 16 == 0, D % 128 == 0; gamma/beta: (1, D) f32."""
    M, D = x.shape
    tm = _pick_tile(M, (256, 128, 64, 32, 16))
    while M // tm < 2 and tm > 16:        # v7x: keep both TensorCores busy
        tm //= 2
    return pl.pallas_call(
        functools.partial(_layernorm_kernel, eps=eps),
        out_shape=jax.ShapeDtypeStruct((M, D), out_dtype),
        grid_spec=pltpu.PrefetchScalarGridSpec(
            num_scalar_prefetch=0,
            grid=(M // tm,),
            in_specs=[pl.BlockSpec((tm, D), lambda i: (i, 0)),
                      pl.BlockSpec((1, D), lambda i: (0, 0)),
                      pl.BlockSpec((1, D), lambda i: (0, 0))],
            out_specs=pl.BlockSpec((tm, D), lambda i: (i, 0))),
        compiler_params=pltpu.CompilerParams(
            dimension_semantics=("parallel",)),
    )(x, gamma2d, beta2d)


# ----------------------------------------------------------------------------
# Kernel 2: tiled MXU matmul with fused epilogue (bias / GELU / residual).
# A, W are bf16; accumulation and epilogue math are f32; output bf16.
# ----------------------------------------------------------------------------
def _make_matmul_kernel(has_bias, has_residual, activation, single_k):
    def epilogue(y, bias_ref, res_ref):
        if has_bias:
            y = y + bias_ref[...]
        if activation == "gelu":
            y = _gelu_tanh(y)
        if has_residual:
            y = y + res_ref[...].astype(jnp.float32)
        return y

    if single_k:
        def kernel(*refs):
            a_ref, b_ref = refs[0], refs[1]
            idx = 2
            bias_ref = res_ref = None
            if has_bias:
                bias_ref = refs[idx]; idx += 1
            if has_residual:
                res_ref = refs[idx]; idx += 1
            o_ref = refs[idx]
            y = jnp.dot(a_ref[...], b_ref[...], preferred_element_type=jnp.float32)
            o_ref[...] = epilogue(y, bias_ref, res_ref).astype(o_ref.dtype)
        return kernel

    def kernel(*refs):
        a_ref, b_ref = refs[0], refs[1]
        idx = 2
        bias_ref = res_ref = None
        if has_bias:
            bias_ref = refs[idx]; idx += 1
        if has_residual:
            res_ref = refs[idx]; idx += 1
        o_ref = refs[idx]
        acc_ref = refs[idx + 1]

        @pl.when(pl.program_id(2) == 0)
        def _():
            acc_ref[...] = jnp.zeros_like(acc_ref)

        acc_ref[...] += jnp.dot(a_ref[...], b_ref[...],
                                preferred_element_type=jnp.float32)

        @pl.when(pl.program_id(2) == pl.num_programs(2) - 1)
        def _():
            o_ref[...] = epilogue(acc_ref[...], bias_ref, res_ref).astype(o_ref.dtype)

    return kernel


def pallas_linear(a, w, bias=None, residual=None, activation=None,
                  out_dtype=jnp.bfloat16):
    """Computes activation(a @ w + bias) + residual, fully fused.

    a: (M, K) bf16 with M % 16 == 0, K % 128 == 0.
    w: (K, N) bf16 (pre-cast at init), N % 128 == 0.
    bias: (1, N) f32.  residual: (M, N) bf16.
    """
    M, K = a.shape
    K2, N = w.shape
    assert K == K2

    tm = _pick_tile(M, (256, 128, 64, 32, 16))
    tn = _pick_tile(N, (512, 256, 128))
    # v7x has 2 TensorCores: make sure there are >= 2 parallel blocks when possible.
    while (M // tm) * (N // tn) < 2 and tn > 128:
        tn //= 2
    while (M // tm) * (N // tn) < 2 and tm > 16:
        tm //= 2

    single_k = K <= 2048
    tk = K if single_k else _pick_tile(K, (2048, 1024, 512, 256, 128))

    args = [a, w]
    kernel = _make_matmul_kernel(bias is not None, residual is not None,
                                 activation, single_k)

    if single_k:
        in_specs = [pl.BlockSpec((tm, tk), lambda i, j: (i, 0)),
                    pl.BlockSpec((tk, tn), lambda i, j: (0, j))]
        if bias is not None:
            args.append(bias)
            in_specs.append(pl.BlockSpec((1, tn), lambda i, j: (0, j)))
        if residual is not None:
            args.append(residual)
            in_specs.append(pl.BlockSpec((tm, tn), lambda i, j: (i, j)))
        grid = (M // tm, N // tn)
        out_spec = pl.BlockSpec((tm, tn), lambda i, j: (i, j))
        scratch = []
        dims = ("parallel", "parallel")
    else:
        in_specs = [pl.BlockSpec((tm, tk), lambda i, j, k: (i, k)),
                    pl.BlockSpec((tk, tn), lambda i, j, k: (k, j))]
        if bias is not None:
            args.append(bias)
            in_specs.append(pl.BlockSpec((1, tn), lambda i, j, k: (0, j)))
        if residual is not None:
            args.append(residual)
            in_specs.append(pl.BlockSpec((tm, tn), lambda i, j, k: (i, j)))
        grid = (M // tm, N // tn, K // tk)
        out_spec = pl.BlockSpec((tm, tn), lambda i, j, k: (i, j))
        scratch = [pltpu.VMEM((tm, tn), jnp.float32)]
        dims = ("parallel", "parallel", "arbitrary")

    return pl.pallas_call(
        kernel,
        out_shape=jax.ShapeDtypeStruct((M, N), out_dtype),
        grid_spec=pltpu.PrefetchScalarGridSpec(
            num_scalar_prefetch=0, grid=grid, in_specs=in_specs,
            out_specs=out_spec, scratch_shapes=scratch),
        compiler_params=pltpu.CompilerParams(dimension_semantics=dims),
    )(*args)


# ----------------------------------------------------------------------------
# Kernel 3: fused per-(batch, head) attention: softmax(Q K^T) V.
# Scale is pre-folded into Wq. Q/K/V are read directly from the (B*N, H*Dh)
# (or fused (B*N, 3*H*Dh)) projection outputs via column-offset index maps,
# so no head-split transposes ever touch HBM.
# ----------------------------------------------------------------------------
def _attention_kernel(q_ref, k_ref, v_ref, o_ref):
    q = q_ref[...]                                       # (Nq, Dh) bf16
    k = k_ref[...]                                       # (Nk, Dh) bf16
    s = lax.dot_general(q, k, (((1,), (1,)), ((), ())),  # contract head dim
                        preferred_element_type=jnp.float32)
    m = jnp.max(s, axis=-1, keepdims=True)
    p = jnp.exp(s - m)
    l = jnp.sum(p, axis=-1, keepdims=True)
    out = jnp.dot(p.astype(v_ref.dtype), v_ref[...],
                  preferred_element_type=jnp.float32)
    # Normalize the small (Nq, Dh) output instead of the (Nq, Nk) probabilities;
    # reciprocal goes to the EUP slot.
    o_ref[...] = (out * pl.reciprocal(l, approx=True)).astype(o_ref.dtype)


def pallas_attention(q_arr, k_arr, v_arr, *, B, Nq, Nk, H, Dh,
                     q_h_off=0, k_h_off=0, v_h_off=0, out_dtype=jnp.bfloat16):
    """q_arr: (>=B*Nq, >= (q_h_off+H)*Dh) bf16, k/v_arr: (>=B*Nk, ...) bf16."""
    out_rows = q_arr.shape[0]
    return pl.pallas_call(
        _attention_kernel,
        out_shape=jax.ShapeDtypeStruct((out_rows, H * Dh), out_dtype),
        grid_spec=pltpu.PrefetchScalarGridSpec(
            num_scalar_prefetch=0,
            grid=(B, H),
            in_specs=[pl.BlockSpec((Nq, Dh), lambda b, h: (b, q_h_off + h)),
                      pl.BlockSpec((Nk, Dh), lambda b, h: (b, k_h_off + h)),
                      pl.BlockSpec((Nk, Dh), lambda b, h: (b, v_h_off + h))],
            out_specs=pl.BlockSpec((Nq, Dh), lambda b, h: (b, h))),
        compiler_params=pltpu.CompilerParams(
            dimension_semantics=("parallel", "parallel")),
    )(q_arr, k_arr, v_arr)


# ----------------------------------------------------------------------------
# Module-level forward (mirrors Transformer_v1.forward).
# ----------------------------------------------------------------------------
def _ffn_block(L, x):
    """FeedForward(x) + x; GELU and the residual are fused into the matmul epilogues."""
    h = pallas_linear(x, L['w1'], bias=L['b1'], activation='gelu')
    return pallas_linear(h, L['w2'], bias=L['b2'], residual=x)


def transformer_v1_apply(prepared, q, k, v, cfg):
    H, Dh = cfg['heads'], cfg['dim_head']
    B, Nq, D = q.shape
    Bk, Nk, Dk = k.shape
    assert Bk == B and Dk == D, "batched attention requires matching batch/dim"
    assert D % 128 == 0 and Dh % 128 == 0 and cfg['mlp_dim'] % 128 == 0, \
        "feature dims must be multiples of 128 (module defaults satisfy this)"
    assert Nq % 8 == 0 and Nk % 8 == 0, "sequence lengths must be multiples of 8"

    Mq, Mk = B * Nq, B * Nk
    Mqp, Mkp = _round_up(Mq, 16), _round_up(Mk, 16)

    # Single entry pass: flatten + cast to bf16 + 16-align the row count once.
    # Everything downstream stays in this padded bf16 layout until the final slice.
    q2 = _pad_rows(q.reshape(Mq, D).astype(jnp.bfloat16), Mqp)
    k2 = _pad_rows(k.reshape(Mk, D).astype(jnp.bfloat16), Mkp)
    v2 = _pad_rows(v.reshape(Mk, D).astype(jnp.bfloat16), Mkp)

    # ---- layer 0: cross attention over (q, k, v) ----
    L0 = prepared[0]
    qn = pallas_layernorm(q2, L0['ln_g'], L0['ln_b'])
    kn = pallas_layernorm(k2, L0['ln_g'], L0['ln_b'])
    vn = pallas_layernorm(v2, L0['ln_g'], L0['ln_b'])
    Q = pallas_linear(qn, L0['wq'])        # attention scale already folded into wq
    K = pallas_linear(kn, L0['wk'])
    V = pallas_linear(vn, L0['wv'])
    O = pallas_attention(Q, K, V, B=B, Nq=Nq, Nk=Nk, H=H, Dh=Dh)
    if cfg['project_out']:
        x = pallas_linear(O, L0['wo'], bias=L0['bo'], residual=q2)
    else:
        x = (O.astype(jnp.float32) + q2.astype(jnp.float32)).astype(jnp.bfloat16)
    x = _ffn_block(L0, x)

    # ---- layers 1..depth-1: self attention with fused QKV projection ----
    for L in prepared[1:]:
        xn = pallas_layernorm(x, L['ln_g'], L['ln_b'])
        QKV = pallas_linear(xn, L['wqkv'])                     # (Mqp, 3*H*Dh)
        O = pallas_attention(QKV, QKV, QKV, B=B, Nq=Nq, Nk=Nq, H=H, Dh=Dh,
                             k_h_off=H, v_h_off=2 * H)
        if cfg['project_out']:
            x = pallas_linear(O, L['wo'], bias=L['bo'], residual=x)
        else:
            x = (O.astype(jnp.float32) + x.astype(jnp.float32)).astype(jnp.bfloat16)
        x = _ffn_block(L, x)

    return x[:Mq].reshape(B, Nq, D).astype(jnp.float32)


# ----------------------------------------------------------------------------
# Parameter init (raw f32, mirrors PyTorch defaults) + one-time kernel prep.
# ----------------------------------------------------------------------------
def init_transformer_params(key, heads, dim, dim_head, mlp_dim, depth):
    inner = dim_head * heads
    project_out = not (heads == 1 and dim_head == dim)

    def linear_init(k, fan_in, fan_out, bias=True):
        bound = 1.0 / math.sqrt(fan_in)
        kw, kb = jax.random.split(k)
        w = jax.random.uniform(kw, (fan_in, fan_out), jnp.float32, -bound, bound)
        b = (jax.random.uniform(kb, (fan_out,), jnp.float32, -bound, bound)
             if bias else None)
        return w, b

    keys = iter(jax.random.split(key, depth * 8))
    layers = []
    for _ in range(depth):
        layer = {
            'ln_g': jnp.ones((dim,), jnp.float32),
            'ln_b': jnp.zeros((dim,), jnp.float32),
            'wq': linear_init(next(keys), dim, inner, bias=False)[0],
            'wk': linear_init(next(keys), dim, inner, bias=False)[0],
            'wv': linear_init(next(keys), dim, inner, bias=False)[0],
        }
        if project_out:
            wo, bo = linear_init(next(keys), inner, dim, bias=True)
            layer['wo'], layer['bo'] = wo, bo
        w1, b1 = linear_init(next(keys), dim, mlp_dim, bias=True)
        w2, b2 = linear_init(next(keys), mlp_dim, dim, bias=True)
        layer.update(w1=w1, b1=b1, w2=w2, b2=b2)
        layers.append(layer)

    cfg = dict(heads=heads, dim=dim, dim_head=dim_head, mlp_dim=mlp_dim,
               depth=depth, project_out=project_out,
               scale=float(dim_head) ** (-0.5))
    return {'layers': layers}, cfg


def prepare_params(params, cfg):
    """One-time prep: bf16 weights, f32 row-vector biases, fused QKV for self-attn
    layers, attention scale folded into Wq. Keeps all casts/copies out of the
    per-step forward pass."""
    scale = cfg['scale']
    prepared = []
    for li, layer in enumerate(params['layers']):
        p = {'ln_g': layer['ln_g'].reshape(1, -1).astype(jnp.float32),
             'ln_b': layer['ln_b'].reshape(1, -1).astype(jnp.float32)}
        wq = (layer['wq'] * scale).astype(jnp.bfloat16)
        wk = layer['wk'].astype(jnp.bfloat16)
        wv = layer['wv'].astype(jnp.bfloat16)
        if li == 0:
            p['wq'], p['wk'], p['wv'] = wq, wk, wv       # cross attention: q != k != v
        else:
            p['wqkv'] = jnp.concatenate([wq, wk, wv], axis=1)   # (D, 3*inner)
        if cfg['project_out']:
            p['wo'] = layer['wo'].astype(jnp.bfloat16)
            p['bo'] = layer['bo'].reshape(1, -1).astype(jnp.float32)
        p['w1'] = layer['w1'].astype(jnp.bfloat16)
        p['b1'] = layer['b1'].reshape(1, -1).astype(jnp.float32)
        p['w2'] = layer['w2'].astype(jnp.bfloat16)
        p['b2'] = layer['b2'].reshape(1, -1).astype(jnp.float32)
        prepared.append(p)
    return prepared


# ----------------------------------------------------------------------------
# Pure-JAX f32 reference (for a loose numerical sanity check).
# ----------------------------------------------------------------------------
def _ln_ref(x, g, b, eps=1e-5):
    mu = jnp.mean(x, -1, keepdims=True)
    var = jnp.mean(jnp.square(x - mu), -1, keepdims=True)
    return (x - mu) * lax.rsqrt(var + eps) * g + b


def reference_forward(params, q, k, v, cfg):
    H, Dh, scale = cfg['heads'], cfg['dim_head'], cfg['scale']

    def attn(layer, q, k, v):
        B, Nq, D = q.shape
        qn = _ln_ref(q, layer['ln_g'], layer['ln_b'])
        kn = _ln_ref(k, layer['ln_g'], layer['ln_b'])
        vn = _ln_ref(v, layer['ln_g'], layer['ln_b'])
        Q = (qn @ layer['wq']).reshape(B, Nq, H, Dh).transpose(0, 2, 1, 3)
        K = (kn @ layer['wk']).reshape(B, -1, H, Dh).transpose(0, 2, 1, 3)
        V = (vn @ layer['wv']).reshape(B, -1, H, Dh).transpose(0, 2, 1, 3)
        s = jnp.einsum('bhid,bhjd->bhij', Q, K) * scale
        p = jax.nn.softmax(s, axis=-1)
        O = jnp.einsum('bhij,bhjd->bhid', p, V)
        O = O.transpose(0, 2, 1, 3).reshape(B, Nq, H * Dh)
        if cfg['project_out']:
            O = O @ layer['wo'] + layer['bo']
        return O + q

    def ffn(layer, x):
        h = jax.nn.gelu(x @ layer['w1'] + layer['b1'], approximate=False)
        return h @ layer['w2'] + layer['b2'] + x

    layers = params['layers']
    x = ffn(layers[0], attn(layers[0], q, k, v))
    for layer in layers[1:]:
        x = ffn(layer, attn(layer, x, x, x))
    return x


if __name__ == "__main__":
    key = jax.random.PRNGKey(0)
    pkey, qkey, kkey, vkey = jax.random.split(key, 4)

    # Small config consistent with Transformer_v1 (module defaults heads=8, dim=2048,
    # dim_head=256, mlp_dim=2048, depth=1 — scaled down; depth=2 exercises both the
    # cross-attention and the fused-QKV self-attention paths).
    HEADS, DIM, DIM_HEAD, MLP_DIM, DEPTH = 2, 256, 128, 512, 2
    B, N = 2, 16

    params, cfg = init_transformer_params(pkey, heads=HEADS, dim=DIM,
                                          dim_head=DIM_HEAD, mlp_dim=MLP_DIM,
                                          depth=DEPTH)
    prepared = prepare_params(params, cfg)     # one-time weight cast / fold / fuse

    q = jax.random.normal(qkey, (B, N, DIM), jnp.float32)
    k = jax.random.normal(kkey, (B, N, DIM), jnp.float32)
    v = jax.random.normal(vkey, (B, N, DIM), jnp.float32)

    apply_fn = jax.jit(lambda p, q_, k_, v_: transformer_v1_apply(p, q_, k_, v_, cfg))
    out = apply_fn(prepared, q, k, v)
    jax.block_until_ready(out)

    assert out.shape == (B, N, DIM), out.shape
    assert bool(jnp.all(jnp.isfinite(out)))

    # Loose sanity check vs. a pure-JAX f32 reference (kernel path runs in bf16).
    ref = reference_forward(params, q, k, v, cfg)
    err = float(jnp.max(jnp.abs(out - ref)))
    ref_mag = float(jnp.max(jnp.abs(ref)))
    assert err <= 0.1 + 0.05 * ref_mag, (err, ref_mag)

    print("KERNEL_OK")
</pallas_src>

<mosaic_0001>
module attributes {stable_mosaic.version = 11 : i64} {
  func.func @kernel(%arg0: i32, %arg1: i32, %arg2: memref<32x256xbf16, #tpu.memory_space<vmem>>, %arg3: memref<256x128xbf16, #tpu.memory_space<vmem>>, %arg4: memref<32x128xbf16, #tpu.memory_space<vmem>>) attributes {dimension_semantics = [#tpu.dimension_semantics<parallel>, #tpu.dimension_semantics<parallel>], iteration_bounds = array<i64: 1, 2>, scalar_prefetch = 0 : i64, scratch_operands = 0 : i64, tpu.core_type = #tpu.core_type<tc>, window_params = [{transform_indices = @transform_0, window_bounds = array<i64: 32, 256>}, {transform_indices = @transform_1, window_bounds = array<i64: 256, 128>}, {transform_indices = @transform_2, window_bounds = array<i64: 32, 128>}]} {
    %c0 = arith.constant 0 : index
    %c0_0 = arith.constant 0 : index
    %0 = vector.load %arg2[%c0, %c0_0] : memref<32x256xbf16, #tpu.memory_space<vmem>>, vector<32x256xbf16>
    %c0_1 = arith.constant 0 : index
    %c0_2 = arith.constant 0 : index
    %1 = vector.load %arg3[%c0_1, %c0_2] : memref<256x128xbf16, #tpu.memory_space<vmem>>, vector<256x128xbf16>
    %cst = arith.constant dense<0.000000e+00> : vector<32x128xf32>
    %2 = tpu.matmul %0, %1, %cst {dimension_numbers = #tpu.dot_dimension_numbers<[1], [0], [0], [1], [0, 0, 1, 1], [], []>} : vector<32x256xbf16>, vector<256x128xbf16>, vector<32x128xf32> -> vector<32x128xf32>
    %3 = arith.truncf %2 : vector<32x128xf32> to vector<32x128xbf16>
    %c0_3 = arith.constant 0 : index
    %c0_4 = arith.constant 0 : index
    %4 = vector.load %arg4[%c0_3, %c0_4] : memref<32x128xbf16, #tpu.memory_space<vmem>>, vector<32x128xbf16>
    tpu.vector_store %arg4[%c0_3, %c0_4], %3 {strides = array<i32>} : memref<32x128xbf16, #tpu.memory_space<vmem>>, vector<32x128xbf16>,
    return
  }
  func.func @transform_0(%arg0: i32, %arg1: i32) -> (i32, i32) {
    %c0_i32 = arith.constant 0 : i32
    %c0_i32_0 = arith.constant 0 : i32
    return %arg0, %c0_i32 : i32, i32
  }
  func.func @transform_1(%arg0: i32, %arg1: i32) -> (i32, i32) {
    %c0_i32 = arith.constant 0 : i32
    %c0_i32_0 = arith.constant 0 : i32
    return %c0_i32, %arg1 : i32, i32
  }
  func.func @transform_2(%arg0: i32, %arg1: i32) -> (i32, i32) {
    %c0_i32 = arith.constant 0 : i32
    return %arg0, %arg1 : i32, i32
  }
}

module attributes {stable_mosaic.version = 11 : i64} {
  func.func @kernel(%arg0: i32, %arg1: i32, %arg2: memref<32x256xbf16, #tpu.memory_space<vmem>>, %arg3: memref<256x128xbf16, #tpu.memory_space<vmem>>, %arg4: memref<32x128xbf16, #tpu.memory_space<vmem>>) attributes {dimension_semantics = [#tpu.dimension_semantics<parallel>, #tpu.dimension_semantics<parallel>], iteration_bounds = array<i64: 1, 2>, scalar_prefetch = 0 : i64, scratch_operands = 0 : i64, tpu.core_type = #tpu.core_type<tc>, window_params = [{transform_indices = @transform_0, window_bounds = array<i64: 32, 256>}, {transform_indices = @transform_1, window_bounds = array<i64: 256, 128>}, {transform_indices = @transform_2, window_bounds = array<i64: 32, 128>}]} {
    %c0 = arith.constant 0 : index
    %c0_0 = arith.constant 0 : index
    %0 = vector.load %arg2[%c0, %c0_0] : memref<32x256xbf16, #tpu.memory_space<vmem>>, vector<32x256xbf16>
    %c0_1 = arith.constant 0 : index
    %c0_2 = arith.constant 0 : index
    %1 = vector.load %arg3[%c0_1, %c0_2] : memref<256x128xbf16, #tpu.memory_space<vmem>>, vector<256x128xbf16>
    %cst = arith.constant dense<0.000000e+00> : vector<32x128xf32>
    %2 = tpu.matmul %0, %1, %cst {dimension_numbers = #tpu.dot_dimension_numbers<[1], [0], [0], [1], [0, 0, 1, 1], [], []>} : vector<32x256xbf16>, vector<256x128xbf16>, vector<32x128xf32> -> vector<32x128xf32>
    %3 = arith.truncf %2 : vector<32x128xf32> to vector<32x128xbf16>
    %c0_3 = arith.constant 0 : index
    %c0_4 = arith.constant 0 : index
    %4 = vector.load %arg4[%c0_3, %c0_4] : memref<32x128xbf16, #tpu.memory_space<vmem>>, vector<32x128xbf16>
    tpu.vector_store %arg4[%c0_3, %c0_4], %3 {strides = array<i32>} : memref<32x128xbf16, #tpu.memory_space<vmem>>, vector<32x128xbf16>,
    return
  }
  func.func @transform_0(%arg0: i32, %arg1: i32) -> (i32, i32) {
    %c0_i32 = arith.constant 0 : i32
    %c0_i32_0 = arith.constant 0 : i32
    return %arg0, %c0_i32 : i32, i32
  }
  func.func @transform_1(%arg0: i32, %arg1: i32) -> (i32, i32) {
    %c0_i32 = arith.constant 0 : i32
    %c0_i32_0 = arith.constant 0 : i32
    return %c0_i32, %arg1 : i32, i32
  }
  func.func @transform_2(%arg0: i32, %arg1: i32) -> (i32, i32) {
    %c0_i32 = arith.constant 0 : i32
    return %arg0, %arg1 : i32, i32
  }
}

module attributes {stable_mosaic.version = 11 : i64} {
  func.func @_layernorm_kernel(%arg0: i32, %arg1: memref<16x256xbf16, #tpu.memory_space<vmem>>, %arg2: memref<1x256xf32, #tpu.memory_space<vmem>>, %arg3: memref<1x256xf32, #tpu.memory_space<vmem>>, %arg4: memref<16x256xbf16, #tpu.memory_space<vmem>>) attributes {dimension_semantics = [#tpu.dimension_semantics<parallel>], iteration_bounds = array<i64: 2>, scalar_prefetch = 0 : i64, scratch_operands = 0 : i64, tpu.core_type = #tpu.core_type<tc>, window_params = [{transform_indices = @transform_0, window_bounds = array<i64: 16, 256>}, {pipeline_mode = #tpu.pipeline_mode<synchronous>, transform_indices = @transform_1, window_bounds = array<i64: 1, 256>}, {pipeline_mode = #tpu.pipeline_mode<synchronous>, transform_indices = @transform_2, window_bounds = array<i64: 1, 256>}, {transform_indices = @transform_3, window_bounds = array<i64: 16, 256>}]} {
    %c0 = arith.constant 0 : index
    %c0_0 = arith.constant 0 : index
    %0 = vector.load %arg1[%c0, %c0_0] : memref<16x256xbf16, #tpu.memory_space<vmem>>, vector<16x256xbf16>
    %1 = arith.extf %0 : vector<16x256xbf16> to vector<16x256xf32>
    %cst = arith.constant dense<0.000000e+00> : vector<16xf32>
    %2 = vector.multi_reduction <add>, %1, %cst [1] : vector<16x256xf32> to vector<16xf32>
    %3 = vector.shape_cast %2 : vector<16xf32> to vector<16x1xf32>
    %cst_1 = arith.constant 2.560000e+02 : f32
    %4 = vector.broadcast %cst_1 : f32 to vector<16x1xf32>
    %5 = arith.divf %3, %4 : vector<16x1xf32>
    %6 = vector.broadcast %5 : vector<16x1xf32> to vector<16x256xf32>
    %7 = arith.subf %1, %6 : vector<16x256xf32>
    %8 = arith.mulf %7, %7 : vector<16x256xf32>
    %cst_2 = arith.constant dense<0.000000e+00> : vector<16xf32>
    %9 = vector.multi_reduction <add>, %8, %cst_2 [1] : vector<16x256xf32> to vector<16xf32>
    %10 = vector.shape_cast %9 : vector<16xf32> to vector<16x1xf32>
    %cst_3 = arith.constant 2.560000e+02 : f32
    %11 = vector.broadcast %cst_3 : f32 to vector<16x1xf32>
    %12 = arith.divf %10, %11 : vector<16x1xf32>
    %cst_4 = arith.constant 9.99999974E-6 : f32
    %13 = vector.broadcast %cst_4 : f32 to vector<16x1xf32>
    %14 = arith.addf %12, %13 : vector<16x1xf32>
    %15 = math.rsqrt %14 : vector<16x1xf32>
    %16 = vector.broadcast %15 : vector<16x1xf32> to vector<16x256xf32>
    %17 = arith.mulf %7, %16 : vector<16x256xf32>
    %c0_5 = arith.constant 0 : index
    %c0_6 = arith.constant 0 : index
    %18 = vector.load %arg2[%c0_5, %c0_6] : memref<1x256xf32, #tpu.memory_space<vmem>>, vector<1x256xf32>
    %19 = vector.broadcast %18 : vector<1x256xf32> to vector<16x256xf32>
    %20 = arith.mulf %17, %19 : vector<16x256xf32>
    %c0_7 = arith.constant 0 : index
    %c0_8 = arith.constant 0 : index
    %21 = vector.load %arg3[%c0_7, %c0_8] : memref<1x256xf32, #tpu.memory_space<vmem>>, vector<1x256xf32>
    %22 = vector.broadcast %21 : vector<1x256xf32> to vector<16x256xf32>
    %23 = arith.addf %20, %22 : vector<16x256xf32>
    %24 = arith.truncf %23 : vector<16x256xf32> to vector<16x256xbf16>
    %c0_9 = arith.constant 0 : index
    %c0_10 = arith.constant 0 : index
    %25 = vector.load %arg4[%c0_9, %c0_10] : memref<16x256xbf16, #tpu.memory_space<vmem>>, vector<16x256xbf16>
    tpu.vector_store %arg4[%c0_9, %c0_10], %24 {strides = array<i32>} : memref<16x256xbf16, #tpu.memory_space<vmem>>, vector<16x256xbf16>,
    return
  }
  func.func @transform_0(%arg0: i32) -> (i32, i32) {
    %c0_i32 = arith.constant 0 : i32
    %c0_i32_0 = arith.constant 0 : i32
    return %arg0, %c0_i32 : i32, i32
  }
  func.func @transform_1(%arg0: i32) -> (i32, i32) {
    %c0_i32 = arith.constant 0 : i32
    %c0_i32_0 = arith.constant 0 : i32
    %c0_i32_1 = arith.constant 0 : i32
    return %c0_i32, %c0_i32_0 : i32, i32
  }
  func.func @transform_2(%arg0: i32) -> (i32, i32) {
    %c0_i32 = arith.constant 0 : i32
    %c0_i32_0 = arith.constant 0 : i32
    %c0_i32_1 = arith.constant 0 : i32
    return %c0_i32, %c0_i32_0 : i32, i32
  }
  func.func @transform_3(%arg0: i32) -> (i32, i32) {
    %c0_i32 = arith.constant 0 : i32
    %c0_i32_0 = arith.constant 0 : i32
    return %arg0, %c0_i32 : i32, i32
  }
}

module attributes {stable_mosaic.version = 11 : i64} {
  func.func @_attention_kernel(%arg0: i32, %arg1: i32, %arg2: memref<16x128xbf16, #tpu.memory_space<vmem>>, %arg3: memref<16x128xbf16, #tpu.memory_space<vmem>>, %arg4: memref<16x128xbf16, #tpu.memory_space<vmem>>, %arg5: memref<16x128xbf16, #tpu.memory_space<vmem>>) attributes {dimension_semantics = [#tpu.dimension_semantics<parallel>, #tpu.dimension_semantics<parallel>], iteration_bounds = array<i64: 2, 2>, scalar_prefetch = 0 : i64, scratch_operands = 0 : i64, tpu.core_type = #tpu.core_type<tc>, window_params = [{transform_indices = @transform_0, window_bounds = array<i64: 16, 128>}, {transform_indices = @transform_1, window_bounds = array<i64: 16, 128>}, {transform_indices = @transform_2, window_bounds = array<i64: 16, 128>}, {transform_indices = @transform_3, window_bounds = array<i64: 16, 128>}]} {
    %c0 = arith.constant 0 : index
    %c0_0 = arith.constant 0 : index
    %0 = vector.load %arg2[%c0, %c0_0] : memref<16x128xbf16, #tpu.memory_space<vmem>>, vector<16x128xbf16>
    %c0_1 = arith.constant 0 : index
    %c0_2 = arith.constant 0 : index
    %1 = vector.load %arg3[%c0_1, %c0_2] : memref<16x128xbf16, #tpu.memory_space<vmem>>, vector<16x128xbf16>
    %cst = arith.constant dense<0.000000e+00> : vector<16x16xf32>
    %2 = tpu.matmul %0, %1, %cst {dimension_numbers = #tpu.dot_dimension_numbers<[1], [1], [0], [0], [0, 0, 1, 0], [], []>} : vector<16x128xbf16>, vector<16x128xbf16>, vector<16x16xf32> -> vector<16x16xf32>
    %cst_3 = arith.constant dense<0xFF800000> : vector<16xf32>
    %3 = vector.multi_reduction <maximumf>, %2, %cst_3 [1] : vector<16x16xf32> to vector<16xf32>
    %4 = vector.shape_cast %3 : vector<16xf32> to vector<16x1xf32>
    %5 = vector.broadcast %4 : vector<16x1xf32> to vector<16x16xf32>
    %6 = arith.subf %2, %5 : vector<16x16xf32>
    %7 = math.exp %6 : vector<16x16xf32>
    %cst_4 = arith.constant dense<0.000000e+00> : vector<16xf32>
    %8 = vector.multi_reduction <add>, %7, %cst_4 [1] : vector<16x16xf32> to vector<16xf32>
    %9 = vector.shape_cast %8 : vector<16xf32> to vector<16x1xf32>
    %10 = arith.truncf %7 : vector<16x16xf32> to vector<16x16xbf16>
    %c0_5 = arith.constant 0 : index
    %c0_6 = arith.constant 0 : index
    %11 = vector.load %arg4[%c0_5, %c0_6] : memref<16x128xbf16, #tpu.memory_space<vmem>>, vector<16x128xbf16>
    %cst_7 = arith.constant dense<0.000000e+00> : vector<16x128xf32>
    %12 = tpu.matmul %10, %11, %cst_7 {dimension_numbers = #tpu.dot_dimension_numbers<[1], [0], [0], [1], [0, 0, 1, 1], [], []>} : vector<16x16xbf16>, vector<16x128xbf16>, vector<16x128xf32> -> vector<16x128xf32>
    %13 = tpu.reciprocal %9 {approx = true} : vector<16x1xf32> -> vector<16x1xf32>
    %14 = vector.broadcast %13 : vector<16x1xf32> to vector<16x128xf32>
    %15 = arith.mulf %12, %14 : vector<16x128xf32>
    %16 = arith.truncf %15 : vector<16x128xf32> to vector<16x128xbf16>
    %c0_8 = arith.constant 0 : index
    %c0_9 = arith.constant 0 : index
    %17 = vector.load %arg5[%c0_8, %c0_9] : memref<16x128xbf16, #tpu.memory_space<vmem>>, vector<16x128xbf16>
    tpu.vector_store %arg5[%c0_8, %c0_9], %16 {strides = array<i32>} : memref<16x128xbf16, #tpu.memory_space<vmem>>, vector<16x128xbf16>,
    return
  }
  func.func @transform_0(%arg0: i32, %arg1: i32) -> (i32, i32) {
    %c0_i32 = arith.constant 0 : i32
    %0 = arith.addi %c0_i32, %arg1 : i32
    %c0_i32_0 = arith.constant 0 : i32
    return %arg0, %0 : i32, i32
  }
  func.func @transform_1(%arg0: i32, %arg1: i32) -> (i32, i32) {
    %c0_i32 = arith.constant 0 : i32
    %0 = arith.addi %c0_i32, %arg1 : i32
    %c0_i32_0 = arith.constant 0 : i32
    return %arg0, %0 : i32, i32
  }
  func.func @transform_2(%arg0: i32, %arg1: i32) -> (i32, i32) {
    %c0_i32 = arith.constant 0 : i32
    %0 = arith.addi %c0_i32, %arg1 : i32
    %c0_i32_0 = arith.constant 0 : i32
    return %arg0, %0 : i32, i32
  }
  func.func @transform_3(%arg0: i32, %arg1: i32) -> (i32, i32) {
    %c0_i32 = arith.constant 0 : i32
    return %arg0, %arg1 : i32, i32
  }
}

module attributes {stable_mosaic.version = 11 : i64} {
  func.func @kernel(%arg0: i32, %arg1: i32, %arg2: memref<32x256xbf16, #tpu.memory_space<vmem>>, %arg3: memref<256x128xbf16, #tpu.memory_space<vmem>>, %arg4: memref<1x128xf32, #tpu.memory_space<vmem>>, %arg5: memref<32x128xbf16, #tpu.memory_space<vmem>>, %arg6: memref<32x128xbf16, #tpu.memory_space<vmem>>) attributes {dimension_semantics = [#tpu.dimension_semantics<parallel>, #tpu.dimension_semantics<parallel>], iteration_bounds = array<i64: 1, 2>, scalar_prefetch = 0 : i64, scratch_operands = 0 : i64, tpu.core_type = #tpu.core_type<tc>, window_params = [{transform_indices = @transform_0, window_bounds = array<i64: 32, 256>}, {transform_indices = @transform_1, window_bounds = array<i64: 256, 128>}, {transform_indices = @transform_2, window_bounds = array<i64: 1, 128>}, {transform_indices = @transform_3, window_bounds = array<i64: 32, 128>}, {transform_indices = @transform_4, window_bounds = array<i64: 32, 128>}]} {
    %c0 = arith.constant 0 : index
    %c0_0 = arith.constant 0 : index
    %0 = vector.load %arg2[%c0, %c0_0] : memref<32x256xbf16, #tpu.memory_space<vmem>>, vector<32x256xbf16>
    %c0_1 = arith.constant 0 : index
    %c0_2 = arith.constant 0 : index
    %1 = vector.load %arg3[%c0_1, %c0_2] : memref<256x128xbf16, #tpu.memory_space<vmem>>, vector<256x128xbf16>
    %cst = arith.constant dense<0.000000e+00> : vector<32x128xf32>
    %2 = tpu.matmul %0, %1, %cst {dimension_numbers = #tpu.dot_dimension_numbers<[1], [0], [0], [1], [0, 0, 1, 1], [], []>} : vector<32x256xbf16>, vector<256x128xbf16>, vector<32x128xf32> -> vector<32x128xf32>
    %c0_3 = arith.constant 0 : index
    %c0_4 = arith.constant 0 : index
    %3 = vector.load %arg4[%c0_3, %c0_4] : memref<1x128xf32, #tpu.memory_space<vmem>>, vector<1x128xf32>
    %4 = vector.broadcast %3 : vector<1x128xf32> to vector<32x128xf32>
    %5 = arith.addf %2, %4 : vector<32x128xf32>
    %c0_5 = arith.constant 0 : index
    %c0_6 = arith.constant 0 : index
    %6 = vector.load %arg5[%c0_5, %c0_6] : memref<32x128xbf16, #tpu.memory_space<vmem>>, vector<32x128xbf16>
    %7 = arith.extf %6 : vector<32x128xbf16> to vector<32x128xf32>
    %8 = arith.addf %5, %7 : vector<32x128xf32>
    %9 = arith.truncf %8 : vector<32x128xf32> to vector<32x128xbf16>
    %c0_7 = arith.constant 0 : index
    %c0_8 = arith.constant 0 : index
    %10 = vector.load %arg6[%c0_7, %c0_8] : memref<32x128xbf16, #tpu.memory_space<vmem>>, vector<32x128xbf16>
    tpu.vector_store %arg6[%c0_7, %c0_8], %9 {strides = array<i32>} : memref<32x128xbf16, #tpu.memory_space<vmem>>, vector<32x128xbf16>,
    return
  }
  func.func @transform_0(%arg0: i32, %arg1: i32) -> (i32, i32) {
    %c0_i32 = arith.constant 0 : i32
    %c0_i32_0 = arith.constant 0 : i32
    return %arg0, %c0_i32 : i32, i32
  }
  func.func @transform_1(%arg0: i32, %arg1: i32) -> (i32, i32) {
    %c0_i32 = arith.constant 0 : i32
    %c0_i32_0 = arith.constant 0 : i32
    return %c0_i32, %arg1 : i32, i32
  }
  func.func @transform_2(%arg0: i32, %arg1: i32) -> (i32, i32) {
    %c0_i32 = arith.constant 0 : i32
    %c0_i32_0 = arith.constant 0 : i32
    return %c0_i32, %arg1 : i32, i32
  }
  func.func @transform_3(%arg0: i32, %arg1: i32) -> (i32, i32) {
    %c0_i32 = arith.constant 0 : i32
    return %arg0, %arg1 : i32, i32
  }
  func.func @transform_4(%arg0: i32, %arg1: i32) -> (i32, i32) {
    %c0_i32 = arith.constant 0 : i32
    return %arg0, %arg1 : i32, i32
  }
}

module attributes {stable_mosaic.version = 11 : i64} {
  func.func @kernel(%arg0: i32, %arg1: i32, %arg2: memref<32x256xbf16, #tpu.memory_space<vmem>>, %arg3: memref<256x256xbf16, #tpu.memory_space<vmem>>, %arg4: memref<1x256xf32, #tpu.memory_space<vmem>>, %arg5: memref<32x256xbf16, #tpu.memory_space<vmem>>) attributes {dimension_semantics = [#tpu.dimension_semantics<parallel>, #tpu.dimension_semantics<parallel>], iteration_bounds = array<i64: 1, 2>, scalar_prefetch = 0 : i64, scratch_operands = 0 : i64, tpu.core_type = #tpu.core_type<tc>, window_params = [{transform_indices = @transform_0, window_bounds = array<i64: 32, 256>}, {transform_indices = @transform_1, window_bounds = array<i64: 256, 256>}, {transform_indices = @transform_2, window_bounds = array<i64: 1, 256>}, {transform_indices = @transform_3, window_bounds = array<i64: 32, 256>}]} {
    %c0 = arith.constant 0 : index
    %c0_0 = arith.constant 0 : index
    %0 = vector.load %arg2[%c0, %c0_0] : memref<32x256xbf16, #tpu.memory_space<vmem>>, vector<32x256xbf16>
    %c0_1 = arith.constant 0 : index
    %c0_2 = arith.constant 0 : index
    %1 = vector.load %arg3[%c0_1, %c0_2] : memref<256x256xbf16, #tpu.memory_space<vmem>>, vector<256x256xbf16>
    %cst = arith.constant dense<0.000000e+00> : vector<32x256xf32>
    %2 = tpu.matmul %0, %1, %cst {dimension_numbers = #tpu.dot_dimension_numbers<[1], [0], [0], [1], [0, 0, 1, 1], [], []>} : vector<32x256xbf16>, vector<256x256xbf16>, vector<32x256xf32> -> vector<32x256xf32>
    %c0_3 = arith.constant 0 : index
    %c0_4 = arith.constant 0 : index
    %3 = vector.load %arg4[%c0_3, %c0_4] : memref<1x256xf32, #tpu.memory_space<vmem>>, vector<1x256xf32>
    %4 = vector.broadcast %3 : vector<1x256xf32> to vector<32x256xf32>
    %5 = arith.addf %2, %4 : vector<32x256xf32>
    %cst_5 = arith.constant 5.000000e-01 : f32
    %6 = vector.broadcast %cst_5 : f32 to vector<32x256xf32>
    %7 = arith.mulf %6, %5 : vector<32x256xf32>
    %cst_6 = arith.constant 4.471500e-02 : f32
    %8 = vector.broadcast %cst_6 : f32 to vector<32x256xf32>
    %9 = arith.mulf %8, %5 : vector<32x256xf32>
    %10 = arith.mulf %9, %5 : vector<32x256xf32>
    %11 = arith.mulf %10, %5 : vector<32x256xf32>
    %12 = arith.addf %5, %11 : vector<32x256xf32>
    %cst_7 = arith.constant 0.797884583 : f32
    %13 = vector.broadcast %cst_7 : f32 to vector<32x256xf32>
    %14 = arith.mulf %13, %12 : vector<32x256xf32>
    %15 = math.tanh %14 : vector<32x256xf32>
    %cst_8 = arith.constant 1.000000e+00 : f32
    %16 = vector.broadcast %cst_8 : f32 to vector<32x256xf32>
    %17 = arith.addf %16, %15 : vector<32x256xf32>
    %18 = arith.mulf %7, %17 : vector<32x256xf32>
    %19 = arith.truncf %18 : vector<32x256xf32> to vector<32x256xbf16>
    %c0_9 = arith.constant 0 : index
    %c0_10 = arith.constant 0 : index
    %20 = vector.load %arg5[%c0_9, %c0_10] : memref<32x256xbf16, #tpu.memory_space<vmem>>, vector<32x256xbf16>
    tpu.vector_store %arg5[%c0_9, %c0_10], %19 {strides = array<i32>} : memref<32x256xbf16, #tpu.memory_space<vmem>>, vector<32x256xbf16>,
    return
  }
  func.func @transform_0(%arg0: i32, %arg1: i32) -> (i32, i32) {
    %c0_i32 = arith.constant 0 : i32
    %c0_i32_0 = arith.constant 0 : i32
    return %arg0, %c0_i32 : i32, i32
  }
  func.func @transform_1(%arg0: i32, %arg1: i32) -> (i32, i32) {
    %c0_i32 = arith.constant 0 : i32
    %c0_i32_0 = arith.constant 0 : i32
    return %c0_i32, %arg1 : i32, i32
  }
  func.func @transform_2(%arg0: i32, %arg1: i32) -> (i32, i32) {
    %c0_i32 = arith.constant 0 : i32
    %c0_i32_0 = arith.constant 0 : i32
    return %c0_i32, %arg1 : i32, i32
  }
  func.func @transform_3(%arg0: i32, %arg1: i32) -> (i32, i32) {
    %c0_i32 = arith.constant 0 : i32
    return %arg0, %arg1 : i32, i32
  }
}

module attributes {stable_mosaic.version = 11 : i64} {
  func.func @kernel(%arg0: i32, %arg1: i32, %arg2: memref<32x512xbf16, #tpu.memory_space<vmem>>, %arg3: memref<512x128xbf16, #tpu.memory_space<vmem>>, %arg4: memref<1x128xf32, #tpu.memory_space<vmem>>, %arg5: memref<32x128xbf16, #tpu.memory_space<vmem>>, %arg6: memref<32x128xbf16, #tpu.memory_space<vmem>>) attributes {dimension_semantics = [#tpu.dimension_semantics<parallel>, #tpu.dimension_semantics<parallel>], iteration_bounds = array<i64: 1, 2>, scalar_prefetch = 0 : i64, scratch_operands = 0 : i64, tpu.core_type = #tpu.core_type<tc>, window_params = [{transform_indices = @transform_0, window_bounds = array<i64: 32, 512>}, {transform_indices = @transform_1, window_bounds = array<i64: 512, 128>}, {transform_indices = @transform_2, window_bounds = array<i64: 1, 128>}, {transform_indices = @transform_3, window_bounds = array<i64: 32, 128>}, {transform_indices = @transform_4, window_bounds = array<i64: 32, 128>}]} {
    %c0 = arith.constant 0 : index
    %c0_0 = arith.constant 0 : index
    %0 = vector.load %arg2[%c0, %c0_0] : memref<32x512xbf16, #tpu.memory_space<vmem>>, vector<32x512xbf16>
    %c0_1 = arith.constant 0 : index
    %c0_2 = arith.constant 0 : index
    %1 = vector.load %arg3[%c0_1, %c0_2] : memref<512x128xbf16, #tpu.memory_space<vmem>>, vector<512x128xbf16>
    %cst = arith.constant dense<0.000000e+00> : vector<32x128xf32>
    %2 = tpu.matmul %0, %1, %cst {dimension_numbers = #tpu.dot_dimension_numbers<[1], [0], [0], [1], [0, 0, 1, 1], [], []>} : vector<32x512xbf16>, vector<512x128xbf16>, vector<32x128xf32> -> vector<32x128xf32>
    %c0_3 = arith.constant 0 : index
    %c0_4 = arith.constant 0 : index
    %3 = vector.load %arg4[%c0_3, %c0_4] : memref<1x128xf32, #tpu.memory_space<vmem>>, vector<1x128xf32>
    %4 = vector.broadcast %3 : vector<1x128xf32> to vector<32x128xf32>
    %5 = arith.addf %2, %4 : vector<32x128xf32>
    %c0_5 = arith.constant 0 : index
    %c0_6 = arith.constant 0 : index
    %6 = vector.load %arg5[%c0_5, %c0_6] : memref<32x128xbf16, #tpu.memory_space<vmem>>, vector<32x128xbf16>
    %7 = arith.extf %6 : vector<32x128xbf16> to vector<32x128xf32>
    %8 = arith.addf %5, %7 : vector<32x128xf32>
    %9 = arith.truncf %8 : vector<32x128xf32> to vector<32x128xbf16>
    %c0_7 = arith.constant 0 : index
    %c0_8 = arith.constant 0 : index
    %10 = vector.load %arg6[%c0_7, %c0_8] : memref<32x128xbf16, #tpu.memory_space<vmem>>, vector<32x128xbf16>
    tpu.vector_store %arg6[%c0_7, %c0_8], %9 {strides = array<i32>} : memref<32x128xbf16, #tpu.memory_space<vmem>>, vector<32x128xbf16>,
    return
  }
  func.func @transform_0(%arg0: i32, %arg1: i32) -> (i32, i32) {
    %c0_i32 = arith.constant 0 : i32
    %c0_i32_0 = arith.constant 0 : i32
    return %arg0, %c0_i32 : i32, i32
  }
  func.func @transform_1(%arg0: i32, %arg1: i32) -> (i32, i32) {
    %c0_i32 = arith.constant 0 : i32
    %c0_i32_0 = arith.constant 0 : i32
    return %c0_i32, %arg1 : i32, i32
  }
  func.func @transform_2(%arg0: i32, %arg1: i32) -> (i32, i32) {
    %c0_i32 = arith.constant 0 : i32
    %c0_i32_0 = arith.constant 0 : i32
    return %c0_i32, %arg1 : i32, i32
  }
  func.func @transform_3(%arg0: i32, %arg1: i32) -> (i32, i32) {
    %c0_i32 = arith.constant 0 : i32
    return %arg0, %arg1 : i32, i32
  }
  func.func @transform_4(%arg0: i32, %arg1: i32) -> (i32, i32) {
    %c0_i32 = arith.constant 0 : i32
    return %arg0, %arg1 : i32, i32
  }
}

module attributes {stable_mosaic.version = 11 : i64} {
  func.func @kernel(%arg0: i32, %arg1: i32, %arg2: memref<32x256xbf16, #tpu.memory_space<vmem>>, %arg3: memref<256x256xbf16, #tpu.memory_space<vmem>>, %arg4: memref<32x256xbf16, #tpu.memory_space<vmem>>) attributes {dimension_semantics = [#tpu.dimension_semantics<parallel>, #tpu.dimension_semantics<parallel>], iteration_bounds = array<i64: 1, 3>, scalar_prefetch = 0 : i64, scratch_operands = 0 : i64, tpu.core_type = #tpu.core_type<tc>, window_params = [{transform_indices = @transform_0, window_bounds = array<i64: 32, 256>}, {transform_indices = @transform_1, window_bounds = array<i64: 256, 256>}, {transform_indices = @transform_2, window_bounds = array<i64: 32, 256>}]} {
    %c0 = arith.constant 0 : index
    %c0_0 = arith.constant 0 : index
    %0 = vector.load %arg2[%c0, %c0_0] : memref<32x256xbf16, #tpu.memory_space<vmem>>, vector<32x256xbf16>
    %c0_1 = arith.constant 0 : index
    %c0_2 = arith.constant 0 : index
    %1 = vector.load %arg3[%c0_1, %c0_2] : memref<256x256xbf16, #tpu.memory_space<vmem>>, vector<256x256xbf16>
    %cst = arith.constant dense<0.000000e+00> : vector<32x256xf32>
    %2 = tpu.matmul %0, %1, %cst {dimension_numbers = #tpu.dot_dimension_numbers<[1], [0], [0], [1], [0, 0, 1, 1], [], []>} : vector<32x256xbf16>, vector<256x256xbf16>, vector<32x256xf32> -> vector<32x256xf32>
    %3 = arith.truncf %2 : vector<32x256xf32> to vector<32x256xbf16>
    %c0_3 = arith.constant 0 : index
    %c0_4 = arith.constant 0 : index
    %4 = vector.load %arg4[%c0_3, %c0_4] : memref<32x256xbf16, #tpu.memory_space<vmem>>, vector<32x256xbf16>
    tpu.vector_store %arg4[%c0_3, %c0_4], %3 {strides = array<i32>} : memref<32x256xbf16, #tpu.memory_space<vmem>>, vector<32x256xbf16>,
    return
  }
  func.func @transform_0(%arg0: i32, %arg1: i32) -> (i32, i32) {
    %c0_i32 = arith.constant 0 : i32
    %c0_i32_0 = arith.constant 0 : i32
    return %arg0, %c0_i32 : i32, i32
  }
  func.func @transform_1(%arg0: i32, %arg1: i32) -> (i32, i32) {
    %c0_i32 = arith.constant 0 : i32
    %c0_i32_0 = arith.constant 0 : i32
    return %c0_i32, %arg1 : i32, i32
  }
  func.func @transform_2(%arg0: i32, %arg1: i32) -> (i32, i32) {
    %c0_i32 = arith.constant 0 : i32
    return %arg0, %arg1 : i32, i32
  }
}

module attributes {stable_mosaic.version = 11 : i64} {
  func.func @_attention_kernel(%arg0: i32, %arg1: i32, %arg2: memref<16x128xbf16, #tpu.memory_space<vmem>>, %arg3: memref<16x128xbf16, #tpu.memory_space<vmem>>, %arg4: memref<16x128xbf16, #tpu.memory_space<vmem>>, %arg5: memref<16x128xbf16, #tpu.memory_space<vmem>>) attributes {dimension_semantics = [#tpu.dimension_semantics<parallel>, #tpu.dimension_semantics<parallel>], iteration_bounds = array<i64: 2, 2>, scalar_prefetch = 0 : i64, scratch_operands = 0 : i64, tpu.core_type = #tpu.core_type<tc>, window_params = [{transform_indices = @transform_0, window_bounds = array<i64: 16, 128>}, {transform_indices = @transform_1, window_bounds = array<i64: 16, 128>}, {transform_indices = @transform_2, window_bounds = array<i64: 16, 128>}, {transform_indices = @transform_3, window_bounds = array<i64: 16, 128>}]} {
    %c0 = arith.constant 0 : index
    %c0_0 = arith.constant 0 : index
    %0 = vector.load %arg2[%c0, %c0_0] : memref<16x128xbf16, #tpu.memory_space<vmem>>, vector<16x128xbf16>
    %c0_1 = arith.constant 0 : index
    %c0_2 = arith.constant 0 : index
    %1 = vector.load %arg3[%c0_1, %c0_2] : memref<16x128xbf16, #tpu.memory_space<vmem>>, vector<16x128xbf16>
    %cst = arith.constant dense<0.000000e+00> : vector<16x16xf32>
    %2 = tpu.matmul %0, %1, %cst {dimension_numbers = #tpu.dot_dimension_numbers<[1], [1], [0], [0], [0, 0, 1, 0], [], []>} : vector<16x128xbf16>, vector<16x128xbf16>, vector<16x16xf32> -> vector<16x16xf32>
    %cst_3 = arith.constant dense<0xFF800000> : vector<16xf32>
    %3 = vector.multi_reduction <maximumf>, %2, %cst_3 [1] : vector<16x16xf32> to vector<16xf32>
    %4 = vector.shape_cast %3 : vector<16xf32> to vector<16x1xf32>
    %5 = vector.broadcast %4 : vector<16x1xf32> to vector<16x16xf32>
    %6 = arith.subf %2, %5 : vector<16x16xf32>
    %7 = math.exp %6 : vector<16x16xf32>
    %cst_4 = arith.constant dense<0.000000e+00> : vector<16xf32>
    %8 = vector.multi_reduction <add>, %7, %cst_4 [1] : vector<16x16xf32> to vector<16xf32>
    %9 = vector.shape_cast %8 : vector<16xf32> to vector<16x1xf32>
    %10 = arith.truncf %7 : vector<16x16xf32> to vector<16x16xbf16>
    %c0_5 = arith.constant 0 : index
    %c0_6 = arith.constant 0 : index
    %11 = vector.load %arg4[%c0_5, %c0_6] : memref<16x128xbf16, #tpu.memory_space<vmem>>, vector<16x128xbf16>
    %cst_7 = arith.constant dense<0.000000e+00> : vector<16x128xf32>
    %12 = tpu.matmul %10, %11, %cst_7 {dimension_numbers = #tpu.dot_dimension_numbers<[1], [0], [0], [1], [0, 0, 1, 1], [], []>} : vector<16x16xbf16>, vector<16x128xbf16>, vector<16x128xf32> -> vector<16x128xf32>
    %13 = tpu.reciprocal %9 {approx = true} : vector<16x1xf32> -> vector<16x1xf32>
    %14 = vector.broadcast %13 : vector<16x1xf32> to vector<16x128xf32>
    %15 = arith.mulf %12, %14 : vector<16x128xf32>
    %16 = arith.truncf %15 : vector<16x128xf32> to vector<16x128xbf16>
    %c0_8 = arith.constant 0 : index
    %c0_9 = arith.constant 0 : index
    %17 = vector.load %arg5[%c0_8, %c0_9] : memref<16x128xbf16, #tpu.memory_space<vmem>>, vector<16x128xbf16>
    tpu.vector_store %arg5[%c0_8, %c0_9], %16 {strides = array<i32>} : memref<16x128xbf16, #tpu.memory_space<vmem>>, vector<16x128xbf16>,
    return
  }
  func.func @transform_0(%arg0: i32, %arg1: i32) -> (i32, i32) {
    %c0_i32 = arith.constant 0 : i32
    %0 = arith.addi %c0_i32, %arg1 : i32
    %c0_i32_0 = arith.constant 0 : i32
    return %arg0, %0 : i32, i32
  }
  func.func @transform_1(%arg0: i32, %arg1: i32) -> (i32, i32) {
    %c2_i32 = arith.constant 2 : i32
    %0 = arith.addi %c2_i32, %arg1 : i32
    %c0_i32 = arith.constant 0 : i32
    return %arg0, %0 : i32, i32
  }
  func.func @transform_2(%arg0: i32, %arg1: i32) -> (i32, i32) {
    %c4_i32 = arith.constant 4 : i32
    %0 = arith.addi %c4_i32, %arg1 : i32
    %c0_i32 = arith.constant 0 : i32
    return %arg0, %0 : i32, i32
  }
  func.func @transform_3(%arg0: i32, %arg1: i32) -> (i32, i32) {
    %c0_i32 = arith.constant 0 : i32
    return %arg0, %arg1 : i32, i32
  }
}

</mosaic_0001>

<bundles_post_ra>
// kernel: _lambda_.16
= control target key start
LH: loop header
LB: loop body
LE: loop exit
PB: predicated region body
PF: predicated region fallthrough
CT: control target
= control target key end

     0   :  { %s381_s12 = smov 0   ;;  %s411_s0 = inlined_call_operand.vmem [shape: bf16[32,256], index: 0, kind: input, shape index: {}]   ;;  %s412_s1 = inlined_call_operand.vmem [shape: f32[1,256], index: 1, kind: input, shape index: {}]   ;;  %s413_s2 = inlined_call_operand.vmem [shape: f32[1,256], index: 2, kind: input, shape index: {}]   ;;  %s414_s3 = inlined_call_operand.vmem [shape: bf16[32,256], index: 3, kind: output, shape index: {}]  }
   0x1 LB: > { %s322_s13 = sadd.s32 4294967295, %s359_s12   ;;  %p326_p0 = scmp.ge.s32.totalorder %s359_s12, 1  ;;  %s359_s12 = sphi %s381_s12, %s13_s12  }
   0x2   : > { %p139_p1 = scmp.lt.s32.totalorder %s359_s12, 3 }
   0x4   : > { %p140_p2 = pnand %p326_p0, %p139_p1 }
   0x5   : > { %s327_s14 = sshll.u32 (!%p140_p2), %s322_s13, 1  ;;  %v220_v24 = vlaneseq (!%p140_p2)  ;;  %v218_v32 = vld [vmem:[%s412_s1] sm:$0x3] (!%p140_p2) }
   0x6   : > { %143 = sbr.rel (%p140_p2) target bundleno = 341 (0x155), region = 32  ;;  %p166_p3 = scmp.lt.s32.totalorder (!%p140_p2), %s327_s14, 3  ;;  %v234_v33 = vld [vmem:[%s413_s2] sm:$0x3] (!%p140_p2) }
   0x7   : > { %v221_v28 = vshrl.u32 (!%p140_p2), %v220_v24, 7 }
   0x9   : > { %v222_v30 = vsub.s32 (!%p140_p2), 0, %v221_v28  ;;  %v226_v31 = vsub.s32 (!%p140_p2), 1, %v221_v28 }
   0xb   : > { %v223_v34 = vrot.slane (!%p140_p2), %v218_v32, %v222_v30  ;;  %v227_v35 = vrot.slane (!%p140_p2), %v218_v32, %v226_v31  ;;  %v239_v37 = vrot.slane (!%p140_p2), %v234_v33, %v222_v30  ;;  %v243_v38 = vrot.slane (!%p140_p2), %v234_v33, %v226_v31 }
   0xd   : > { %s416_s14 = smov (!%p166_p3, %s327_s14), 3 }
   0xe   : > { %s337_s15 = sshll.u32 %s416_s14, 3 }
   0xf   : > { %s170_s18 = scalar_lea.vmem %s411_s0, %s337_s15  ;;  %s177_s25 = scalar_lea.vmem %s414_s3, %s337_s15 }
  0x10   : > { %v179_v0 = vld [vmem:[%s170_s18] sm:$0xff]  ;;  %v180_v1 = vld [vmem:[%s170_s18 + $0x8] sm:$0xff] }
  0x11   : > { %v181_v2 = vunpack.c.l.bf16 %v179_v0  ;;  %v182_v3 = vunpack.c.h.bf16 %v179_v0  ;;  %v183_v4 = vunpack.c.l.bf16 %v180_v1  ;;  %v184_v5 = vunpack.c.h.bf16 %v180_v1 }
  0x13   : > { %v185_v6 = vadd.f32 %v182_v3, %v181_v2  ;;  %v188_v7 = vadd.f32 %v184_v5, %v183_v4 }
  0x15   : > { %186 = vadd.xlane.f32.xlu0 %v185_v6 }
  0x19   : > { %189 = vadd.xlane.f32.xlu0 %v188_v7 }
  0xa2   : > { %v187_v8 = vpop.xlane.xlu0 %186 }
  0xa3   : > { %v192_v9 = vmul.f32 0.00390625, %v187_v8 }
  0xa5   : > { %v194_v10 = vsub.f32 %v181_v2, %v192_v9  ;;  %v195_v11 = vsub.f32 %v182_v3, %v192_v9 }
  0xa6   : > { %v190_v12 = vpop.xlane.xlu0 %189 }
  0xa7   : > { %v193_v13 = vmul.f32 0.00390625, %v190_v12  ;;  %v198_v14 = vmul.f32 %v194_v10, %v194_v10  ;;  %v199_v15 = vmul.f32 %v195_v11, %v195_v11 }
  0xa9   : > { %v196_v16 = vsub.f32 %v183_v4, %v193_v13  ;;  %v197_v17 = vsub.f32 %v184_v5, %v193_v13  ;;  %v202_v18 = vadd.f32 %v199_v15, %v198_v14 }
  0xab   : > { %203 = vadd.xlane.f32.xlu1 %v202_v18  ;;  %v200_v19 = vmul.f32 %v196_v16, %v196_v16  ;;  %v201_v20 = vmul.f32 %v197_v17, %v197_v17 }
  0xad   : > { %v205_v21 = vadd.f32 %v201_v20, %v200_v19 }
  0xaf   : > { %206 = vadd.xlane.f32.xlu1 %v205_v21 }
 0x138   : > { %v204_v22 = vpop.xlane.xlu1 %203 }
 0x139   : > { %v208_v23 = vmul.f32 0.00390625, %v204_v22 }
 0x13b   : > { %v210_v25 = vadd.f32 1e-05, %v208_v23 }
 0x13c   : > { %v207_v26 = vpop.xlane.xlu1 %206 }
 0x13d   : > { %349 = vrsqrt.f32 %v210_v25  ;;  %v209_v27 = vmul.f32 0.00390625, %v207_v26 }
 0x13f   : > { %v211_v29 = vadd.f32 1e-05, %v209_v27 }
 0x141   : > { %351 = vrsqrt.f32 %v211_v29 }
 0x147   : > { %v350_v36 = vpop.eup %349 }
 0x148   : > { %v214_v39 = vmul.f32 %v350_v36, %v194_v10  ;;  %v215_v40 = vmul.f32 %v350_v36, %v195_v11 }
 0x14a   : > { %v230_v41 = vmul.f32 %v223_v34, %v214_v39  ;;  %v231_v42 = vmul.f32 %v227_v35, %v215_v40 }
 0x14b   : > { %v352_v43 = vpop.eup %351 }
 0x14c   : > { %v246_v44 = vadd.f32 %v239_v37, %v230_v41  ;;  %v247_v45 = vadd.f32 %v243_v38, %v231_v42  ;;  %v216_v46 = vmul.f32 %v352_v43, %v196_v16  ;;  %v217_v47 = vmul.f32 %v352_v43, %v197_v17 }
 0x14e   : > { %v339_v48 = vpack.c.bf16 %v247_v45, %v246_v44  ;;  %v232_v49 = vmul.f32 %v223_v34, %v216_v46  ;;  %v233_v50 = vmul.f32 %v227_v35, %v217_v47 }
 0x150   : > { %262 = vst [vmem:[%s177_s25] sm:$0xff] %v339_v48  ;;  %v248_v51 = vadd.f32 %v239_v37, %v232_v49  ;;  %v249_v52 = vadd.f32 %v243_v38, %v233_v50 }
 0x152   : > { %v340_v53 = vpack.c.bf16 %v249_v52, %v248_v51 }
 0x154   : > { %263 = vst [vmem:[%s177_s25 + $0x8] sm:$0xff] %v340_v53 }
 0x155 PF: > { %s13_s12 = sadd.s32 1, %s359_s12  }
 0x156   : > { %p10_p4 = scmp.ge.s32.totalorder %s13_s12, 4  }
 0x158   :  { %12 = sbr.rel (!%p10_p4) target bundleno = 1 (0x1), region = 62 }

// kernel: _lambda_.19
= control target key start
LH: loop header
LB: loop body
LE: loop exit
PB: predicated region body
PF: predicated region fallthrough
CT: control target
= control target key end

     0   :  { %7 = vsyncpa [#allocation3], 0  ;;  %s1013_s0 = inlined_call_operand.vmem [shape: bf16[32,256], index: 0, kind: input, shape index: {}]   ;;  %s1014_s1 = inlined_call_operand.hbm [shape: bf16[256,256], index: 1, kind: input, shape index: {}]   ;;  %s1015_s2 = inlined_call_operand.vmem [shape: bf16[32,256], index: 2, kind: output, shape index: {}]  }
   0x1   :  { %9 = vsyncpa [#allocation3 + $0x1], 0  ;;  %s847_s9 = smov 0   ;;  %s849_s10 = smov 0  }
   0x2   :  { %s851_s11 = smov 0   ;;  %s853_s12 = smov 0  }
   0x3   :  { %s855_s13 = smov 0   ;;  %s857_s14 = smov 0  }
   0x4 LB: > { %s569_s15 = sadd.s32 4294967295, %s826_s14   ;;  %s24_s16 = sadd.s32 1, %s822_s13  ;;  %s826_s14 = sphi %s857_s14, %s15_s14   ;;  %s822_s13 = sphi %s855_s13, %s1026_s13   ;;  %s818_s12 = sphi %s853_s12, %s1025_s12   ;;  %s814_s11 = sphi %s851_s11, %s1024_s11   ;;  %s810_s10 = sphi %s849_s10, %s1023_s10   ;;  %s806_s9 = sphi %s847_s9, %s1022_s9  }
   0x5   : > { %p25_p0 = scmp.ge.s32.totalorder %s24_s16, 2  ;;  %s60_s17 = sadd.s32 1, %s814_s11 }
   0x6   : > { %p67_p1 = scmp.ne.s32.totalorder %s814_s11, %s810_s10  ;;  %p68_p2 = scmp.eq.s32.totalorder %s826_s14, 0 }
   0x7   : > { %s1028_s16 = smov (%p25_p0, %s24_s16), 0  ;;  %p73_p4 = scmp.ne.s32.totalorder %s810_s10, %s806_s9 }
   0x8   : > { %p883_p3 = por %p68_p2, %p67_p1  ;;  %s57_s19 = ssub.s32 %s822_s13, %s1028_s16 }
   0x9   : > { %p74_p5 = scmp.eq.s32.totalorder %s569_s15, 0  ;;  %p58_p6 = scmp.eq.s32.totalorder %s57_s19, 0 }
   0xa   : > { %p99_p7 = scmp.eq.s32.totalorder %s569_s15, 1  ;;  %p672_p10 = scmp.lt.s32.totalorder %s826_s14, 2 }
   0xb   : > { %p890_p8 = por %p74_p5, %p73_p4  ;;  %s135_s23 = sand.u32 1, %s814_s11  }
   0xc   : > { %s895_s21 = scalar_select %p58_p6, %s814_s11, %s60_s17  }
   0xd   : > { %p897_p9 = por %p99_p7, %p67_p1  ;;  %s575_s24 = sshll.u32 %s822_s13, 6 }
   0xe   : > { %s574_s25 = sshll.u32 %s135_s23, 7  ;;  %s907_s28 = scalar_lea.hbm %s1014_s1, %s575_s24 }
   0xf   : > { %s1018_s22 = scalar_select %p897_p9, 1, 0 }
  0x10   : > { %s139_s29 = scalar_lea.vmem [#allocation2], %s574_s25  ;;  %p911_p11 = pnand %p672_p10, %p883_p3 }
  0x11   : > { %s145_s30 = sshll.u32 %s139_s29, 4  ;;  %s918_s4 = scalar_lea.sflag [#allocation3], %s135_s23  ;;  %s915_s30 = int_to_ptr.vmem [resolvable:$true] %s145_s30 }
  0x12   : > { %s746_s5 = scalar_lea.hbm %s907_s28, 2048  ;;  %p748_p0 = pneg %p911_p11 }
  0x13   : > { %p747_p13 = scmp.ne.s32.totalorder %s907_s28, %s746_s5  ;;  %s751_s8 = scalar_lea.hbm %s1014_s1, 4096 }
  0x14   : > { %p752_p3 = scmp.lt.u32.totalorder %s907_s28, %s1014_s1  ;;  %p753_p4 = scmp.lt.u32.totalorder %s751_s8, %s746_s5 }
  0x15   : > { %p749_p1 = pnand %p748_p0, %p747_p13  ;;  %p755_p6 = scmp.lt.u32.totalorder %s746_s5, %s907_s28 }
  0x16   : > { %p754_p5 = por %p753_p4, %p752_p3 }
  0x17   : > { %p750_p2 = pneg %p749_p1 }
  0x18   : > { %p756_p7 = por %p755_p6, %p754_p5 }
  0x1a   : > { %p757_p10 = pnand %p756_p7, %p750_p2 }
  0x1c   : > { %760 = shalt.err (!%p757_p10)
}
  0x1d   : > { %s761_s17 = scalar_lea.vmem %s915_s30, 2048  ;;  %s828_s18 = smov [#allocation2]  }
  0x1e   : > { %p762_p13 = scmp.ne.s32.totalorder %s915_s30, %s761_s17  ;;  %s766_s19 = sshll.u32 %s828_s18, 4  ;;  %s767_s19 = int_to_ptr.vmem [resolvable:$false] %s766_s19 }
  0x1f   : > { %s768_s23 = scalar_lea.vmem %s767_s19, 4096  ;;  %p769_p9 = scmp.lt.s32.totalorder %s915_s30, %s767_s19 }
  0x20   : > { %p764_p1 = pnand %p762_p13, %p748_p0  ;;  %p770_p3 = scmp.lt.s32.totalorder %s768_s23, %s761_s17 }
  0x22   : > { %p765_p12 = pneg %p764_p1  ;;  %p771_p4 = por %p770_p3, %p769_p9 }
  0x24   : > { %p772_p5 = pnand %p771_p4, %p765_p12 }
  0x26   : > { %775 = shalt.err (!%p772_p5)
}
  0x27   : > { %s829_s24 = smov 128   ;;  %s830_s25 = smov 64  }
  0x28   : > { %s831_s26 = smov 4   ;;  %p153_p0 = scmp.lt.s32.totalorder %s826_s14, 3 }
  0x29   : > { %671 = dma.hbm_to_vmem [thread:$0]  (!%p911_p11), %s907_s28, 2048, %s915_s30, %s918_s4, %s829_s24, %s830_s25, %s831_s26  }
  0x2a   : > { %p1020_p2 = scmp.ge.s32.totalorder %s826_s14, 1 }
  0x2c   : > { %p154_p6 = pnand %p1020_p2, %p153_p0 }
  0x2d   : > { %s950_s27 = sand.u32 (!%p154_p6), 1, %s810_s10  }
  0x2e   : > { %157 = sbr.rel (%p154_p6) target bundleno = 316 (0x13c), region = 28  ;;  %s577_s29 = sshll.u32 (!%p154_p6), %s950_s27, 7 }
  0x2f   : > { %s160_s5 = scalar_lea.sflag (!%p154_p6), [#allocation3], %s950_s27  ;;  %s954_s6 = scalar_lea.vmem (!%p154_p6), [#allocation2], %s577_s29 }
  0x35   : > { %801 = dma.done.wait (%p890_p8), %s160_s5, 2048  }
  0x36   : > { %803 = vsyncadd (%p890_p8), %s160_s5, 4294965248  ;;  %v724_v0 = vld [vmem:[%s954_s6 + $0x40] sm:$0xff]   ;;  %v726_v2 = vld [vmem:[%s954_s6 + $0x48] sm:$0xff]   ;;  %s578_s15 = sshll.u32 %s950_s27, 4  ;;  %p1021_p8 = scmp.ne.s32.totalorder %s1018_s22, 0 }
  0x37   : > { %v725_v1 = vld [vmem:[%s954_s6] sm:$0xff]   ;;  %622 = vmatprep.subr.bf16.mxu0 %v724_v0  ;;  %650 = vmatprep.subr.bf16.mxu1 %v724_v0  ;;  %v727_v3 = vld [vmem:[%s954_s6 + $0x8] sm:$0xff]   ;;  %v728_v4 = vld [vmem:[%s954_s6 + $0x50] sm:$0xff]   ;;  %s188_s17 = scalar_lea.vmem [#allocation4], %s578_s15  ;;  %s604_s18 = sshll.u32 (%p1021_p8), %s818_s12, 2 }
  0x38   : > { %623 = vmatpush3.bf16.msra.mxu0 %v725_v1  ;;  %658 = vmatpush3.bf16.msra.mxu1 %v725_v1  ;;  %v729_v5 = vld [vmem:[%s954_s6 + $0x10] sm:$0xff]   ;;  %v730_v6 = vld [vmem:[%s954_s6 + $0x58] sm:$0xff]   ;;  %v732_v8 = vld [vmem:[%s954_s6 + $0x60] sm:$0xff]   ;;  %s430_s24 = scalar_lea.vmem (%p1021_p8), %s1015_s2, %s604_s18 }
  0x39   : > { %624 = vmatprep.subr.bf16.mxu0 %v726_v2  ;;  %651 = vmatprep.subr.bf16.mxu1 %v726_v2  ;;  %v731_v7 = vld [vmem:[%s954_s6 + $0x18] sm:$0xff]   ;;  %v733_v9 = vld [vmem:[%s954_s6 + $0x20] sm:$0xff]   ;;  %v734_v10 = vld [vmem:[%s954_s6 + $0x68] sm:$0xff]  }
  0x3a   : > { %v742_v11 = vld [vmem:[%s1013_s0 + $0x4] ss:$8 sps:$4 sm:$0xff]   ;;  %v745_v12 = vld [vmem:[%s1013_s0 + $0x14] ss:$8 sps:$4 sm:$0xff]   ;;  %v740_v18 = vld [vmem:[%s1013_s0] ss:$8 sps:$4 sm:$0xff]  }
  0x3b   : > { %v735_v13 = vld [vmem:[%s954_s6 + $0x28] sm:$0xff]   ;;  %v736_v14 = vld [vmem:[%s954_s6 + $0x70] sm:$0xff]   ;;  %382 = vmatprep.mubr.bf16.mxu0 %v742_v11  ;;  %390 = vmatprep.mubr.bf16.mxu1 %v745_v12  ;;  %v738_v16 = vld [vmem:[%s954_s6 + $0x78] sm:$0xff]  }
  0x3c   : > { %625 = vmatpush3.bf16.msra.mxu0 %v727_v3  ;;  %659 = vmatpush3.bf16.msra.mxu1 %v727_v3  ;;  %v737_v15 = vld [vmem:[%s954_s6 + $0x30] sm:$0xff]   ;;  %v739_v17 = vld [vmem:[%s954_s6 + $0x38] sm:$0xff]  }
  0x3d   : > { %626 = vmatprep.subr.bf16.mxu0 %v728_v4  ;;  %652 = vmatprep.subr.bf16.mxu1 %v728_v4  ;;  %v743_v19 = vld [vmem:[%s1013_s0 + $0x10] ss:$8 sps:$4 sm:$0xff]  }
  0x40   : > { %627 = vmatpush3.bf16.msra.mxu0 %v729_v5  ;;  %660 = vmatpush3.bf16.msra.mxu1 %v729_v5 }
  0x41   : > { %628 = vmatprep.subr.bf16.mxu0 %v730_v6  ;;  %653 = vmatprep.subr.bf16.mxu1 %v730_v6 }
  0x44   : > { %629 = vmatpush3.bf16.msra.mxu0 %v731_v7  ;;  %661 = vmatpush3.bf16.msra.mxu1 %v731_v7 }
  0x45   : > { %630 = vmatprep.subr.bf16.mxu0 %v732_v8  ;;  %654 = vmatprep.subr.bf16.mxu1 %v732_v8 }
  0x48   : > { %631 = vmatpush3.bf16.msra.mxu0 %v733_v9  ;;  %662 = vmatpush3.bf16.msra.mxu1 %v733_v9 }
  0x49   : > { %632 = vmatprep.subr.bf16.mxu0 %v734_v10  ;;  %655 = vmatprep.subr.bf16.mxu1 %v734_v10 }
  0x4c   : > { %633 = vmatpush3.bf16.msra.mxu0 %v735_v13  ;;  %663 = vmatpush3.bf16.msra.mxu1 %v735_v13 }
  0x4d   : > { %634 = vmatprep.subr.bf16.mxu0 %v736_v14  ;;  %656 = vmatprep.subr.bf16.mxu1 %v736_v14 }
  0x50   : > { %635 = vmatpush3.bf16.msra.mxu0 %v737_v15  ;;  %664 = vmatpush3.bf16.msra.mxu1 %v737_v15 }
  0x51   : > { %636 = vmatprep.subr.bf16.mxu0 %v738_v16  ;;  %657 = vmatprep.subr.bf16.mxu1 %v738_v16 }
  0x54   : > { %637 = vmatpush3.bf16.msra.mxu0 %v739_v17  ;;  %665 = vmatpush3.bf16.msra.mxu1 %v739_v17 }
  0x57   : > { %383 = vmatmul.mubr.bf16.vlgmr.msra.gmra.mrb[0].mxu0 %v740_v18  ;;  %391 = vmatmul.mubr.bf16.vlgmr.msra.gmra.mrb[0].mxu1 %v743_v19 }
 0x12a   : > { %v638_v20 = vpop.f32.mrb[0].mxu0  ;;  %v644_v21 = vpop.f32.mrb[0].mxu1 }
 0x12b   : > { %v639_v22 = vpop.f32.mrb[1].mxu0  ;;  %v645_v23 = vpop.f32.mrb[1].mxu1 }
 0x12c   : > { %v640_v24 = vadd.f32 %v639_v22, %v638_v20  ;;  %v646_v25 = vadd.f32 %v645_v23, %v644_v21  ;;  %v641_v26 = vpop.f32.mrb[2].mxu0  ;;  %v647_v27 = vpop.f32.mrb[2].mxu1  ;;  %425 = sbr.rel (!%p1021_p8) target bundleno = 316 (0x13c), region = 36 }
 0x12d   : > { %v642_v28 = vpop.f32.mrb[3].mxu0  ;;  %v648_v29 = vpop.f32.mrb[3].mxu1 }
 0x12e   : > { %v643_v30 = vadd.f32 %v642_v28, %v641_v26  ;;  %v649_v31 = vadd.f32 %v648_v29, %v647_v27 }
 0x130   : > { %v614_v32 = vpack.c.bf16 %v643_v30, %v640_v24  ;;  %v619_v33 = vpack.c.bf16 %v649_v31, %v646_v25 }
 0x132   : > { %615 = vst [vmem:[%s188_s17] sm:$0xff] %v614_v32   ;;  %621 = vst [vmem:[%s188_s17 + $0x8] sm:$0xff] %v619_v33  }
 0x139   : > { %v446_v34 = vld [vmem:[%s188_s17] sm:$0xf]  ;;  %v448_v35 = vld [vmem:[%s188_s17 + $0x4] sm:$0xf]  ;;  %v450_v36 = vld [vmem:[%s188_s17 + $0x8] sm:$0xf] }
 0x13a   : > { %v452_v37 = vld [vmem:[%s188_s17 + $0xc] sm:$0xf]  ;;  %447 = vst [vmem:[%s430_s24] sm:$0xf] %v446_v34  ;;  %449 = vst [vmem:[%s430_s24 + $0x8] sm:$0xf] %v448_v35 }
 0x13b   : > { %451 = vst [vmem:[%s430_s24 + $0x10] sm:$0xf] %v450_v36  ;;  %453 = vst [vmem:[%s430_s24 + $0x18] sm:$0xf] %v452_v37 }
 0x13c PF: > { %s15_s14 = sadd.s32 1, %s826_s14   ;;  %s1022_s9 = smov %s810_s10 }
 0x13d   : > { %p12_p9 = scmp.ge.s32.totalorder %s15_s14, 4   ;;  %s1023_s10 = smov %s814_s11 }
 0x13e   : > { %s1024_s11 = smov %s895_s21  ;;  %s1025_s12 = smov %s822_s13 }
 0x13f   : > { %s1026_s13 = smov %s1028_s16  ;;  %14 = sbr.rel (!%p12_p9) target bundleno = 4 (0x4), region = 112 }
 0x146   :  { %494 = vsyncpa [#allocation3], 1 }
 0x147   :  { %496 = vsyncpa [#allocation3 + $0x1], 1 }

// kernel: _lambda_.20
= control target key start
LH: loop header
LB: loop body
LE: loop exit
PB: predicated region body
PF: predicated region fallthrough
CT: control target
= control target key end

     0   :  { %s924_s9 = smov 0   ;;  %s926_s10 = smov 0   ;;  %s1098_s0 = inlined_call_operand.vmem [shape: bf16[32,256], index: 0, kind: input, shape index: {}]   ;;  %s1099_s1 = inlined_call_operand.vmem [shape: bf16[256,256], index: 1, kind: input, shape index: {}]   ;;  %s1100_s2 = inlined_call_operand.vmem [shape: bf16[32,256], index: 2, kind: output, shape index: {}]  }
   0x1   :  { %s928_s11 = smov 0   ;;  %s930_s12 = smov 0  }
   0x2   :  { %s932_s13 = smov 0  }
   0x3 LB: > { %s21_s14 = sadd.s32 1, %s903_s12  ;;  %s710_s15 = sadd.s32 4294967295, %s907_s13   ;;  %s907_s13 = sphi %s932_s13, %s12_s13   ;;  %s903_s12 = sphi %s930_s12, %s1105_s12   ;;  %s899_s11 = sphi %s928_s11, %s1104_s11   ;;  %s895_s10 = sphi %s926_s10, %s1103_s10   ;;  %s891_s9 = sphi %s924_s9, %s1102_s9  }
   0x4   : > { %p22_p0 = scmp.ge.s32.totalorder %s21_s14, 2  ;;  %p64_p1 = scmp.ne.s32.totalorder %s895_s10, %s891_s9 }
   0x5   : > { %p65_p2 = scmp.eq.s32.totalorder %s907_s13, 0  ;;  %p96_p4 = scmp.eq.s32.totalorder %s710_s15, 1 }
   0x6   : > { %s1107_s14 = smov (%p22_p0, %s21_s14), 0  ;;  %s57_s17 = sadd.s32 1, %s895_s10 }
   0x7   : > { %p66_p3 = por %p65_p2, %p64_p1  ;;  %s54_s16 = ssub.s32 %s903_s12, %s1107_s14 }
   0x8   : > { %p55_p5 = scmp.eq.s32.totalorder %s54_s16, 0  ;;  %p959_p6 = por %p96_p4, %p64_p1 }
   0x9   : > { %p714_p7 = scmp.ge.s32.totalorder %s907_s13, 2 }
   0xa   : > { %s964_s19 = scalar_select %p55_p5, %s895_s10, %s57_s17  }
   0xb   : > { %128 = sbr.rel (%p714_p7) target bundleno = 43 (0x2b), region = 20 }
  0x12   : > { %131 = sbr.rel (!%p66_p3) target bundleno = 43 (0x2b), region = 24  ;;  %s133_s20 = sand.u32 (%p66_p3), 1, %s895_s10  }
  0x13   : > { %s716_s21 = sshll.u32 (%p66_p3), %s903_s12, 2  ;;  %s715_s22 = sshll.u32 (%p66_p3), %s133_s20, 7 }
  0x14   : > { %s972_s25 = scalar_lea.vmem (%p66_p3), %s1099_s1, %s716_s21  ;;  %s976_s26 = scalar_lea.vmem (%p66_p3), [#allocation2], %s715_s22 }
  0x15   : > { %v153_v0 = vld [vmem:[%s972_s25] sm:$0xf] (%p66_p3)  ;;  %v155_v1 = vld [vmem:[%s972_s25 + $0x8] sm:$0xf] (%p66_p3)  ;;  %v157_v2 = vld [vmem:[%s972_s25 + $0x10] sm:$0xf] (%p66_p3) }
  0x16   : > { %154 = vst [vmem:[%s976_s26] sm:$0xf] (%p66_p3), %v153_v0  ;;  %156 = vst [vmem:[%s976_s26 + $0x4] sm:$0xf] (%p66_p3), %v155_v1  ;;  %v159_v3 = vld [vmem:[%s972_s25 + $0x18] sm:$0xf] (%p66_p3) }
  0x17   : > { %v161_v4 = vld [vmem:[%s972_s25 + $0x20] sm:$0xf] (%p66_p3)  ;;  %158 = vst [vmem:[%s976_s26 + $0x8] sm:$0xf] (%p66_p3), %v157_v2  ;;  %160 = vst [vmem:[%s976_s26 + $0xc] sm:$0xf] (%p66_p3), %v159_v3 }
  0x18   : > { %162 = vst [vmem:[%s976_s26 + $0x10] sm:$0xf] (%p66_p3), %v161_v4  ;;  %v163_v5 = vld [vmem:[%s972_s25 + $0x28] sm:$0xf] (%p66_p3)  ;;  %v165_v6 = vld [vmem:[%s972_s25 + $0x30] sm:$0xf] (%p66_p3) }
  0x19   : > { %v167_v7 = vld [vmem:[%s972_s25 + $0x38] sm:$0xf]  ;;  %164 = vst [vmem:[%s976_s26 + $0x14] sm:$0xf] %v163_v5  ;;  %166 = vst [vmem:[%s976_s26 + $0x18] sm:$0xf] %v165_v6 }
  0x1a   : > { %168 = vst [vmem:[%s976_s26 + $0x1c] sm:$0xf] %v167_v7  ;;  %v169_v8 = vld [vmem:[%s972_s25 + $0x40] sm:$0xf]  ;;  %v171_v9 = vld [vmem:[%s972_s25 + $0x48] sm:$0xf] }
  0x1b   : > { %v173_v10 = vld [vmem:[%s972_s25 + $0x50] sm:$0xf]  ;;  %170 = vst [vmem:[%s976_s26 + $0x20] sm:$0xf] %v169_v8  ;;  %172 = vst [vmem:[%s976_s26 + $0x24] sm:$0xf] %v171_v9 }
  0x1c   : > { %174 = vst [vmem:[%s976_s26 + $0x28] sm:$0xf] %v173_v10  ;;  %v175_v11 = vld [vmem:[%s972_s25 + $0x58] sm:$0xf]  ;;  %v177_v12 = vld [vmem:[%s972_s25 + $0x60] sm:$0xf] }
  0x1d   : > { %v179_v13 = vld [vmem:[%s972_s25 + $0x68] sm:$0xf]  ;;  %176 = vst [vmem:[%s976_s26 + $0x2c] sm:$0xf] %v175_v11  ;;  %178 = vst [vmem:[%s976_s26 + $0x30] sm:$0xf] %v177_v12 }
  0x1e   : > { %180 = vst [vmem:[%s976_s26 + $0x34] sm:$0xf] %v179_v13  ;;  %v181_v14 = vld [vmem:[%s972_s25 + $0x70] sm:$0xf]  ;;  %v183_v15 = vld [vmem:[%s972_s25 + $0x78] sm:$0xf] }
  0x1f   : > { %v185_v16 = vld [vmem:[%s972_s25 + $0x80] sm:$0xf]  ;;  %182 = vst [vmem:[%s976_s26 + $0x38] sm:$0xf] %v181_v14  ;;  %184 = vst [vmem:[%s976_s26 + $0x3c] sm:$0xf] %v183_v15 }
  0x20   : > { %186 = vst [vmem:[%s976_s26 + $0x40] sm:$0xf] %v185_v16  ;;  %v187_v17 = vld [vmem:[%s972_s25 + $0x88] sm:$0xf]  ;;  %v189_v18 = vld [vmem:[%s972_s25 + $0x90] sm:$0xf] }
  0x21   : > { %v191_v19 = vld [vmem:[%s972_s25 + $0x98] sm:$0xf]  ;;  %188 = vst [vmem:[%s976_s26 + $0x44] sm:$0xf] %v187_v17  ;;  %190 = vst [vmem:[%s976_s26 + $0x48] sm:$0xf] %v189_v18 }
  0x22   : > { %192 = vst [vmem:[%s976_s26 + $0x4c] sm:$0xf] %v191_v19  ;;  %v193_v20 = vld [vmem:[%s972_s25 + $0xa0] sm:$0xf]  ;;  %v195_v21 = vld [vmem:[%s972_s25 + $0xa8] sm:$0xf] }
  0x23   : > { %v197_v22 = vld [vmem:[%s972_s25 + $0xb0] sm:$0xf]  ;;  %194 = vst [vmem:[%s976_s26 + $0x50] sm:$0xf] %v193_v20  ;;  %196 = vst [vmem:[%s976_s26 + $0x54] sm:$0xf] %v195_v21 }
  0x24   : > { %198 = vst [vmem:[%s976_s26 + $0x58] sm:$0xf] %v197_v22  ;;  %v199_v23 = vld [vmem:[%s972_s25 + $0xb8] sm:$0xf]  ;;  %v201_v24 = vld [vmem:[%s972_s25 + $0xc0] sm:$0xf] }
  0x25   : > { %v203_v25 = vld [vmem:[%s972_s25 + $0xc8] sm:$0xf]  ;;  %200 = vst [vmem:[%s976_s26 + $0x5c] sm:$0xf] %v199_v23  ;;  %202 = vst [vmem:[%s976_s26 + $0x60] sm:$0xf] %v201_v24 }
  0x26   : > { %204 = vst [vmem:[%s976_s26 + $0x64] sm:$0xf] %v203_v25  ;;  %v205_v26 = vld [vmem:[%s972_s25 + $0xd0] sm:$0xf]  ;;  %v207_v27 = vld [vmem:[%s972_s25 + $0xd8] sm:$0xf] }
  0x27   : > { %v209_v28 = vld [vmem:[%s972_s25 + $0xe0] sm:$0xf]  ;;  %206 = vst [vmem:[%s976_s26 + $0x68] sm:$0xf] %v205_v26  ;;  %208 = vst [vmem:[%s976_s26 + $0x6c] sm:$0xf] %v207_v27 }
  0x28   : > { %210 = vst [vmem:[%s976_s26 + $0x70] sm:$0xf] %v209_v28  ;;  %v211_v29 = vld [vmem:[%s972_s25 + $0xe8] sm:$0xf]  ;;  %v213_v30 = vld [vmem:[%s972_s25 + $0xf0] sm:$0xf] }
  0x29   : > { %v215_v31 = vld [vmem:[%s972_s25 + $0xf8] sm:$0xf]  ;;  %212 = vst [vmem:[%s976_s26 + $0x74] sm:$0xf] %v211_v29  ;;  %214 = vst [vmem:[%s976_s26 + $0x78] sm:$0xf] %v213_v30 }
  0x2a   : > { %216 = vst [vmem:[%s976_s26 + $0x7c] sm:$0xf] %v215_v31 }
  0x2b PF: > { %p717_p8 = scmp.ge.s32.totalorder %s907_s13, 1  ;;  %p302_p9 = scmp.lt.s32.totalorder %s907_s13, 3 }
  0x2d   : > { %p303_p10 = pnand %p717_p8, %p302_p9 }
  0x2e   : > { %s309_s27 = sand.u32 (!%p303_p10), 1, %s891_s9   ;;  %v865_v32 = vld [vmem:[%s1098_s0 + $0x4] ss:$8 sps:$4 sm:$0xff] (!%p303_p10)   ;;  %v868_v33 = vld [vmem:[%s1098_s0 + $0x14] ss:$8 sps:$4 sm:$0xff] (!%p303_p10)  }
  0x2f   : > { %306 = sbr.rel (%p303_p10) target bundleno = 311 (0x137), region = 65  ;;  %s718_s28 = sshll.u32 (!%p303_p10), %s309_s27, 7  ;;  %528 = vmatprep.mubr.bf16.mxu0 (!%p303_p10), %v865_v32  ;;  %536 = vmatprep.mubr.bf16.mxu1 (!%p303_p10), %v868_v33  ;;  %v863_v50 = vld [vmem:[%s1098_s0] ss:$8 sps:$4 sm:$0xff] (!%p303_p10)   ;;  %v866_v51 = vld [vmem:[%s1098_s0 + $0x10] ss:$8 sps:$4 sm:$0xff] (!%p303_p10)  }
  0x30   : > { %s1051_s5 = scalar_lea.vmem (!%p303_p10), [#allocation2], %s718_s28  ;;  %s719_s16 = sshll.u32 (!%p303_p10), %s309_s27, 4 }
  0x31   : > { %v847_v34 = vld [vmem:[%s1051_s5 + $0x40] sm:$0xff] (!%p303_p10)   ;;  %v849_v36 = vld [vmem:[%s1051_s5 + $0x48] sm:$0xff] (!%p303_p10)   ;;  %v851_v38 = vld [vmem:[%s1051_s5 + $0x50] sm:$0xff] (!%p303_p10)   ;;  %s334_s17 = scalar_lea.vmem (!%p303_p10), [#allocation3], %s719_s16 }
  0x32   : > { %v848_v35 = vld [vmem:[%s1051_s5] sm:$0xff] (!%p303_p10)   ;;  %763 = vmatprep.subr.bf16.mxu0 (!%p303_p10), %v847_v34  ;;  %791 = vmatprep.subr.bf16.mxu1 (!%p303_p10), %v847_v34  ;;  %v850_v37 = vld [vmem:[%s1051_s5 + $0x8] sm:$0xff] (!%p303_p10)   ;;  %v852_v39 = vld [vmem:[%s1051_s5 + $0x10] sm:$0xff] (!%p303_p10)  }
  0x33   : > { %764 = vmatpush3.bf16.msra.mxu0 (!%p303_p10), %v848_v35  ;;  %799 = vmatpush3.bf16.msra.mxu1 (!%p303_p10), %v848_v35  ;;  %v853_v40 = vld [vmem:[%s1051_s5 + $0x58] sm:$0xff] (!%p303_p10)   ;;  %v855_v42 = vld [vmem:[%s1051_s5 + $0x60] sm:$0xff] (!%p303_p10)   ;;  %v857_v44 = vld [vmem:[%s1051_s5 + $0x68] sm:$0xff] (!%p303_p10)  }
  0x34   : > { %765 = vmatprep.subr.bf16.mxu0 (!%p303_p10), %v849_v36  ;;  %792 = vmatprep.subr.bf16.mxu1 (!%p303_p10), %v849_v36  ;;  %v854_v41 = vld [vmem:[%s1051_s5 + $0x18] sm:$0xff] (!%p303_p10)   ;;  %v856_v43 = vld [vmem:[%s1051_s5 + $0x20] sm:$0xff] (!%p303_p10)   ;;  %v858_v45 = vld [vmem:[%s1051_s5 + $0x28] sm:$0xff] (!%p303_p10)  }
  0x35   : > { %v859_v46 = vld [vmem:[%s1051_s5 + $0x70] sm:$0xff] (!%p303_p10)   ;;  %v861_v48 = vld [vmem:[%s1051_s5 + $0x78] sm:$0xff] (!%p303_p10)  }
  0x36   : > { %v860_v47 = vld [vmem:[%s1051_s5 + $0x30] sm:$0xff]   ;;  %v862_v49 = vld [vmem:[%s1051_s5 + $0x38] sm:$0xff]   ;;  %s745_s20 = sshll.u32 (%p959_p6), %s899_s11, 2 }
  0x37   : > { %766 = vmatpush3.bf16.msra.mxu0 %v850_v37  ;;  %800 = vmatpush3.bf16.msra.mxu1 %v850_v37  ;;  %s576_s9 = scalar_lea.vmem (%p959_p6), %s1100_s2, %s745_s20 }
  0x38   : > { %767 = vmatprep.subr.bf16.mxu0 %v851_v38  ;;  %793 = vmatprep.subr.bf16.mxu1 %v851_v38 }
  0x3b   : > { %768 = vmatpush3.bf16.msra.mxu0 %v852_v39  ;;  %801 = vmatpush3.bf16.msra.mxu1 %v852_v39 }
  0x3c   : > { %769 = vmatprep.subr.bf16.mxu0 %v853_v40  ;;  %794 = vmatprep.subr.bf16.mxu1 %v853_v40 }
  0x3f   : > { %770 = vmatpush3.bf16.msra.mxu0 %v854_v41  ;;  %802 = vmatpush3.bf16.msra.mxu1 %v854_v41 }
  0x40   : > { %771 = vmatprep.subr.bf16.mxu0 %v855_v42  ;;  %795 = vmatprep.subr.bf16.mxu1 %v855_v42 }
  0x43   : > { %772 = vmatpush3.bf16.msra.mxu0 %v856_v43  ;;  %803 = vmatpush3.bf16.msra.mxu1 %v856_v43 }
  0x44   : > { %773 = vmatprep.subr.bf16.mxu0 %v857_v44  ;;  %796 = vmatprep.subr.bf16.mxu1 %v857_v44 }
  0x47   : > { %774 = vmatpush3.bf16.msra.mxu0 %v858_v45  ;;  %804 = vmatpush3.bf16.msra.mxu1 %v858_v45 }
  0x48   : > { %775 = vmatprep.subr.bf16.mxu0 %v859_v46  ;;  %797 = vmatprep.subr.bf16.mxu1 %v859_v46 }
  0x4b   : > { %776 = vmatpush3.bf16.msra.mxu0 %v860_v47  ;;  %805 = vmatpush3.bf16.msra.mxu1 %v860_v47 }
  0x4c   : > { %777 = vmatprep.subr.bf16.mxu0 %v861_v48  ;;  %798 = vmatprep.subr.bf16.mxu1 %v861_v48 }
  0x4f   : > { %778 = vmatpush3.bf16.msra.mxu0 %v862_v49  ;;  %806 = vmatpush3.bf16.msra.mxu1 %v862_v49 }
  0x52   : > { %529 = vmatmul.mubr.bf16.vlgmr.msra.gmra.mrb[0].mxu0 %v863_v50  ;;  %537 = vmatmul.mubr.bf16.vlgmr.msra.gmra.mrb[0].mxu1 %v866_v51 }
 0x125   : > { %v779_v52 = vpop.f32.mrb[0].mxu0  ;;  %v785_v53 = vpop.f32.mrb[0].mxu1 }
 0x126   : > { %v780_v54 = vpop.f32.mrb[1].mxu0  ;;  %v786_v55 = vpop.f32.mrb[1].mxu1 }
 0x127   : > { %v781_v56 = vadd.f32 %v780_v54, %v779_v52  ;;  %v787_v57 = vadd.f32 %v786_v55, %v785_v53  ;;  %v782_v58 = vpop.f32.mrb[2].mxu0  ;;  %v788_v59 = vpop.f32.mrb[2].mxu1  ;;  %571 = sbr.rel (!%p959_p6) target bundleno = 311 (0x137), region = 73 }
 0x128   : > { %v783_v60 = vpop.f32.mrb[3].mxu0  ;;  %v789_v61 = vpop.f32.mrb[3].mxu1 }
 0x129   : > { %v784_v62 = vadd.f32 %v783_v60, %v782_v58  ;;  %v790_v63 = vadd.f32 %v789_v61, %v788_v59 }
 0x12b   : > { %v755_v0 = vpack.c.bf16 %v784_v62, %v781_v56  ;;  %v760_v1 = vpack.c.bf16 %v790_v63, %v787_v57 }
 0x12d   : > { %756 = vst [vmem:[%s334_s17] sm:$0xff] %v755_v0   ;;  %762 = vst [vmem:[%s334_s17 + $0x8] sm:$0xff] %v760_v1  }
 0x134   : > { %v592_v2 = vld [vmem:[%s334_s17] sm:$0xf]  ;;  %v594_v3 = vld [vmem:[%s334_s17 + $0x4] sm:$0xf]  ;;  %v596_v4 = vld [vmem:[%s334_s17 + $0x8] sm:$0xf] }
 0x135   : > { %v598_v5 = vld [vmem:[%s334_s17 + $0xc] sm:$0xf]  ;;  %593 = vst [vmem:[%s576_s9] sm:$0xf] %v592_v2  ;;  %595 = vst [vmem:[%s576_s9 + $0x8] sm:$0xf] %v594_v3 }
 0x136   : > { %597 = vst [vmem:[%s576_s9 + $0x10] sm:$0xf] %v596_v4  ;;  %599 = vst [vmem:[%s576_s9 + $0x18] sm:$0xf] %v598_v5 }
 0x137 PF: > { %s12_s13 = sadd.s32 1, %s907_s13   ;;  %s1102_s9 = smov %s895_s10 }
 0x138   : > { %p9_p11 = scmp.ge.s32.totalorder %s12_s13, 4   ;;  %s1103_s10 = smov %s964_s19 }
 0x139   : > { %s1104_s11 = smov %s903_s12  ;;  %s1105_s12 = smov %s1107_s14 }
 0x13a   :  { %11 = sbr.rel (!%p9_p11) target bundleno = 3 (0x3), region = 148 }

// kernel: _lambda_.22
= control target key start
LH: loop header
LB: loop body
LE: loop exit
PB: predicated region body
PF: predicated region fallthrough
CT: control target
= control target key end

     0   :  { %s891_s12 = smov 0   ;;  %s893_s13 = smov 0   ;;  %s1020_s0 = inlined_call_operand.vmem [shape: bf16[32,256], index: 0, kind: input, shape index: {}]   ;;  %s1021_s1 = inlined_call_operand.vmem [shape: bf16[32,256], index: 1, kind: input, shape index: {}]   ;;  %s1022_s2 = inlined_call_operand.vmem [shape: bf16[32,256], index: 2, kind: input, shape index: {}]   ;;  %s1023_s3 = inlined_call_operand.vmem [shape: bf16[32,256], index: 3, kind: output, shape index: {}]  }
   0x1   :  { %s895_s14 = smov 0   ;;  %s897_s15 = smov 0  }
   0x2   :  { %s899_s16 = smov 0   ;;  %s901_s17 = smov 0  }
   0x3   :  { %s903_s18 = smov 0  }
   0x4 LB: > { %s22_s19 = sadd.s32 1, %s859_s16  ;;  %s25_s20 = sadd.s32 1, %s863_s17  ;;  %s867_s18 = sphi %s903_s18, %s13_s18   ;;  %s863_s17 = sphi %s901_s17, %s1031_s17   ;;  %s859_s16 = sphi %s899_s16, %s1030_s16   ;;  %s855_s15 = sphi %s897_s15, %s1029_s15   ;;  %s851_s14 = sphi %s895_s14, %s1028_s14   ;;  %s847_s13 = sphi %s893_s13, %s1027_s13   ;;  %s843_s12 = sphi %s891_s12, %s1026_s12  }
   0x5   : > { %p23_p0 = scmp.ge.s32.totalorder %s22_s19, 2  ;;  %s684_s21 = sadd.s32 4294967295, %s867_s18  }
   0x6   : > { %p41_p1 = scmp.ne.s32.totalorder %s847_s13, %s843_s12  ;;  %p42_p2 = scmp.eq.s32.totalorder %s867_s18, 0 }
   0x7   : > { %s1033_s19 = smov (%p23_p0, %s22_s19), 0  ;;  %s1035_s20 = smov (!%p23_p0, %s25_s20), %s863_s17 }
   0x8   : > { %p27_p3 = scmp.ge.s32.totalorder %s1035_s20, 2  ;;  %p129_p4 = scmp.eq.s32.totalorder %s684_s21, 3 }
   0x9   : > { %s30_s22 = ssub.s32 %s859_s16, %s1033_s19  ;;  %p937_p5 = por %p42_p2, %p41_p1 }
   0xa   : > { %s1037_s20 = smov (%p27_p3, %s1035_s20), 0  ;;  %p943_p6 = por %p129_p4, %p41_p1 }
   0xb   : > { %s29_s25 = ssub.s32 %s863_s17, %s1037_s20  ;;  %s34_s27 = sadd.s32 1, %s847_s13 }
   0xc   : > { %s31_s26 = sor.u32 %s30_s22, %s29_s25  ;;  %p687_p8 = scmp.ge.s32.totalorder %s867_s18, 4 }
   0xd   : > { %p32_p7 = scmp.eq.s32.totalorder %s31_s26, 0 }
   0xe   : > { %151 = sbr.rel (%p687_p8) target bundleno = 42 (0x2a), region = 16 }
   0xf   : > { %s951_s28 = scalar_select %p32_p7, %s847_s13, %s34_s27  }
  0x15   : > { %154 = sbr.rel (!%p937_p5) target bundleno = 28 (0x1c), region = 20  ;;  %s156_s29 = sand.u32 (%p937_p5), 1, %s847_s13  }
  0x16   : > { %s717_s30 = sshll.u32 (%p937_p5), %s863_s17, 2  ;;  %s688_s4 = sshll.u32 (%p937_p5), %s156_s29, 3 }
  0x17   : > { %s161_s5 = sadd.s32 (%p937_p5), %s859_s16, %s717_s30  ;;  %s158_s10 = scalar_lea.vmem (%p937_p5), [#allocation2], %s688_s4 }
  0x18   : > { %s691_s6 = sshll.u32 (%p937_p5), %s161_s5, 2 }
  0x19   : > { %s163_s9 = scalar_lea.vmem (%p937_p5), %s1020_s0, %s691_s6 }
  0x1a   : > { %v179_v0 = vld [vmem:[%s163_s9] sm:$0xf] (%p937_p5)  ;;  %v181_v1 = vld [vmem:[%s163_s9 + $0x8] sm:$0xf] (%p937_p5) }
  0x1b   : > { %180 = vst [vmem:[%s158_s10] sm:$0xf] (%p937_p5), %v179_v0  ;;  %182 = vst [vmem:[%s158_s10 + $0x4] sm:$0xf] (%p937_p5), %v181_v1 }
  0x1c PF: > { %209 = sbr.rel (!%p937_p5) target bundleno = 35 (0x23), region = 61  ;;  %s211_s11 = sand.u32 (%p937_p5), 1, %s847_s13  }
  0x1d   : > { %s718_s21 = sshll.u32 (%p937_p5), %s863_s17, 2  ;;  %s692_s22 = sshll.u32 (%p937_p5), %s211_s11, 3 }
  0x1e   : > { %s216_s25 = sadd.s32 (%p937_p5), %s859_s16, %s718_s21  ;;  %s213_s4 = scalar_lea.vmem (%p937_p5), [#allocation3], %s692_s22 }
  0x1f   : > { %s695_s26 = sshll.u32 (%p937_p5), %s216_s25, 2 }
  0x20   : > { %s218_s30 = scalar_lea.vmem (%p937_p5), %s1021_s1, %s695_s26 }
  0x21   : > { %v234_v2 = vld [vmem:[%s218_s30] sm:$0xf] (%p937_p5)  ;;  %v236_v3 = vld [vmem:[%s218_s30 + $0x8] sm:$0xf] (%p937_p5) }
  0x22   : > { %235 = vst [vmem:[%s213_s4] sm:$0xf] (%p937_p5), %v234_v2  ;;  %237 = vst [vmem:[%s213_s4 + $0x4] sm:$0xf] (%p937_p5), %v236_v3 }
  0x23 PF: > { %264 = sbr.rel (!%p937_p5) target bundleno = 42 (0x2a), region = 102  ;;  %s266_s5 = sand.u32 (%p937_p5), 1, %s847_s13  }
  0x24   : > { %s719_s6 = sshll.u32 (%p937_p5), %s863_s17, 2  ;;  %s696_s7 = sshll.u32 (%p937_p5), %s266_s5, 3 }
  0x25   : > { %s271_s8 = sadd.s32 (%p937_p5), %s859_s16, %s719_s6  ;;  %s268_s22 = scalar_lea.vmem (%p937_p5), [#allocation4], %s696_s7 }
  0x26   : > { %s699_s9 = sshll.u32 (%p937_p5), %s271_s8, 2 }
  0x27   : > { %s273_s21 = scalar_lea.vmem (%p937_p5), %s1022_s2, %s699_s9 }
  0x28   : > { %v289_v4 = vld [vmem:[%s273_s21] sm:$0xf] (%p937_p5)  ;;  %v291_v5 = vld [vmem:[%s273_s21 + $0x8] sm:$0xf] (%p937_p5) }
  0x29   : > { %290 = vst [vmem:[%s268_s22] sm:$0xf] (%p937_p5), %v289_v4  ;;  %292 = vst [vmem:[%s268_s22 + $0x4] sm:$0xf] (%p937_p5), %v291_v5 }
  0x2a PF: > { %p700_p9 = scmp.ge.s32.totalorder %s867_s18, 1  ;;  %p318_p10 = scmp.lt.s32.totalorder %s867_s18, 5 }
  0x2c   : > { %p319_p11 = pnand %p700_p9, %p318_p10 }
  0x2d   : > { %s325_s23 = sand.u32 (!%p319_p11), 1, %s843_s12   ;;  %v869_v6 = vmov (!%p319_p11), 0.0   ;;  %vm870_vm0 = vmmov (!%p319_p11), 0   ;;  %vm431_vm1 = vcmask (!%p319_p11), 130048  }
  0x2e   : > { %322 = sbr.rel (%p319_p11) target bundleno = 659 (0x293), region = 143  ;;  %732 = vmatprep.subr.bf16.mxu0 (!%p319_p11), %v869_v6  ;;  %s981_s25 = sshll.u32 (!%p319_p11), %s325_s23, 3  ;;  %734 = vmatprep.mubr.msk.bf16.mxu0 (!%p319_p11), %vm870_vm0, %v869_v6 }
  0x2f   : > { %738 = vmatprep.subr.bf16.mxu1 (!%p319_p11), %v869_v6  ;;  %740 = vmatprep.mubr.msk.bf16.mxu1 (!%p319_p11), %vm870_vm0, %v869_v6  ;;  %s334_s26 = scalar_lea.vmem (!%p319_p11), [#allocation3], %s981_s25  ;;  %s327_s27 = scalar_lea.vmem (!%p319_p11), [#allocation2], %s981_s25 }
  0x30   : > { %v802_v7 = vld [vmem:[%s334_s26] sm:$0xff] (!%p319_p11)   ;;  %v803_v8 = vld [vmem:[%s327_s27] sm:$0xff] (!%p319_p11)   ;;  %s341_s12 = scalar_lea.vmem (!%p319_p11), [#allocation4], %s981_s25  ;;  %s368_s29 = scalar_lea.vmem (!%p319_p11), [#allocation5], %s981_s25 }
  0x31   : > { %733 = vmatpush3.bf16.xpose.msra.mxu0 (!%p319_p11), %v802_v7  ;;  %v804_v15 = vld [vmem:[%s341_s12] sm:$0xff] (!%p319_p11)  }
  0x32   : > { %739 = vmatpush3.bf16.msra.mxu1 (!%p319_p11), %v804_v15 }
  0x35   : > { %s722_s30 = sshll.u32 (%p943_p6), %s855_s15, 2 }
  0x36   : > { %s526_s4 = sadd.s32 (%p943_p6), %s851_s14, %s722_s30 }
  0x37   : > { %s714_s5 = sshll.u32 (%p943_p6), %s526_s4, 2 }
  0x38   : > { %735 = vmatmul.mubr.bf16.vlgmr.msra.gmra.mrb[0].mxu0 %v803_v8  ;;  %s528_s8 = scalar_lea.vmem (%p943_p6), %s1023_s3, %s714_s5 }
 0x10b   : > { %v424_v9 = vpop.f32.mrb[0].mxu0 }
 0x10c   : > { %v736_v10 = vpop.f32.mrb[1].mxu0  ;;  %v432_v11 = vsel %vm431_vm1, %v424_v9, -inf }
 0x10d   : > { %433 = vmax.xlane.f32.xlu0 %v432_v11  ;;  %v427_v12 = vpop.f32.mrb[2].mxu0 }
 0x10e   : > { %v737_v13 = vpop.f32.mrb[3].mxu0  ;;  %v435_v14 = vsel %vm431_vm1, %v427_v12, -inf }
 0x111   : > { %436 = vmax.xlane.f32.xlu0 %v435_v14 }
 0x19a   : > { %v434_v16 = vpop.xlane.xlu0 %433 }
 0x19b   : > { %v438_v17 = vsub.f32 %v424_v9, %v434_v16 }
 0x19d   : > { %v440_v18 = vmul.f32 1.442695, %v438_v17 }
 0x19e   : > { %v437_v19 = vpop.xlane.xlu0 %436 }
 0x19f   : > { %805 = vpow2.f32 %v440_v18  ;;  %v439_v20 = vsub.f32 %v427_v12, %v437_v19 }
 0x1a1   : > { %v442_v21 = vmul.f32 1.442695, %v439_v20 }
 0x1a3   : > { %807 = vpow2.f32 %v442_v21 }
 0x1a9   : > { %v806_v22 = vpop.eup %805 }
 0x1aa   : > { %v444_v23 = vsel %vm431_vm1, %v806_v22, 0.0 }
 0x1ab   : > { %445 = vadd.xlane.f32.xlu1 %v444_v23 }
 0x1ad   : > { %v808_v24 = vpop.eup %807 }
 0x1ae   : > { %v447_v25 = vsel %vm431_vm1, %v808_v24, 0.0  ;;  %v450_v26 = vpack.c.bf16 %v808_v24, %v806_v22 }
 0x1af   : > { %448 = vadd.xlane.f32.xlu1 %v447_v25 }
 0x1b0   : > { %741 = vmatmul.mubr.msk.bf16.vlgmr.msra.gmra.mrb[0].mxu1 %vm431_vm1, %v450_v26 }
 0x238   : > { %v446_v27 = vpop.xlane.xlu1 %445 }
 0x239   : > { %809 = vrcp.f32 %v446_v27 }
 0x23c   : > { %v449_v28 = vpop.xlane.xlu1 %448 }
 0x23d   : > { %811 = vrcp.f32 %v449_v28 }
 0x243   : > { %v810_v30 = vpop.eup %809 }
 0x247   : > { %v812_v32 = vpop.eup %811 }
 0x283   : > { %v496_v29 = vpop.f32.mrb[0].mxu1 }
 0x284   : > { %v742_v31 = vpop.f32.mrb[1].mxu1  ;;  %v505_v34 = vmul.f32 %v810_v30, %v496_v29  ;;  %523 = sbr.rel (!%p943_p6) target bundleno = 659 (0x293), region = 159 }
 0x285   : > { %v499_v33 = vpop.f32.mrb[2].mxu1 }
 0x286   : > { %v506_v35 = vmul.f32 %v812_v32, %v499_v33  ;;  %v743_v36 = vpop.f32.mrb[3].mxu1 }
 0x288   : > { %v726_v37 = vpack.c.bf16 %v506_v35, %v505_v34 }
 0x28a   : > { %727 = vst [vmem:[%s368_s29] sm:$0xff] %v726_v37  }
 0x291   : > { %v544_v38 = vld [vmem:[%s368_s29] sm:$0xf]  ;;  %v546_v39 = vld [vmem:[%s368_s29 + $0x4] sm:$0xf] }
 0x292   : > { %545 = vst [vmem:[%s528_s8] sm:$0xf] %v544_v38  ;;  %547 = vst [vmem:[%s528_s8 + $0x8] sm:$0xf] %v546_v39 }
 0x293 PF: > { %s13_s18 = sadd.s32 1, %s867_s18   ;;  %s1026_s12 = smov %s847_s13 }
 0x294   : > { %p10_p12 = scmp.ge.s32.totalorder %s13_s18, 6   ;;  %s1027_s13 = smov %s951_s28 }
 0x295   : > { %s1028_s14 = smov %s859_s16  ;;  %s1029_s15 = smov %s863_s17 }
 0x296   : > { %s1030_s16 = smov %s1033_s19  ;;  %s1031_s17 = smov %s1037_s20 }
 0x297   :  { %12 = sbr.rel (!%p10_p12) target bundleno = 4 (0x4), region = 247 }

// kernel: _lambda_.23
= control target key start
LH: loop header
LB: loop body
LE: loop exit
PB: predicated region body
PF: predicated region fallthrough
CT: control target
= control target key end

     0   :  { %s1142_s15 = smov 0   ;;  %s1144_s16 = smov 0   ;;  %s1338_s0 = inlined_call_operand.vmem [shape: bf16[32,256], index: 0, kind: input, shape index: {}]   ;;  %s1339_s1 = inlined_call_operand.vmem [shape: bf16[256,256], index: 1, kind: input, shape index: {}]   ;;  %s1340_s2 = inlined_call_operand.vmem [shape: f32[1,256], index: 2, kind: input, shape index: {}]   ;;  %s1341_s3 = inlined_call_operand.vmem [shape: bf16[32,256], index: 3, kind: input, shape index: {}]   ;;  %s1342_s4 = inlined_call_operand.vmem [shape: bf16[32,256], index: 4, kind: output, shape index: {}]  }
   0x1   :  { %s1146_s17 = smov 0   ;;  %s1148_s18 = smov 0  }
   0x2   :  { %s1150_s19 = smov 0  }
   0x3 LB: > { %s23_s20 = sadd.s32 1, %s1111_s18  ;;  %s905_s21 = sadd.s32 4294967295, %s1115_s19   ;;  %s1115_s19 = sphi %s1150_s19, %s14_s19   ;;  %s1111_s18 = sphi %s1148_s18, %s1348_s18   ;;  %s1107_s17 = sphi %s1146_s17, %s1347_s17   ;;  %s1103_s16 = sphi %s1144_s16, %s1346_s16   ;;  %s1099_s15 = sphi %s1142_s15, %s1345_s15  }
   0x4   : > { %p24_p0 = scmp.ge.s32.totalorder %s23_s20, 2  ;;  %p66_p1 = scmp.ne.s32.totalorder %s1103_s16, %s1099_s15 }
   0x5   : > { %p67_p2 = scmp.eq.s32.totalorder %s1115_s19, 0  ;;  %p152_p4 = scmp.eq.s32.totalorder %s905_s21, 1 }
   0x6   : > { %s1350_s20 = smov (%p24_p0, %s23_s20), 0  ;;  %s59_s24 = sadd.s32 1, %s1103_s16 }
   0x7   : > { %p1174_p3 = por %p67_p2, %p66_p1  ;;  %s56_s23 = ssub.s32 %s1111_s18, %s1350_s20 }
   0x8   : > { %p57_p5 = scmp.eq.s32.totalorder %s56_s23, 0  ;;  %p1181_p6 = por %p152_p4, %p66_p1 }
   0x9   : > { %p909_p7 = scmp.ge.s32.totalorder %s1115_s19, 2 }
   0xa   : > { %s1186_s26 = scalar_select %p57_p5, %s1103_s16, %s59_s24  }
   0xb   : > { %184 = sbr.rel (%p909_p7) target bundleno = 50 (0x32), region = 20 }
  0x12   : > { %187 = sbr.rel (!%p1174_p3) target bundleno = 43 (0x2b), region = 24  ;;  %s189_s27 = sand.u32 (%p1174_p3), 1, %s1103_s16  }
  0x13   : > { %s911_s28 = sshll.u32 (%p1174_p3), %s1111_s18, 2  ;;  %s910_s29 = sshll.u32 (%p1174_p3), %s189_s27, 7 }
  0x14   : > { %s1196_s6 = scalar_lea.vmem (%p1174_p3), %s1339_s1, %s911_s28  ;;  %s1200_s7 = scalar_lea.vmem (%p1174_p3), [#allocation2], %s910_s29 }
  0x15   : > { %v209_v0 = vld [vmem:[%s1196_s6] sm:$0xf] (%p1174_p3)  ;;  %v211_v1 = vld [vmem:[%s1196_s6 + $0x8] sm:$0xf] (%p1174_p3)  ;;  %v213_v2 = vld [vmem:[%s1196_s6 + $0x10] sm:$0xf] (%p1174_p3) }
  0x16   : > { %210 = vst [vmem:[%s1200_s7] sm:$0xf] (%p1174_p3), %v209_v0  ;;  %212 = vst [vmem:[%s1200_s7 + $0x4] sm:$0xf] (%p1174_p3), %v211_v1  ;;  %v215_v3 = vld [vmem:[%s1196_s6 + $0x18] sm:$0xf] (%p1174_p3) }
  0x17   : > { %v217_v4 = vld [vmem:[%s1196_s6 + $0x20] sm:$0xf] (%p1174_p3)  ;;  %214 = vst [vmem:[%s1200_s7 + $0x8] sm:$0xf] (%p1174_p3), %v213_v2  ;;  %216 = vst [vmem:[%s1200_s7 + $0xc] sm:$0xf] (%p1174_p3), %v215_v3 }
  0x18   : > { %218 = vst [vmem:[%s1200_s7 + $0x10] sm:$0xf] (%p1174_p3), %v217_v4  ;;  %v219_v5 = vld [vmem:[%s1196_s6 + $0x28] sm:$0xf] (%p1174_p3)  ;;  %v221_v6 = vld [vmem:[%s1196_s6 + $0x30] sm:$0xf] (%p1174_p3) }
  0x19   : > { %v223_v7 = vld [vmem:[%s1196_s6 + $0x38] sm:$0xf]  ;;  %220 = vst [vmem:[%s1200_s7 + $0x14] sm:$0xf] %v219_v5  ;;  %222 = vst [vmem:[%s1200_s7 + $0x18] sm:$0xf] %v221_v6 }
  0x1a   : > { %224 = vst [vmem:[%s1200_s7 + $0x1c] sm:$0xf] %v223_v7  ;;  %v225_v8 = vld [vmem:[%s1196_s6 + $0x40] sm:$0xf]  ;;  %v227_v9 = vld [vmem:[%s1196_s6 + $0x48] sm:$0xf] }
  0x1b   : > { %v229_v10 = vld [vmem:[%s1196_s6 + $0x50] sm:$0xf]  ;;  %226 = vst [vmem:[%s1200_s7 + $0x20] sm:$0xf] %v225_v8  ;;  %228 = vst [vmem:[%s1200_s7 + $0x24] sm:$0xf] %v227_v9 }
  0x1c   : > { %230 = vst [vmem:[%s1200_s7 + $0x28] sm:$0xf] %v229_v10  ;;  %v231_v11 = vld [vmem:[%s1196_s6 + $0x58] sm:$0xf]  ;;  %v233_v12 = vld [vmem:[%s1196_s6 + $0x60] sm:$0xf] }
  0x1d   : > { %v235_v13 = vld [vmem:[%s1196_s6 + $0x68] sm:$0xf]  ;;  %232 = vst [vmem:[%s1200_s7 + $0x2c] sm:$0xf] %v231_v11  ;;  %234 = vst [vmem:[%s1200_s7 + $0x30] sm:$0xf] %v233_v12 }
  0x1e   : > { %236 = vst [vmem:[%s1200_s7 + $0x34] sm:$0xf] %v235_v13  ;;  %v237_v14 = vld [vmem:[%s1196_s6 + $0x70] sm:$0xf]  ;;  %v239_v15 = vld [vmem:[%s1196_s6 + $0x78] sm:$0xf] }
  0x1f   : > { %v241_v16 = vld [vmem:[%s1196_s6 + $0x80] sm:$0xf]  ;;  %238 = vst [vmem:[%s1200_s7 + $0x38] sm:$0xf] %v237_v14  ;;  %240 = vst [vmem:[%s1200_s7 + $0x3c] sm:$0xf] %v239_v15 }
  0x20   : > { %242 = vst [vmem:[%s1200_s7 + $0x40] sm:$0xf] %v241_v16  ;;  %v243_v17 = vld [vmem:[%s1196_s6 + $0x88] sm:$0xf]  ;;  %v245_v18 = vld [vmem:[%s1196_s6 + $0x90] sm:$0xf] }
  0x21   : > { %v247_v19 = vld [vmem:[%s1196_s6 + $0x98] sm:$0xf]  ;;  %244 = vst [vmem:[%s1200_s7 + $0x44] sm:$0xf] %v243_v17  ;;  %246 = vst [vmem:[%s1200_s7 + $0x48] sm:$0xf] %v245_v18 }
  0x22   : > { %248 = vst [vmem:[%s1200_s7 + $0x4c] sm:$0xf] %v247_v19  ;;  %v249_v20 = vld [vmem:[%s1196_s6 + $0xa0] sm:$0xf]  ;;  %v251_v21 = vld [vmem:[%s1196_s6 + $0xa8] sm:$0xf] }
  0x23   : > { %v253_v22 = vld [vmem:[%s1196_s6 + $0xb0] sm:$0xf]  ;;  %250 = vst [vmem:[%s1200_s7 + $0x50] sm:$0xf] %v249_v20  ;;  %252 = vst [vmem:[%s1200_s7 + $0x54] sm:$0xf] %v251_v21 }
  0x24   : > { %254 = vst [vmem:[%s1200_s7 + $0x58] sm:$0xf] %v253_v22  ;;  %v255_v23 = vld [vmem:[%s1196_s6 + $0xb8] sm:$0xf]  ;;  %v257_v24 = vld [vmem:[%s1196_s6 + $0xc0] sm:$0xf] }
  0x25   : > { %v259_v25 = vld [vmem:[%s1196_s6 + $0xc8] sm:$0xf]  ;;  %256 = vst [vmem:[%s1200_s7 + $0x5c] sm:$0xf] %v255_v23  ;;  %258 = vst [vmem:[%s1200_s7 + $0x60] sm:$0xf] %v257_v24 }
  0x26   : > { %260 = vst [vmem:[%s1200_s7 + $0x64] sm:$0xf] %v259_v25  ;;  %v261_v26 = vld [vmem:[%s1196_s6 + $0xd0] sm:$0xf]  ;;  %v263_v27 = vld [vmem:[%s1196_s6 + $0xd8] sm:$0xf] }
  0x27   : > { %v265_v28 = vld [vmem:[%s1196_s6 + $0xe0] sm:$0xf]  ;;  %262 = vst [vmem:[%s1200_s7 + $0x68] sm:$0xf] %v261_v26  ;;  %264 = vst [vmem:[%s1200_s7 + $0x6c] sm:$0xf] %v263_v27 }
  0x28   : > { %266 = vst [vmem:[%s1200_s7 + $0x70] sm:$0xf] %v265_v28  ;;  %v267_v29 = vld [vmem:[%s1196_s6 + $0xe8] sm:$0xf]  ;;  %v269_v30 = vld [vmem:[%s1196_s6 + $0xf0] sm:$0xf] }
  0x29   : > { %v271_v31 = vld [vmem:[%s1196_s6 + $0xf8] sm:$0xf]  ;;  %268 = vst [vmem:[%s1200_s7 + $0x74] sm:$0xf] %v267_v29  ;;  %270 = vst [vmem:[%s1200_s7 + $0x78] sm:$0xf] %v269_v30 }
  0x2a   : > { %272 = vst [vmem:[%s1200_s7 + $0x7c] sm:$0xf] %v271_v31 }
  0x2b PF: > { %365 = sbr.rel (!%p1174_p3) target bundleno = 50 (0x32), region = 69  ;;  %s367_s8 = sand.u32 (%p1174_p3), 1, %s1103_s16  }
  0x2c   : > { %s913_s9 = sshll.u32 (%p1174_p3), %s1111_s18, 2  ;;  %s912_s10 = sshll.u32 (%p1174_p3), %s367_s8, 4 }
  0x2d   : > { %s374_s13 = scalar_lea.vmem (%p1174_p3), %s1341_s3, %s913_s9  ;;  %s369_s14 = scalar_lea.vmem (%p1174_p3), [#allocation3], %s912_s10 }
  0x2e   : > { %v390_v32 = vld [vmem:[%s374_s13] sm:$0xf] (%p1174_p3)  ;;  %v392_v33 = vld [vmem:[%s374_s13 + $0x8] sm:$0xf] (%p1174_p3)  ;;  %v394_v34 = vld [vmem:[%s374_s13 + $0x10] sm:$0xf] (%p1174_p3) }
  0x2f   : > { %391 = vst [vmem:[%s369_s14] sm:$0xf] (%p1174_p3), %v390_v32  ;;  %393 = vst [vmem:[%s369_s14 + $0x4] sm:$0xf] (%p1174_p3), %v392_v33  ;;  %v396_v35 = vld [vmem:[%s374_s13 + $0x18] sm:$0xf] (%p1174_p3) }
  0x30   : > { %395 = vst [vmem:[%s369_s14 + $0x8] sm:$0xf] (%p1174_p3), %v394_v34  ;;  %397 = vst [vmem:[%s369_s14 + $0xc] sm:$0xf] (%p1174_p3), %v396_v35 }
  0x32 PF: > { %p914_p8 = scmp.ge.s32.totalorder %s1115_s19, 1  ;;  %p427_p9 = scmp.lt.s32.totalorder %s1115_s19, 3 }
  0x34   : > { %p428_p10 = pnand %p914_p8, %p427_p9 }
  0x35   : > { %s434_s21 = sand.u32 (!%p428_p10), 1, %s1099_s15   ;;  %v1073_v36 = vld [vmem:[%s1338_s0 + $0x4] ss:$8 sps:$4 sm:$0xff] (!%p428_p10)   ;;  %v1076_v37 = vld [vmem:[%s1338_s0 + $0x14] ss:$8 sps:$4 sm:$0xff] (!%p428_p10)   ;;  %p485_p11 = scmp.lt.s32.totalorder (!%p428_p10), %s1107_s17, 1 }
  0x36   : > { %431 = sbr.rel (%p428_p10) target bundleno = 322 (0x142), region = 110  ;;  %s915_s22 = sshll.u32 (!%p428_p10), %s434_s21, 7  ;;  %682 = vmatprep.mubr.bf16.mxu0 (!%p428_p10), %v1073_v36  ;;  %690 = vmatprep.mubr.bf16.mxu1 (!%p428_p10), %v1076_v37  ;;  %v1071_v54 = vld [vmem:[%s1338_s0] ss:$8 sps:$4 sm:$0xff] (!%p428_p10)   ;;  %v1074_v55 = vld [vmem:[%s1338_s0 + $0x10] ss:$8 sps:$4 sm:$0xff] (!%p428_p10)  }
  0x37   : > { %s1282_s29 = scalar_lea.vmem (!%p428_p10), [#allocation2], %s915_s22  ;;  %s1309_s8 = sshll.u32 (!%p428_p10), %s434_s21, 4 }
  0x38   : > { %v1055_v38 = vld [vmem:[%s1282_s29 + $0x40] sm:$0xff] (!%p428_p10)   ;;  %v1057_v40 = vld [vmem:[%s1282_s29 + $0x48] sm:$0xff] (!%p428_p10)   ;;  %v1059_v42 = vld [vmem:[%s1282_s29 + $0x50] sm:$0xff] (!%p428_p10)   ;;  %s443_s13 = scalar_lea.vmem (!%p428_p10), [#allocation3], %s1309_s8  ;;  %s477_s15 = scalar_lea.vmem (!%p428_p10), [#allocation4], %s1309_s8 }
  0x39   : > { %v1056_v39 = vld [vmem:[%s1282_s29] sm:$0xff] (!%p428_p10)   ;;  %971 = vmatprep.subr.bf16.mxu0 (!%p428_p10), %v1055_v38  ;;  %999 = vmatprep.subr.bf16.mxu1 (!%p428_p10), %v1055_v38  ;;  %v1058_v41 = vld [vmem:[%s1282_s29 + $0x8] sm:$0xff] (!%p428_p10)   ;;  %v1060_v43 = vld [vmem:[%s1282_s29 + $0x10] sm:$0xff] (!%p428_p10)  }
  0x3a   : > { %972 = vmatpush3.bf16.msra.mxu0 (!%p428_p10), %v1056_v39  ;;  %1007 = vmatpush3.bf16.msra.mxu1 (!%p428_p10), %v1056_v39  ;;  %v1061_v44 = vld [vmem:[%s1282_s29 + $0x58] sm:$0xff] (!%p428_p10)   ;;  %v1063_v46 = vld [vmem:[%s1282_s29 + $0x60] sm:$0xff] (!%p428_p10)   ;;  %v1065_v48 = vld [vmem:[%s1282_s29 + $0x68] sm:$0xff] (!%p428_p10)  }
  0x3b   : > { %973 = vmatprep.subr.bf16.mxu0 (!%p428_p10), %v1057_v40  ;;  %1000 = vmatprep.subr.bf16.mxu1 (!%p428_p10), %v1057_v40  ;;  %v1062_v45 = vld [vmem:[%s1282_s29 + $0x18] sm:$0xff] (!%p428_p10)   ;;  %v1064_v47 = vld [vmem:[%s1282_s29 + $0x20] sm:$0xff] (!%p428_p10)   ;;  %v1066_v49 = vld [vmem:[%s1282_s29 + $0x28] sm:$0xff] (!%p428_p10)  }
  0x3c   : > { %v1067_v50 = vld [vmem:[%s1282_s29 + $0x70] sm:$0xff] (!%p428_p10)   ;;  %v1069_v52 = vld [vmem:[%s1282_s29 + $0x78] sm:$0xff] (!%p428_p10)  }
  0x3d   : > { %v1068_v51 = vld [vmem:[%s1282_s29 + $0x30] sm:$0xff]   ;;  %v1070_v53 = vld [vmem:[%s1282_s29 + $0x38] sm:$0xff]   ;;  %s486_s9 = scalar_select %p485_p11, %s1107_s17, 1 }
  0x3e   : > { %974 = vmatpush3.bf16.msra.mxu0 %v1058_v41  ;;  %1008 = vmatpush3.bf16.msra.mxu1 %v1058_v41  ;;  %v952_v58 = vld [vmem:[%s443_s13] sm:$0xff]   ;;  %v969_v59 = vld [vmem:[%s443_s13 + $0x8] sm:$0xff]   ;;  %s944_s14 = sshll.u32 (%p1181_p6), %s1107_s17, 2 }
  0x3f   : > { %975 = vmatprep.subr.bf16.mxu0 %v1059_v42  ;;  %1001 = vmatprep.subr.bf16.mxu1 %v1059_v42  ;;  %s487_s12 = scalar_lea.vmem %s1340_s2, %s486_s9  ;;  %v953_v3 = vunpack.c.l.bf16 %v952_v58  ;;  %v957_v4 = vunpack.c.l.bf16 %v969_v59  ;;  %v954_v6 = vunpack.c.h.bf16 %v952_v58  ;;  %v958_v8 = vunpack.c.h.bf16 %v969_v59  ;;  %s742_s23 = scalar_lea.vmem (%p1181_p6), %s1342_s4, %s944_s14 }
  0x40   : > { %v918_v60 = vld [vmem:[%s487_s12] ss:$0 sm:$0xff] }
  0x42   : > { %976 = vmatpush3.bf16.msra.mxu0 %v1060_v43  ;;  %1009 = vmatpush3.bf16.msra.mxu1 %v1060_v43 }
  0x43   : > { %977 = vmatprep.subr.bf16.mxu0 %v1061_v44  ;;  %1002 = vmatprep.subr.bf16.mxu1 %v1061_v44 }
  0x46   : > { %978 = vmatpush3.bf16.msra.mxu0 %v1062_v45  ;;  %1010 = vmatpush3.bf16.msra.mxu1 %v1062_v45 }
  0x47   : > { %979 = vmatprep.subr.bf16.mxu0 %v1063_v46  ;;  %1003 = vmatprep.subr.bf16.mxu1 %v1063_v46 }
  0x4a   : > { %980 = vmatpush3.bf16.msra.mxu0 %v1064_v47  ;;  %1011 = vmatpush3.bf16.msra.mxu1 %v1064_v47 }
  0x4b   : > { %981 = vmatprep.subr.bf16.mxu0 %v1065_v48  ;;  %1004 = vmatprep.subr.bf16.mxu1 %v1065_v48 }
  0x4e   : > { %982 = vmatpush3.bf16.msra.mxu0 %v1066_v49  ;;  %1012 = vmatpush3.bf16.msra.mxu1 %v1066_v49 }
  0x4f   : > { %983 = vmatprep.subr.bf16.mxu0 %v1067_v50  ;;  %1005 = vmatprep.subr.bf16.mxu1 %v1067_v50 }
  0x52   : > { %984 = vmatpush3.bf16.msra.mxu0 %v1068_v51  ;;  %1013 = vmatpush3.bf16.msra.mxu1 %v1068_v51 }
  0x53   : > { %985 = vmatprep.subr.bf16.mxu0 %v1069_v52  ;;  %1006 = vmatprep.subr.bf16.mxu1 %v1069_v52 }
  0x56   : > { %986 = vmatpush3.bf16.msra.mxu0 %v1070_v53  ;;  %1014 = vmatpush3.bf16.msra.mxu1 %v1070_v53 }
  0x59   : > { %683 = vmatmul.mubr.bf16.vlgmr.msra.gmra.mrb[0].mxu0 %v1071_v54  ;;  %691 = vmatmul.mubr.bf16.vlgmr.msra.gmra.mrb[0].mxu1 %v1074_v55 }
 0x12c   : > { %v987_v56 = vpop.f32.mrb[0].mxu0  ;;  %v993_v57 = vpop.f32.mrb[0].mxu1 }
 0x12d   : > { %v988_v61 = vpop.f32.mrb[1].mxu0  ;;  %v994_v62 = vpop.f32.mrb[1].mxu1 }
 0x12e   : > { %v989_v63 = vadd.f32 %v988_v61, %v987_v56  ;;  %v995_v0 = vadd.f32 %v994_v62, %v993_v57  ;;  %v990_v1 = vpop.f32.mrb[2].mxu0  ;;  %v996_v2 = vpop.f32.mrb[2].mxu1 }
 0x12f   : > { %v991_v5 = vpop.f32.mrb[3].mxu0  ;;  %v997_v7 = vpop.f32.mrb[3].mxu1 }
 0x130   : > { %v685_v9 = vadd.f32 %v989_v63, %v918_v60  ;;  %v693_v10 = vadd.f32 %v995_v0, %v918_v60  ;;  %v992_v11 = vadd.f32 %v991_v5, %v990_v1  ;;  %v998_v12 = vadd.f32 %v997_v7, %v996_v2 }
 0x132   : > { %v688_v13 = vadd.f32 %v992_v11, %v918_v60  ;;  %v696_v14 = vadd.f32 %v998_v12, %v918_v60  ;;  %v707_v15 = vadd.f32 %v953_v3, %v685_v9  ;;  %v709_v16 = vadd.f32 %v957_v4, %v693_v10  ;;  %737 = sbr.rel (!%p1181_p6) target bundleno = 322 (0x142), region = 122 }
 0x134   : > { %v708_v17 = vadd.f32 %v954_v6, %v688_v13  ;;  %v710_v18 = vadd.f32 %v958_v8, %v696_v14 }
 0x136   : > { %v962_v19 = vpack.c.bf16 %v708_v17, %v707_v15  ;;  %v967_v20 = vpack.c.bf16 %v710_v18, %v709_v16 }
 0x138   : > { %963 = vst [vmem:[%s477_s15] sm:$0xff] %v962_v19   ;;  %970 = vst [vmem:[%s477_s15 + $0x8] sm:$0xff] %v967_v20  }
 0x13f   : > { %v758_v21 = vld [vmem:[%s477_s15] sm:$0xf]  ;;  %v760_v22 = vld [vmem:[%s477_s15 + $0x4] sm:$0xf]  ;;  %v762_v23 = vld [vmem:[%s477_s15 + $0x8] sm:$0xf] }
 0x140   : > { %v764_v24 = vld [vmem:[%s477_s15 + $0xc] sm:$0xf]  ;;  %759 = vst [vmem:[%s742_s23] sm:$0xf] %v758_v21  ;;  %761 = vst [vmem:[%s742_s23 + $0x8] sm:$0xf] %v760_v22 }
 0x141   : > { %763 = vst [vmem:[%s742_s23 + $0x10] sm:$0xf] %v762_v23  ;;  %765 = vst [vmem:[%s742_s23 + $0x18] sm:$0xf] %v764_v24 }
 0x142 PF: > { %s14_s19 = sadd.s32 1, %s1115_s19   ;;  %s1345_s15 = smov %s1103_s16 }
 0x143   : > { %p11_p12 = scmp.ge.s32.totalorder %s14_s19, 4   ;;  %s1346_s16 = smov %s1186_s26 }
 0x144   : > { %s1347_s17 = smov %s1111_s18  ;;  %s1348_s18 = smov %s1350_s20 }
 0x145   :  { %13 = sbr.rel (!%p11_p12) target bundleno = 3 (0x3), region = 208 }

// kernel: _lambda_.24
= control target key start
LH: loop header
LB: loop body
LE: loop exit
PB: predicated region body
PF: predicated region fallthrough
CT: control target
= control target key end

     0   :  { %s1180_s12 = smov 0   ;;  %s1182_s13 = smov 0   ;;  %s1430_s0 = inlined_call_operand.vmem [shape: bf16[32,256], index: 0, kind: input, shape index: {}]   ;;  %s1431_s1 = inlined_call_operand.vmem [shape: bf16[256,512], index: 1, kind: input, shape index: {}]   ;;  %s1432_s2 = inlined_call_operand.vmem [shape: f32[1,512], index: 2, kind: input, shape index: {}]   ;;  %s1433_s3 = inlined_call_operand.vmem [shape: bf16[32,512], index: 3, kind: output, shape index: {}]  }
   0x1   :  { %s1184_s14 = smov 0   ;;  %s1186_s15 = smov 0  }
   0x2   :  { %s1188_s16 = smov 0  }
   0x3 LB: > { %s22_s17 = sadd.s32 1, %s1154_s15  ;;  %s915_s18 = sadd.s32 4294967295, %s1158_s16   ;;  %s1158_s16 = sphi %s1188_s16, %s13_s16   ;;  %s1154_s15 = sphi %s1186_s15, %s1438_s15   ;;  %s1150_s14 = sphi %s1184_s14, %s1437_s14   ;;  %s1146_s13 = sphi %s1182_s13, %s1436_s13   ;;  %s1142_s12 = sphi %s1180_s12, %s1435_s12  }
   0x4   : > { %p23_p0 = scmp.ge.s32.totalorder %s22_s17, 2  ;;  %p65_p1 = scmp.ne.s32.totalorder %s1146_s13, %s1142_s12 }
   0x5   : > { %p66_p2 = scmp.eq.s32.totalorder %s1158_s16, 0  ;;  %p123_p4 = scmp.eq.s32.totalorder %s915_s18, 1 }
   0x6   : > { %s1440_s17 = smov (%p23_p0, %s22_s17), 0  ;;  %s58_s20 = sadd.s32 1, %s1146_s13 }
   0x7   : > { %p67_p3 = por %p66_p2, %p65_p1  ;;  %s55_s19 = ssub.s32 %s1154_s15, %s1440_s17 }
   0x8   : > { %p56_p5 = scmp.eq.s32.totalorder %s55_s19, 0  ;;  %p1215_p6 = por %p123_p4, %p65_p1 }
   0x9   : > { %p919_p7 = scmp.ge.s32.totalorder %s1158_s16, 2 }
   0xa   : > { %s1220_s22 = scalar_select %p56_p5, %s1146_s13, %s58_s20  }
   0xb   : > { %155 = sbr.rel (%p919_p7) target bundleno = 38 (0x26), region = 20 }
  0x12   : > { %158 = sbr.rel (!%p67_p3) target bundleno = 38 (0x26), region = 24  ;;  %s160_s23 = sand.u32 (%p67_p3), 1, %s1146_s13  }
  0x13   : > { %s972_s24 = sshll.u32 (%p67_p3), %s1154_s15, 3  ;;  %s920_s25 = sshll.u32 (%p67_p3), %s160_s23, 8 }
  0x14   : > { %s1228_s28 = scalar_lea.vmem (%p67_p3), %s1431_s1, %s972_s24  ;;  %s1233_s29 = scalar_lea.vmem (%p67_p3), [#allocation2], %s920_s25 }
  0x15   : > { %v255_v0 = vld [vmem:[%s1228_s28] sm:$0xff] (%p67_p3)  ;;  %v257_v1 = vld [vmem:[%s1228_s28 + $0x10] sm:$0xff] (%p67_p3) }
  0x16   : > { %v259_v2 = vld [vmem:[%s1228_s28 + $0x20] sm:$0xff] (%p67_p3)  ;;  %256 = vst [vmem:[%s1233_s29] sm:$0xff] (%p67_p3), %v255_v0  ;;  %258 = vst [vmem:[%s1233_s29 + $0x8] sm:$0xff] (%p67_p3), %v257_v1  ;;  %v261_v3 = vld [vmem:[%s1228_s28 + $0x30] sm:$0xff] (%p67_p3) }
  0x17   : > { %260 = vst [vmem:[%s1233_s29 + $0x10] sm:$0xff] (%p67_p3), %v259_v2  ;;  %v263_v4 = vld [vmem:[%s1228_s28 + $0x40] sm:$0xff] (%p67_p3)  ;;  %v265_v5 = vld [vmem:[%s1228_s28 + $0x50] sm:$0xff] (%p67_p3)  ;;  %262 = vst [vmem:[%s1233_s29 + $0x18] sm:$0xff] (%p67_p3), %v261_v3 }
  0x18   : > { %264 = vst [vmem:[%s1233_s29 + $0x20] sm:$0xff] (%p67_p3), %v263_v4  ;;  %266 = vst [vmem:[%s1233_s29 + $0x28] sm:$0xff] (%p67_p3), %v265_v5  ;;  %v267_v6 = vld [vmem:[%s1228_s28 + $0x60] sm:$0xff] (%p67_p3)  ;;  %v269_v7 = vld [vmem:[%s1228_s28 + $0x70] sm:$0xff] (%p67_p3) }
  0x19   : > { %v271_v8 = vld [vmem:[%s1228_s28 + $0x80] sm:$0xff]  ;;  %268 = vst [vmem:[%s1233_s29 + $0x30] sm:$0xff] %v267_v6  ;;  %270 = vst [vmem:[%s1233_s29 + $0x38] sm:$0xff] %v269_v7  ;;  %v273_v9 = vld [vmem:[%s1228_s28 + $0x90] sm:$0xff] }
  0x1a   : > { %272 = vst [vmem:[%s1233_s29 + $0x40] sm:$0xff] %v271_v8  ;;  %v275_v10 = vld [vmem:[%s1228_s28 + $0xa0] sm:$0xff]  ;;  %v277_v11 = vld [vmem:[%s1228_s28 + $0xb0] sm:$0xff]  ;;  %274 = vst [vmem:[%s1233_s29 + $0x48] sm:$0xff] %v273_v9 }
  0x1b   : > { %276 = vst [vmem:[%s1233_s29 + $0x50] sm:$0xff] %v275_v10  ;;  %278 = vst [vmem:[%s1233_s29 + $0x58] sm:$0xff] %v277_v11  ;;  %v279_v12 = vld [vmem:[%s1228_s28 + $0xc0] sm:$0xff]  ;;  %v281_v13 = vld [vmem:[%s1228_s28 + $0xd0] sm:$0xff] }
  0x1c   : > { %v283_v14 = vld [vmem:[%s1228_s28 + $0xe0] sm:$0xff]  ;;  %280 = vst [vmem:[%s1233_s29 + $0x60] sm:$0xff] %v279_v12  ;;  %282 = vst [vmem:[%s1233_s29 + $0x68] sm:$0xff] %v281_v13  ;;  %v285_v15 = vld [vmem:[%s1228_s28 + $0xf0] sm:$0xff] }
  0x1d   : > { %284 = vst [vmem:[%s1233_s29 + $0x70] sm:$0xff] %v283_v14  ;;  %v287_v16 = vld [vmem:[%s1228_s28 + $0x100] sm:$0xff]  ;;  %v289_v17 = vld [vmem:[%s1228_s28 + $0x110] sm:$0xff]  ;;  %286 = vst [vmem:[%s1233_s29 + $0x78] sm:$0xff] %v285_v15 }
  0x1e   : > { %288 = vst [vmem:[%s1233_s29 + $0x80] sm:$0xff] %v287_v16  ;;  %290 = vst [vmem:[%s1233_s29 + $0x88] sm:$0xff] %v289_v17  ;;  %v291_v18 = vld [vmem:[%s1228_s28 + $0x120] sm:$0xff]  ;;  %v293_v19 = vld [vmem:[%s1228_s28 + $0x130] sm:$0xff] }
  0x1f   : > { %v295_v20 = vld [vmem:[%s1228_s28 + $0x140] sm:$0xff]  ;;  %292 = vst [vmem:[%s1233_s29 + $0x90] sm:$0xff] %v291_v18  ;;  %294 = vst [vmem:[%s1233_s29 + $0x98] sm:$0xff] %v293_v19  ;;  %v297_v21 = vld [vmem:[%s1228_s28 + $0x150] sm:$0xff] }
  0x20   : > { %296 = vst [vmem:[%s1233_s29 + $0xa0] sm:$0xff] %v295_v20  ;;  %v299_v22 = vld [vmem:[%s1228_s28 + $0x160] sm:$0xff]  ;;  %v301_v23 = vld [vmem:[%s1228_s28 + $0x170] sm:$0xff]  ;;  %298 = vst [vmem:[%s1233_s29 + $0xa8] sm:$0xff] %v297_v21 }
  0x21   : > { %300 = vst [vmem:[%s1233_s29 + $0xb0] sm:$0xff] %v299_v22  ;;  %302 = vst [vmem:[%s1233_s29 + $0xb8] sm:$0xff] %v301_v23  ;;  %v303_v24 = vld [vmem:[%s1228_s28 + $0x180] sm:$0xff]  ;;  %v305_v25 = vld [vmem:[%s1228_s28 + $0x190] sm:$0xff] }
  0x22   : > { %v307_v26 = vld [vmem:[%s1228_s28 + $0x1a0] sm:$0xff]  ;;  %304 = vst [vmem:[%s1233_s29 + $0xc0] sm:$0xff] %v303_v24  ;;  %306 = vst [vmem:[%s1233_s29 + $0xc8] sm:$0xff] %v305_v25  ;;  %v309_v27 = vld [vmem:[%s1228_s28 + $0x1b0] sm:$0xff] }
  0x23   : > { %308 = vst [vmem:[%s1233_s29 + $0xd0] sm:$0xff] %v307_v26  ;;  %v311_v28 = vld [vmem:[%s1228_s28 + $0x1c0] sm:$0xff]  ;;  %v313_v29 = vld [vmem:[%s1228_s28 + $0x1d0] sm:$0xff]  ;;  %310 = vst [vmem:[%s1233_s29 + $0xd8] sm:$0xff] %v309_v27 }
  0x24   : > { %312 = vst [vmem:[%s1233_s29 + $0xe0] sm:$0xff] %v311_v28  ;;  %314 = vst [vmem:[%s1233_s29 + $0xe8] sm:$0xff] %v313_v29  ;;  %v315_v30 = vld [vmem:[%s1228_s28 + $0x1e0] sm:$0xff]  ;;  %v317_v31 = vld [vmem:[%s1228_s28 + $0x1f0] sm:$0xff] }
  0x25   : > { %316 = vst [vmem:[%s1233_s29 + $0xf0] sm:$0xff] %v315_v30  ;;  %318 = vst [vmem:[%s1233_s29 + $0xf8] sm:$0xff] %v317_v31 }
  0x26 PF: > { %p923_p8 = scmp.ge.s32.totalorder %s1158_s16, 1  ;;  %p331_p9 = scmp.lt.s32.totalorder %s1158_s16, 3 }
  0x28   : > { %p332_p10 = pnand %p923_p8, %p331_p9 }
  0x29   : > { %s338_s30 = sand.u32 (!%p332_p10), 1, %s1142_s12   ;;  %v1100_v32 = vld [vmem:[%s1430_s0 + $0x4] ss:$8 sps:$4 sm:$0xff] (!%p332_p10)   ;;  %v1103_v33 = vld [vmem:[%s1430_s0 + $0x14] ss:$8 sps:$4 sm:$0xff] (!%p332_p10)   ;;  %s926_s20 = sshll.u32 (!%p332_p10), %s1150_s14, 1  ;;  %v423_v4 = vlaneseq (!%p332_p10) }
  0x2a   : > { %335 = sbr.rel (%p332_p10) target bundleno = 366 (0x16e), region = 66  ;;  %s924_s4 = sshll.u32 (!%p332_p10), %s338_s30, 8  ;;  %645 = vmatprep.mubr.bf16.mxu0 (!%p332_p10), %v1100_v32  ;;  %655 = vmatprep.mubr.bf16.mxu1 (!%p332_p10), %v1103_v33  ;;  %v1098_v2 = vld [vmem:[%s1430_s0] ss:$8 sps:$4 sm:$0xff] (!%p332_p10)   ;;  %v1101_v3 = vld [vmem:[%s1430_s0 + $0x10] ss:$8 sps:$4 sm:$0xff] (!%p332_p10)  }
  0x2b   : > { %s1307_s9 = scalar_lea.vmem (!%p332_p10), [#allocation2], %s924_s4  ;;  %p379_p11 = scmp.lt.s32.totalorder (!%p332_p10), %s926_s20, 3  ;;  %v424_v5 = vshrl.u32 (!%p332_p10), %v423_v4, 7 }
  0x2c   : > { %v1050_v34 = vld [vmem:[%s1307_s9 + $0x4] ss:$8 sps:$4 sm:$0xff] (!%p332_p10)   ;;  %v1052_v35 = vld [vmem:[%s1307_s9] ss:$8 sps:$4 sm:$0xff] (!%p332_p10)   ;;  %v1053_v36 = vld [vmem:[%s1307_s9 + $0x14] ss:$8 sps:$4 sm:$0xff] (!%p332_p10)  }
  0x2d   : > { %613 = vmatprep.subr.bf16.mxu0 (!%p332_p10), %v1050_v34  ;;  %978 = vmatprep.subr.bf16.mxu1 (!%p332_p10), %v1050_v34  ;;  %v1055_v37 = vld [vmem:[%s1307_s9 + $0x10] ss:$8 sps:$4 sm:$0xff] (!%p332_p10)   ;;  %v1056_v38 = vld [vmem:[%s1307_s9 + $0x24] ss:$8 sps:$4 sm:$0xff] (!%p332_p10)   ;;  %v1058_v39 = vld [vmem:[%s1307_s9 + $0x20] ss:$8 sps:$4 sm:$0xff] (!%p332_p10)  }
  0x2e   : > { %614 = vmatpush1.bf16.msra.mxu0 (!%p332_p10), %v1052_v35  ;;  %994 = vmatpush1.bf16.msra.mxu1 (!%p332_p10), %v1052_v35  ;;  %v1059_v40 = vld [vmem:[%s1307_s9 + $0x34] ss:$8 sps:$4 sm:$0xff] (!%p332_p10)   ;;  %v1061_v41 = vld [vmem:[%s1307_s9 + $0x30] ss:$8 sps:$4 sm:$0xff] (!%p332_p10)   ;;  %v1062_v42 = vld [vmem:[%s1307_s9 + $0x44] ss:$8 sps:$4 sm:$0xff] (!%p332_p10)  }
  0x2f   : > { %615 = vmatprep.subr.bf16.mxu0 (!%p332_p10), %v1053_v36  ;;  %979 = vmatprep.subr.bf16.mxu1 (!%p332_p10), %v1053_v36  ;;  %v1064_v43 = vld [vmem:[%s1307_s9 + $0x40] ss:$8 sps:$4 sm:$0xff] (!%p332_p10)   ;;  %v1065_v44 = vld [vmem:[%s1307_s9 + $0x54] ss:$8 sps:$4 sm:$0xff] (!%p332_p10)   ;;  %v1067_v45 = vld [vmem:[%s1307_s9 + $0x50] ss:$8 sps:$4 sm:$0xff] (!%p332_p10)  }
  0x30   : > { %v1068_v46 = vld [vmem:[%s1307_s9 + $0x64] ss:$8 sps:$4 sm:$0xff] (!%p332_p10)   ;;  %v1070_v47 = vld [vmem:[%s1307_s9 + $0x60] ss:$8 sps:$4 sm:$0xff] (!%p332_p10)   ;;  %v1071_v48 = vld [vmem:[%s1307_s9 + $0x74] ss:$8 sps:$4 sm:$0xff] (!%p332_p10)  }
  0x31   : > { %v1073_v49 = vld [vmem:[%s1307_s9 + $0x70] ss:$8 sps:$4 sm:$0xff]   ;;  %v1074_v50 = vld [vmem:[%s1307_s9 + $0x84] ss:$8 sps:$4 sm:$0xff]   ;;  %v1076_v51 = vld [vmem:[%s1307_s9 + $0x80] ss:$8 sps:$4 sm:$0xff]  }
  0x32   : > { %616 = vmatpush1.bf16.msra.mxu0 %v1055_v37  ;;  %995 = vmatpush1.bf16.msra.mxu1 %v1055_v37  ;;  %v1077_v52 = vld [vmem:[%s1307_s9 + $0x94] ss:$8 sps:$4 sm:$0xff]   ;;  %v1079_v53 = vld [vmem:[%s1307_s9 + $0x90] ss:$8 sps:$4 sm:$0xff]   ;;  %v1080_v54 = vld [vmem:[%s1307_s9 + $0xa4] ss:$8 sps:$4 sm:$0xff]  }
  0x33   : > { %617 = vmatprep.subr.bf16.mxu0 %v1056_v38  ;;  %980 = vmatprep.subr.bf16.mxu1 %v1056_v38  ;;  %v1082_v55 = vld [vmem:[%s1307_s9 + $0xa0] ss:$8 sps:$4 sm:$0xff]   ;;  %v1083_v56 = vld [vmem:[%s1307_s9 + $0xb4] ss:$8 sps:$4 sm:$0xff]   ;;  %v1085_v57 = vld [vmem:[%s1307_s9 + $0xb0] ss:$8 sps:$4 sm:$0xff]  }
  0x34   : > { %v1086_v58 = vld [vmem:[%s1307_s9 + $0xc4] ss:$8 sps:$4 sm:$0xff]   ;;  %v1088_v59 = vld [vmem:[%s1307_s9 + $0xc0] ss:$8 sps:$4 sm:$0xff]   ;;  %v1089_v60 = vld [vmem:[%s1307_s9 + $0xd4] ss:$8 sps:$4 sm:$0xff]  }
  0x35   : > { %v1091_v61 = vld [vmem:[%s1307_s9 + $0xd0] ss:$8 sps:$4 sm:$0xff]   ;;  %v1092_v62 = vld [vmem:[%s1307_s9 + $0xe4] ss:$8 sps:$4 sm:$0xff]   ;;  %v1094_v63 = vld [vmem:[%s1307_s9 + $0xe0] ss:$8 sps:$4 sm:$0xff]  }
  0x36   : > { %618 = vmatpush1.bf16.msra.mxu0 %v1058_v39  ;;  %996 = vmatpush1.bf16.msra.mxu1 %v1058_v39  ;;  %v1095_v0 = vld [vmem:[%s1307_s9 + $0xf4] ss:$8 sps:$4 sm:$0xff]   ;;  %v1097_v1 = vld [vmem:[%s1307_s9 + $0xf0] ss:$8 sps:$4 sm:$0xff]   ;;  %s1442_s20 = smov (!%p379_p11, %s926_s20), 3  ;;  %v425_v6 = vsub.s32 0, %v424_v5 }
  0x37   : > { %619 = vmatprep.subr.bf16.mxu0 %v1059_v40  ;;  %981 = vmatprep.subr.bf16.mxu1 %v1059_v40  ;;  %s381_s25 = scalar_lea.vmem %s1432_s2, %s1442_s20  ;;  %v429_v8 = vsub.s32 1, %v424_v5  ;;  %s925_s26 = sshll.u32 %s338_s30, 5 }
  0x38   : > { %v421_v7 = vld [vmem:[%s381_s25] sm:$0x3]  ;;  %s369_s12 = scalar_lea.vmem [#allocation3], %s925_s26  ;;  %s977_s27 = sshll.u32 (%p1215_p6), %s1150_s14, 3 }
  0x39   : > { %v426_v9 = vrot.slane %v421_v7, %v425_v6  ;;  %v430_v10 = vrot.slane %v421_v7, %v429_v8  ;;  %s778_s30 = scalar_lea.vmem (%p1215_p6), %s1433_s3, %s977_s27 }
  0x3a   : > { %620 = vmatpush1.bf16.msra.mxu0 %v1061_v41  ;;  %997 = vmatpush1.bf16.msra.mxu1 %v1061_v41 }
  0x3b   : > { %621 = vmatprep.subr.bf16.mxu0 %v1062_v42  ;;  %982 = vmatprep.subr.bf16.mxu1 %v1062_v42 }
  0x3e   : > { %622 = vmatpush1.bf16.msra.mxu0 %v1064_v43  ;;  %998 = vmatpush1.bf16.msra.mxu1 %v1064_v43 }
  0x3f   : > { %623 = vmatprep.subr.bf16.mxu0 %v1065_v44  ;;  %983 = vmatprep.subr.bf16.mxu1 %v1065_v44 }
  0x42   : > { %624 = vmatpush1.bf16.msra.mxu0 %v1067_v45  ;;  %999 = vmatpush1.bf16.msra.mxu1 %v1067_v45 }
  0x43   : > { %625 = vmatprep.subr.bf16.mxu0 %v1068_v46  ;;  %984 = vmatprep.subr.bf16.mxu1 %v1068_v46 }
  0x46   : > { %626 = vmatpush1.bf16.msra.mxu0 %v1070_v47  ;;  %1000 = vmatpush1.bf16.msra.mxu1 %v1070_v47 }
  0x47   : > { %627 = vmatprep.subr.bf16.mxu0 %v1071_v48  ;;  %985 = vmatprep.subr.bf16.mxu1 %v1071_v48 }
  0x4a   : > { %628 = vmatpush1.bf16.msra.mxu0 %v1073_v49  ;;  %1001 = vmatpush1.bf16.msra.mxu1 %v1073_v49 }
  0x4b   : > { %629 = vmatprep.subr.bf16.mxu0 %v1074_v50  ;;  %986 = vmatprep.subr.bf16.mxu1 %v1074_v50 }
  0x4e   : > { %630 = vmatpush1.bf16.msra.mxu0 %v1076_v51  ;;  %1002 = vmatpush1.bf16.msra.mxu1 %v1076_v51 }
  0x4f   : > { %631 = vmatprep.subr.bf16.mxu0 %v1077_v52  ;;  %987 = vmatprep.subr.bf16.mxu1 %v1077_v52 }
  0x52   : > { %632 = vmatpush1.bf16.msra.mxu0 %v1079_v53  ;;  %1003 = vmatpush1.bf16.msra.mxu1 %v1079_v53 }
  0x53   : > { %633 = vmatprep.subr.bf16.mxu0 %v1080_v54  ;;  %988 = vmatprep.subr.bf16.mxu1 %v1080_v54 }
  0x56   : > { %634 = vmatpush1.bf16.msra.mxu0 %v1082_v55  ;;  %1004 = vmatpush1.bf16.msra.mxu1 %v1082_v55 }
  0x57   : > { %635 = vmatprep.subr.bf16.mxu0 %v1083_v56  ;;  %989 = vmatprep.subr.bf16.mxu1 %v1083_v56 }
  0x5a   : > { %636 = vmatpush1.bf16.msra.mxu0 %v1085_v57  ;;  %1005 = vmatpush1.bf16.msra.mxu1 %v1085_v57 }
  0x5b   : > { %637 = vmatprep.subr.bf16.mxu0 %v1086_v58  ;;  %990 = vmatprep.subr.bf16.mxu1 %v1086_v58 }
  0x5e   : > { %638 = vmatpush1.bf16.msra.mxu0 %v1088_v59  ;;  %1006 = vmatpush1.bf16.msra.mxu1 %v1088_v59 }
  0x5f   : > { %639 = vmatprep.subr.bf16.mxu0 %v1089_v60  ;;  %991 = vmatprep.subr.bf16.mxu1 %v1089_v60 }
  0x62   : > { %640 = vmatpush1.bf16.msra.mxu0 %v1091_v61  ;;  %1007 = vmatpush1.bf16.msra.mxu1 %v1091_v61 }
  0x63   : > { %641 = vmatprep.subr.bf16.mxu0 %v1092_v62  ;;  %992 = vmatprep.subr.bf16.mxu1 %v1092_v62 }
  0x66   : > { %642 = vmatpush1.bf16.msra.mxu0 %v1094_v63  ;;  %1008 = vmatpush1.bf16.msra.mxu1 %v1094_v63 }
  0x67   : > { %643 = vmatprep.subr.bf16.mxu0 %v1095_v0  ;;  %993 = vmatprep.subr.bf16.mxu1 %v1095_v0 }
  0x6a   : > { %644 = vmatpush1.bf16.msra.mxu0 %v1097_v1  ;;  %1009 = vmatpush1.bf16.msra.mxu1 %v1097_v1 }
  0x6d   : > { %646 = vmatmul.mubr.bf16.vlgmr.msra.gmra.mrb[0].mxu0 %v1098_v2  ;;  %656 = vmatmul.mubr.bf16.vlgmr.msra.gmra.mrb[0].mxu1 %v1101_v3 }
 0x140   : > { %v647_v11 = vpop.f32.mrb[0].mxu0  ;;  %v657_v12 = vpop.f32.mrb[0].mxu1 }
 0x141   : > { %v1351_v13 = vadd.f32 %v647_v11, %v426_v9  ;;  %v1353_v14 = vadd.f32 %v657_v12, %v426_v9  ;;  %v649_v15 = vpop.f32.mrb[1].mxu0  ;;  %v659_v16 = vpop.f32.mrb[1].mxu1 }
 0x142   : > { %v1355_v17 = vadd.f32 %v649_v15, %v430_v10  ;;  %v1357_v18 = vadd.f32 %v659_v16, %v430_v10  ;;  %v651_v19 = vpop.f32.mrb[2].mxu0  ;;  %v661_v20 = vpop.f32.mrb[2].mxu1 }
 0x143   : > { %v674_v21 = vmul.f32 0.044715, %v1351_v13  ;;  %v678_v22 = vmul.f32 0.044715, %v1353_v14  ;;  %v1365_v27 = vadd.f32 %v651_v19, %v426_v9  ;;  %v1367_v28 = vadd.f32 %v661_v20, %v426_v9  ;;  %v653_v29 = vpop.f32.mrb[3].mxu0  ;;  %v663_v30 = vpop.f32.mrb[3].mxu1 }
 0x144   : > { %v675_v23 = vmul.f32 0.044715, %v1355_v17  ;;  %v679_v24 = vmul.f32 0.044715, %v1357_v18  ;;  %v1371_v33 = vadd.f32 %v653_v29, %v430_v10  ;;  %v1382_v43 = vadd.f32 %v663_v30, %v430_v10 }
 0x145   : > { %v682_v25 = vmul.f32 %v674_v21, %v1351_v13  ;;  %v686_v26 = vmul.f32 %v678_v22, %v1353_v14  ;;  %v676_v36 = vmul.f32 0.044715, %v1365_v27  ;;  %v680_v39 = vmul.f32 0.044715, %v1367_v28 }
 0x146   : > { %v683_v31 = vmul.f32 %v675_v23, %v1355_v17  ;;  %v687_v32 = vmul.f32 %v679_v24, %v1357_v18  ;;  %v677_v47 = vmul.f32 0.044715, %v1371_v33  ;;  %v681_v56 = vmul.f32 0.044715, %v1382_v43 }
 0x147   : > { %v690_v34 = vmul.f32 %v682_v25, %v1351_v13  ;;  %v694_v35 = vmul.f32 %v686_v26, %v1353_v14  ;;  %v684_v42 = vmul.f32 %v676_v36, %v1365_v27  ;;  %v688_v46 = vmul.f32 %v680_v39, %v1367_v28 }
 0x148   : > { %v691_v37 = vmul.f32 %v683_v31, %v1355_v17  ;;  %v695_v38 = vmul.f32 %v687_v32, %v1357_v18  ;;  %v685_v54 = vmul.f32 %v677_v47, %v1371_v33  ;;  %v689_v60 = vmul.f32 %v681_v56, %v1382_v43 }
 0x149   : > { %v698_v40 = vadd.f32 %v690_v34, %v1351_v13  ;;  %v702_v41 = vadd.f32 %v694_v35, %v1353_v14  ;;  %v692_v50 = vmul.f32 %v684_v42, %v1365_v27  ;;  %v696_v53 = vmul.f32 %v688_v46, %v1367_v28 }
 0x14a   : > { %v699_v44 = vadd.f32 %v691_v37, %v1355_v17  ;;  %v703_v45 = vadd.f32 %v695_v38, %v1357_v18  ;;  %v693_v58 = vmul.f32 %v685_v54, %v1371_v33  ;;  %v697_v63 = vmul.f32 %v689_v60, %v1382_v43 }
 0x14b   : > { %v706_v48 = vmul.f32 0.7978846, %v698_v40  ;;  %v710_v49 = vmul.f32 0.7978846, %v702_v41  ;;  %v700_v55 = vadd.f32 %v692_v50, %v1365_v27  ;;  %v704_v57 = vadd.f32 %v696_v53, %v1367_v28 }
 0x14c   : > { %v707_v51 = vmul.f32 0.7978846, %v699_v44  ;;  %v711_v52 = vmul.f32 0.7978846, %v703_v45  ;;  %v701_v62 = vadd.f32 %v693_v58, %v1371_v33  ;;  %v705_v1 = vadd.f32 %v697_v63, %v1382_v43 }
 0x14d   : > { %1104 = vtanh.f32 %v706_v48  ;;  %v708_v59 = vmul.f32 0.7978846, %v700_v55  ;;  %v712_v61 = vmul.f32 0.7978846, %v704_v57  ;;  %v666_v5 = vmul.f32 0.5, %v1351_v13 }
 0x14e   : > { %1106 = vtanh.f32 %v710_v49  ;;  %v709_v0 = vmul.f32 0.7978846, %v701_v62  ;;  %v713_v2 = vmul.f32 0.7978846, %v705_v1  ;;  %v670_v8 = vmul.f32 0.5, %v1353_v14 }
 0x14f   : > { %1108 = vtanh.f32 %v707_v51  ;;  %v667_v12 = vmul.f32 0.5, %v1355_v17  ;;  %v671_v20 = vmul.f32 0.5, %v1357_v18  ;;  %v668_v25 = vmul.f32 0.5, %v1365_v27 }
 0x150   : > { %1110 = vtanh.f32 %v711_v52  ;;  %v669_v32 = vmul.f32 0.5, %v1371_v33  ;;  %v672_v34 = vmul.f32 0.5, %v1367_v28  ;;  %v673_v37 = vmul.f32 0.5, %v1382_v43 }
 0x151   : > { %1112 = vtanh.f32 %v708_v59 }
 0x152   : > { %1114 = vtanh.f32 %v712_v61 }
 0x153   : > { %1116 = vtanh.f32 %v709_v0 }
 0x154   : > { %1118 = vtanh.f32 %v713_v2 }
 0x157   : > { %v1105_v3 = vpop.eup %1104 }
 0x158   : > { %v1107_v4 = vpop.eup %1106  ;;  %v722_v6 = vadd.f32 1.0, %v1105_v3 }
 0x159   : > { %v1109_v7 = vpop.eup %1108  ;;  %v726_v9 = vadd.f32 1.0, %v1107_v4 }
 0x15a   : > { %v1111_v10 = vpop.eup %1110  ;;  %v730_v11 = vmul.f32 %v722_v6, %v666_v5  ;;  %v723_v15 = vadd.f32 1.0, %v1109_v7 }
 0x15b   : > { %v1113_v16 = vpop.eup %1112  ;;  %v734_v19 = vmul.f32 %v726_v9, %v670_v8  ;;  %v727_v21 = vadd.f32 1.0, %v1111_v10 }
 0x15c   : > { %v1115_v22 = vpop.eup %1114  ;;  %v731_v23 = vmul.f32 %v723_v15, %v667_v12  ;;  %v724_v13 = vadd.f32 1.0, %v1113_v16 }
 0x15d   : > { %v735_v24 = vmul.f32 %v727_v21, %v671_v20  ;;  %v1117_v14 = vpop.eup %1116  ;;  %v728_v29 = vadd.f32 1.0, %v1115_v22 }
 0x15e   : > { %v973_v26 = vpack.c.bf16 %v731_v23, %v730_v11  ;;  %v732_v31 = vmul.f32 %v724_v13, %v668_v25  ;;  %v725_v17 = vadd.f32 1.0, %v1117_v14  ;;  %v1119_v18 = vpop.eup %1118 }
 0x15f   : > { %v975_v30 = vpack.c.bf16 %v735_v24, %v734_v19  ;;  %v736_v36 = vmul.f32 %v728_v29, %v672_v34  ;;  %v729_v38 = vadd.f32 1.0, %v1119_v18  ;;  %772 = sbr.rel (!%p1215_p6) target bundleno = 366 (0x16e), region = 74 }
 0x160   : > { %762 = vst [vmem:[%s369_s12] sm:$0xff] %v973_v26  ;;  %v733_v35 = vmul.f32 %v725_v17, %v669_v32 }
 0x161   : > { %764 = vst [vmem:[%s369_s12 + $0x10] sm:$0xff] %v975_v30  ;;  %v737_v39 = vmul.f32 %v729_v38, %v673_v37 }
 0x162   : > { %v974_v27 = vpack.c.bf16 %v733_v35, %v732_v31 }
 0x163   : > { %v976_v40 = vpack.c.bf16 %v737_v39, %v736_v36 }
 0x164   : > { %763 = vst [vmem:[%s369_s12 + $0x8] sm:$0xff] %v974_v27 }
 0x165   : > { %765 = vst [vmem:[%s369_s12 + $0x18] sm:$0xff] %v976_v40 }
 0x167   : > { %v812_v33 = vld [vmem:[%s369_s12] sm:$0xff] }
 0x168   : > { %v816_v28 = vld [vmem:[%s369_s12 + $0x10] sm:$0xff]  ;;  %813 = vst [vmem:[%s778_s30] sm:$0xff] %v812_v33 }
 0x169   : > { %817 = vst [vmem:[%s778_s30 + $0x20] sm:$0xff] %v816_v28 }
 0x16b   : > { %v814_v41 = vld [vmem:[%s369_s12 + $0x8] sm:$0xff] }
 0x16c   : > { %v818_v42 = vld [vmem:[%s369_s12 + $0x18] sm:$0xff]  ;;  %815 = vst [vmem:[%s778_s30 + $0x10] sm:$0xff] %v814_v41 }
 0x16d   : > { %819 = vst [vmem:[%s778_s30 + $0x30] sm:$0xff] %v818_v42 }
 0x16e PF: > { %s13_s16 = sadd.s32 1, %s1158_s16   ;;  %s1435_s12 = smov %s1146_s13 }
 0x16f   : > { %p10_p12 = scmp.ge.s32.totalorder %s13_s16, 4   ;;  %s1436_s13 = smov %s1220_s22 }
 0x170   : > { %s1437_s14 = smov %s1154_s15  ;;  %s1438_s15 = smov %s1440_s17 }
 0x171   :  { %12 = sbr.rel (!%p10_p12) target bundleno = 3 (0x3), region = 149 }

// kernel: _lambda_.25
= control target key start
LH: loop header
LB: loop body
LE: loop exit
PB: predicated region body
PF: predicated region fallthrough
CT: control target
= control target key end

     0   :  { %s1525_s15 = smov 0   ;;  %s1527_s16 = smov 0   ;;  %s1813_s0 = inlined_call_operand.vmem [shape: bf16[32,512], index: 0, kind: input, shape index: {}]   ;;  %s1814_s1 = inlined_call_operand.vmem [shape: bf16[512,256], index: 1, kind: input, shape index: {}]   ;;  %s1815_s2 = inlined_call_operand.vmem [shape: f32[1,256], index: 2, kind: input, shape index: {}]   ;;  %s1816_s3 = inlined_call_operand.vmem [shape: bf16[32,256], index: 3, kind: input, shape index: {}]   ;;  %s1817_s4 = inlined_call_operand.vmem [shape: bf16[32,256], index: 4, kind: output, shape index: {}]  }
   0x1   :  { %s1529_s17 = smov 0   ;;  %s1531_s18 = smov 0  }
   0x2   :  { %s1533_s19 = smov 0  }
   0x3 LB: > { %s23_s20 = sadd.s32 1, %s1494_s18  ;;  %s1234_s21 = sadd.s32 4294967295, %s1498_s19   ;;  %s1498_s19 = sphi %s1533_s19, %s14_s19   ;;  %s1494_s18 = sphi %s1531_s18, %s1823_s18   ;;  %s1490_s17 = sphi %s1529_s17, %s1822_s17   ;;  %s1486_s16 = sphi %s1527_s16, %s1821_s16   ;;  %s1482_s15 = sphi %s1525_s15, %s1820_s15  }
   0x4   : > { %p24_p0 = scmp.ge.s32.totalorder %s23_s20, 2  ;;  %p66_p1 = scmp.ne.s32.totalorder %s1486_s16, %s1482_s15 }
   0x5   : > { %p67_p2 = scmp.eq.s32.totalorder %s1498_s19, 0  ;;  %p152_p4 = scmp.eq.s32.totalorder %s1234_s21, 1 }
   0x6   : > { %s1825_s20 = smov (%p24_p0, %s23_s20), 0  ;;  %s59_s24 = sadd.s32 1, %s1486_s16 }
   0x7   : > { %p1557_p3 = por %p67_p2, %p66_p1  ;;  %s56_s23 = ssub.s32 %s1494_s18, %s1825_s20 }
   0x8   : > { %p57_p5 = scmp.eq.s32.totalorder %s56_s23, 0  ;;  %p1564_p6 = por %p152_p4, %p66_p1 }
   0x9   : > { %p1238_p7 = scmp.ge.s32.totalorder %s1498_s19, 2 }
   0xa   : > { %s1569_s26 = scalar_select %p57_p5, %s1486_s16, %s59_s24  }
   0xb   : > { %184 = sbr.rel (%p1238_p7) target bundleno = 71 (0x47), region = 20 }
  0x12   : > { %187 = sbr.rel (!%p1557_p3) target bundleno = 64 (0x40), region = 24  ;;  %s189_s27 = sand.u32 (%p1557_p3), 1, %s1486_s16  }
  0x13   : > { %s1240_s28 = sshll.u32 (%p1557_p3), %s1494_s18, 2  ;;  %s1239_s29 = sshll.u32 (%p1557_p3), %s189_s27, 8 }
  0x14   : > { %s1579_s6 = scalar_lea.vmem (%p1557_p3), %s1814_s1, %s1240_s28  ;;  %s1583_s7 = scalar_lea.vmem (%p1557_p3), [#allocation2], %s1239_s29 }
  0x15   : > { %v209_v0 = vld [vmem:[%s1579_s6] sm:$0xf] (%p1557_p3)  ;;  %v211_v1 = vld [vmem:[%s1579_s6 + $0x8] sm:$0xf] (%p1557_p3)  ;;  %v213_v2 = vld [vmem:[%s1579_s6 + $0x10] sm:$0xf] (%p1557_p3) }
  0x16   : > { %210 = vst [vmem:[%s1583_s7] sm:$0xf] (%p1557_p3), %v209_v0  ;;  %212 = vst [vmem:[%s1583_s7 + $0x4] sm:$0xf] (%p1557_p3), %v211_v1  ;;  %v215_v3 = vld [vmem:[%s1579_s6 + $0x18] sm:$0xf] (%p1557_p3) }
  0x17   : > { %v217_v4 = vld [vmem:[%s1579_s6 + $0x20] sm:$0xf] (%p1557_p3)  ;;  %214 = vst [vmem:[%s1583_s7 + $0x8] sm:$0xf] (%p1557_p3), %v213_v2  ;;  %216 = vst [vmem:[%s1583_s7 + $0xc] sm:$0xf] (%p1557_p3), %v215_v3 }
  0x18   : > { %218 = vst [vmem:[%s1583_s7 + $0x10] sm:$0xf] (%p1557_p3), %v217_v4  ;;  %v219_v5 = vld [vmem:[%s1579_s6 + $0x28] sm:$0xf] (%p1557_p3)  ;;  %v221_v6 = vld [vmem:[%s1579_s6 + $0x30] sm:$0xf] (%p1557_p3) }
  0x19   : > { %v223_v7 = vld [vmem:[%s1579_s6 + $0x38] sm:$0xf]  ;;  %220 = vst [vmem:[%s1583_s7 + $0x14] sm:$0xf] %v219_v5  ;;  %222 = vst [vmem:[%s1583_s7 + $0x18] sm:$0xf] %v221_v6 }
  0x1a   : > { %224 = vst [vmem:[%s1583_s7 + $0x1c] sm:$0xf] %v223_v7  ;;  %v225_v8 = vld [vmem:[%s1579_s6 + $0x40] sm:$0xf]  ;;  %v227_v9 = vld [vmem:[%s1579_s6 + $0x48] sm:$0xf] }
  0x1b   : > { %v229_v10 = vld [vmem:[%s1579_s6 + $0x50] sm:$0xf]  ;;  %226 = vst [vmem:[%s1583_s7 + $0x20] sm:$0xf] %v225_v8  ;;  %228 = vst [vmem:[%s1583_s7 + $0x24] sm:$0xf] %v227_v9 }
  0x1c   : > { %230 = vst [vmem:[%s1583_s7 + $0x28] sm:$0xf] %v229_v10  ;;  %v231_v11 = vld [vmem:[%s1579_s6 + $0x58] sm:$0xf]  ;;  %v233_v12 = vld [vmem:[%s1579_s6 + $0x60] sm:$0xf] }
  0x1d   : > { %v235_v13 = vld [vmem:[%s1579_s6 + $0x68] sm:$0xf]  ;;  %232 = vst [vmem:[%s1583_s7 + $0x2c] sm:$0xf] %v231_v11  ;;  %234 = vst [vmem:[%s1583_s7 + $0x30] sm:$0xf] %v233_v12 }
  0x1e   : > { %236 = vst [vmem:[%s1583_s7 + $0x34] sm:$0xf] %v235_v13  ;;  %v237_v14 = vld [vmem:[%s1579_s6 + $0x70] sm:$0xf]  ;;  %v239_v15 = vld [vmem:[%s1579_s6 + $0x78] sm:$0xf] }
  0x1f   : > { %v241_v16 = vld [vmem:[%s1579_s6 + $0x80] sm:$0xf]  ;;  %238 = vst [vmem:[%s1583_s7 + $0x38] sm:$0xf] %v237_v14  ;;  %240 = vst [vmem:[%s1583_s7 + $0x3c] sm:$0xf] %v239_v15 }
  0x20   : > { %242 = vst [vmem:[%s1583_s7 + $0x40] sm:$0xf] %v241_v16  ;;  %v243_v17 = vld [vmem:[%s1579_s6 + $0x88] sm:$0xf]  ;;  %v245_v18 = vld [vmem:[%s1579_s6 + $0x90] sm:$0xf] }
  0x21   : > { %v247_v19 = vld [vmem:[%s1579_s6 + $0x98] sm:$0xf]  ;;  %244 = vst [vmem:[%s1583_s7 + $0x44] sm:$0xf] %v243_v17  ;;  %246 = vst [vmem:[%s1583_s7 + $0x48] sm:$0xf] %v245_v18 }
  0x22   : > { %248 = vst [vmem:[%s1583_s7 + $0x4c] sm:$0xf] %v247_v19  ;;  %v249_v20 = vld [vmem:[%s1579_s6 + $0xa0] sm:$0xf]  ;;  %v251_v21 = vld [vmem:[%s1579_s6 + $0xa8] sm:$0xf] }
  0x23   : > { %v253_v22 = vld [vmem:[%s1579_s6 + $0xb0] sm:$0xf]  ;;  %250 = vst [vmem:[%s1583_s7 + $0x50] sm:$0xf] %v249_v20  ;;  %252 = vst [vmem:[%s1583_s7 + $0x54] sm:$0xf] %v251_v21 }
  0x24   : > { %254 = vst [vmem:[%s1583_s7 + $0x58] sm:$0xf] %v253_v22  ;;  %v255_v23 = vld [vmem:[%s1579_s6 + $0xb8] sm:$0xf]  ;;  %v257_v24 = vld [vmem:[%s1579_s6 + $0xc0] sm:$0xf] }
  0x25   : > { %v259_v25 = vld [vmem:[%s1579_s6 + $0xc8] sm:$0xf]  ;;  %256 = vst [vmem:[%s1583_s7 + $0x5c] sm:$0xf] %v255_v23  ;;  %258 = vst [vmem:[%s1583_s7 + $0x60] sm:$0xf] %v257_v24 }
  0x26   : > { %260 = vst [vmem:[%s1583_s7 + $0x64] sm:$0xf] %v259_v25  ;;  %v261_v26 = vld [vmem:[%s1579_s6 + $0xd0] sm:$0xf]  ;;  %v263_v27 = vld [vmem:[%s1579_s6 + $0xd8] sm:$0xf] }
  0x27   : > { %v265_v28 = vld [vmem:[%s1579_s6 + $0xe0] sm:$0xf]  ;;  %262 = vst [vmem:[%s1583_s7 + $0x68] sm:$0xf] %v261_v26  ;;  %264 = vst [vmem:[%s1583_s7 + $0x6c] sm:$0xf] %v263_v27 }
  0x28   : > { %266 = vst [vmem:[%s1583_s7 + $0x70] sm:$0xf] %v265_v28  ;;  %v267_v29 = vld [vmem:[%s1579_s6 + $0xe8] sm:$0xf]  ;;  %v269_v30 = vld [vmem:[%s1579_s6 + $0xf0] sm:$0xf] }
  0x29   : > { %v271_v31 = vld [vmem:[%s1579_s6 + $0xf8] sm:$0xf]  ;;  %268 = vst [vmem:[%s1583_s7 + $0x74] sm:$0xf] %v267_v29  ;;  %270 = vst [vmem:[%s1583_s7 + $0x78] sm:$0xf] %v269_v30 }
  0x2a   : > { %272 = vst [vmem:[%s1583_s7 + $0x7c] sm:$0xf] %v271_v31  ;;  %v273_v32 = vld [vmem:[%s1579_s6 + $0x100] sm:$0xf]  ;;  %v275_v33 = vld [vmem:[%s1579_s6 + $0x108] sm:$0xf] }
  0x2b   : > { %v277_v34 = vld [vmem:[%s1579_s6 + $0x110] sm:$0xf]  ;;  %274 = vst [vmem:[%s1583_s7 + $0x80] sm:$0xf] %v273_v32  ;;  %276 = vst [vmem:[%s1583_s7 + $0x84] sm:$0xf] %v275_v33 }
  0x2c   : > { %278 = vst [vmem:[%s1583_s7 + $0x88] sm:$0xf] %v277_v34  ;;  %v279_v35 = vld [vmem:[%s1579_s6 + $0x118] sm:$0xf]  ;;  %v281_v36 = vld [vmem:[%s1579_s6 + $0x120] sm:$0xf] }
  0x2d   : > { %v283_v37 = vld [vmem:[%s1579_s6 + $0x128] sm:$0xf]  ;;  %280 = vst [vmem:[%s1583_s7 + $0x8c] sm:$0xf] %v279_v35  ;;  %282 = vst [vmem:[%s1583_s7 + $0x90] sm:$0xf] %v281_v36 }
  0x2e   : > { %284 = vst [vmem:[%s1583_s7 + $0x94] sm:$0xf] %v283_v37  ;;  %v285_v38 = vld [vmem:[%s1579_s6 + $0x130] sm:$0xf]  ;;  %v287_v39 = vld [vmem:[%s1579_s6 + $0x138] sm:$0xf] }
  0x2f   : > { %v289_v40 = vld [vmem:[%s1579_s6 + $0x140] sm:$0xf]  ;;  %286 = vst [vmem:[%s1583_s7 + $0x98] sm:$0xf] %v285_v38  ;;  %288 = vst [vmem:[%s1583_s7 + $0x9c] sm:$0xf] %v287_v39 }
  0x30   : > { %290 = vst [vmem:[%s1583_s7 + $0xa0] sm:$0xf] %v289_v40  ;;  %v291_v41 = vld [vmem:[%s1579_s6 + $0x148] sm:$0xf]  ;;  %v293_v42 = vld [vmem:[%s1579_s6 + $0x150] sm:$0xf] }
  0x31   : > { %v295_v43 = vld [vmem:[%s1579_s6 + $0x158] sm:$0xf]  ;;  %292 = vst [vmem:[%s1583_s7 + $0xa4] sm:$0xf] %v291_v41  ;;  %294 = vst [vmem:[%s1583_s7 + $0xa8] sm:$0xf] %v293_v42 }
  0x32   : > { %296 = vst [vmem:[%s1583_s7 + $0xac] sm:$0xf] %v295_v43  ;;  %v297_v44 = vld [vmem:[%s1579_s6 + $0x160] sm:$0xf]  ;;  %v299_v45 = vld [vmem:[%s1579_s6 + $0x168] sm:$0xf] }
  0x33   : > { %v301_v46 = vld [vmem:[%s1579_s6 + $0x170] sm:$0xf]  ;;  %298 = vst [vmem:[%s1583_s7 + $0xb0] sm:$0xf] %v297_v44  ;;  %300 = vst [vmem:[%s1583_s7 + $0xb4] sm:$0xf] %v299_v45 }
  0x34   : > { %302 = vst [vmem:[%s1583_s7 + $0xb8] sm:$0xf] %v301_v46  ;;  %v303_v47 = vld [vmem:[%s1579_s6 + $0x178] sm:$0xf]  ;;  %v305_v48 = vld [vmem:[%s1579_s6 + $0x180] sm:$0xf] }
  0x35   : > { %v307_v49 = vld [vmem:[%s1579_s6 + $0x188] sm:$0xf]  ;;  %304 = vst [vmem:[%s1583_s7 + $0xbc] sm:$0xf] %v303_v47  ;;  %306 = vst [vmem:[%s1583_s7 + $0xc0] sm:$0xf] %v305_v48 }
  0x36   : > { %308 = vst [vmem:[%s1583_s7 + $0xc4] sm:$0xf] %v307_v49  ;;  %v309_v50 = vld [vmem:[%s1579_s6 + $0x190] sm:$0xf]  ;;  %v311_v51 = vld [vmem:[%s1579_s6 + $0x198] sm:$0xf] }
  0x37   : > { %v313_v52 = vld [vmem:[%s1579_s6 + $0x1a0] sm:$0xf]  ;;  %310 = vst [vmem:[%s1583_s7 + $0xc8] sm:$0xf] %v309_v50  ;;  %312 = vst [vmem:[%s1583_s7 + $0xcc] sm:$0xf] %v311_v51 }
  0x38   : > { %314 = vst [vmem:[%s1583_s7 + $0xd0] sm:$0xf] %v313_v52  ;;  %v315_v53 = vld [vmem:[%s1579_s6 + $0x1a8] sm:$0xf]  ;;  %v317_v54 = vld [vmem:[%s1579_s6 + $0x1b0] sm:$0xf] }
  0x39   : > { %v319_v55 = vld [vmem:[%s1579_s6 + $0x1b8] sm:$0xf]  ;;  %316 = vst [vmem:[%s1583_s7 + $0xd4] sm:$0xf] %v315_v53  ;;  %318 = vst [vmem:[%s1583_s7 + $0xd8] sm:$0xf] %v317_v54 }
  0x3a   : > { %320 = vst [vmem:[%s1583_s7 + $0xdc] sm:$0xf] %v319_v55  ;;  %v321_v56 = vld [vmem:[%s1579_s6 + $0x1c0] sm:$0xf]  ;;  %v323_v57 = vld [vmem:[%s1579_s6 + $0x1c8] sm:$0xf] }
  0x3b   : > { %v325_v58 = vld [vmem:[%s1579_s6 + $0x1d0] sm:$0xf]  ;;  %322 = vst [vmem:[%s1583_s7 + $0xe0] sm:$0xf] %v321_v56  ;;  %324 = vst [vmem:[%s1583_s7 + $0xe4] sm:$0xf] %v323_v57 }
  0x3c   : > { %326 = vst [vmem:[%s1583_s7 + $0xe8] sm:$0xf] %v325_v58  ;;  %v327_v59 = vld [vmem:[%s1579_s6 + $0x1d8] sm:$0xf]  ;;  %v329_v60 = vld [vmem:[%s1579_s6 + $0x1e0] sm:$0xf] }
  0x3d   : > { %v331_v61 = vld [vmem:[%s1579_s6 + $0x1e8] sm:$0xf]  ;;  %328 = vst [vmem:[%s1583_s7 + $0xec] sm:$0xf] %v327_v59  ;;  %330 = vst [vmem:[%s1583_s7 + $0xf0] sm:$0xf] %v329_v60 }
  0x3e   : > { %332 = vst [vmem:[%s1583_s7 + $0xf4] sm:$0xf] %v331_v61  ;;  %v333_v62 = vld [vmem:[%s1579_s6 + $0x1f0] sm:$0xf]  ;;  %v335_v63 = vld [vmem:[%s1579_s6 + $0x1f8] sm:$0xf] }
  0x3f   : > { %334 = vst [vmem:[%s1583_s7 + $0xf8] sm:$0xf] %v333_v62  ;;  %336 = vst [vmem:[%s1583_s7 + $0xfc] sm:$0xf] %v335_v63 }
  0x40 PF: > { %493 = sbr.rel (!%p1557_p3) target bundleno = 71 (0x47), region = 69  ;;  %s495_s8 = sand.u32 (%p1557_p3), 1, %s1486_s16  }
  0x41   : > { %s1242_s9 = sshll.u32 (%p1557_p3), %s1494_s18, 2  ;;  %s1241_s10 = sshll.u32 (%p1557_p3), %s495_s8, 4 }
  0x42   : > { %s502_s13 = scalar_lea.vmem (%p1557_p3), %s1816_s3, %s1242_s9  ;;  %s497_s14 = scalar_lea.vmem (%p1557_p3), [#allocation3], %s1241_s10 }
  0x43   : > { %v518_v0 = vld [vmem:[%s502_s13] sm:$0xf] (%p1557_p3)  ;;  %v520_v1 = vld [vmem:[%s502_s13 + $0x8] sm:$0xf] (%p1557_p3)  ;;  %v522_v2 = vld [vmem:[%s502_s13 + $0x10] sm:$0xf] (%p1557_p3) }
  0x44   : > { %519 = vst [vmem:[%s497_s14] sm:$0xf] (%p1557_p3), %v518_v0  ;;  %521 = vst [vmem:[%s497_s14 + $0x4] sm:$0xf] (%p1557_p3), %v520_v1  ;;  %v524_v3 = vld [vmem:[%s502_s13 + $0x18] sm:$0xf] (%p1557_p3) }
  0x45   : > { %523 = vst [vmem:[%s497_s14 + $0x8] sm:$0xf] (%p1557_p3), %v522_v2  ;;  %525 = vst [vmem:[%s497_s14 + $0xc] sm:$0xf] (%p1557_p3), %v524_v3 }
  0x47 PF: > { %p1243_p8 = scmp.ge.s32.totalorder %s1498_s19, 1  ;;  %p555_p9 = scmp.lt.s32.totalorder %s1498_s19, 3 }
  0x49   : > { %p556_p10 = pnand %p1243_p8, %p555_p9 }
  0x4a   : > { %s562_s21 = sand.u32 (!%p556_p10), 1, %s1482_s15   ;;  %v1450_v4 = vld [vmem:[%s1813_s0 + $0x4] ss:$16 sps:$4 sm:$0xff] (!%p556_p10)   ;;  %v1453_v5 = vld [vmem:[%s1813_s0 + $0xc] ss:$16 sps:$4 sm:$0xff] (!%p556_p10)   ;;  %p613_p11 = scmp.lt.s32.totalorder (!%p556_p10), %s1490_s17, 1 }
  0x4b   : > { %559 = sbr.rel (%p556_p10) target bundleno = 353 (0x161), region = 110  ;;  %s1244_s22 = sshll.u32 (!%p556_p10), %s562_s21, 8  ;;  %962 = vmatprep.mubr.bf16.mxu0 (!%p556_p10), %v1450_v4  ;;  %1011 = vmatprep.mubr.bf16.mxu1 (!%p556_p10), %v1453_v5  ;;  %v1448_v36 = vld [vmem:[%s1813_s0] ss:$16 sps:$4 sm:$0xff] (!%p556_p10)   ;;  %v1451_v38 = vld [vmem:[%s1813_s0 + $0x8] ss:$16 sps:$4 sm:$0xff] (!%p556_p10)  }
  0x4c   : > { %s1729_s29 = scalar_lea.vmem (!%p556_p10), [#allocation2], %s1244_s22  ;;  %v1454_v40 = vld [vmem:[%s1813_s0 + $0x24] ss:$16 sps:$4 sm:$0xff] (!%p556_p10)   ;;  %v1456_v41 = vld [vmem:[%s1813_s0 + $0x2c] ss:$16 sps:$4 sm:$0xff] (!%p556_p10)   ;;  %s1785_s24 = sshll.u32 (!%p556_p10), %s562_s21, 4 }
  0x4d   : > { %v1416_v6 = vld [vmem:[%s1729_s29 + $0x40] sm:$0xff] (!%p556_p10)   ;;  %v1420_v10 = vld [vmem:[%s1729_s29 + $0x48] sm:$0xff] (!%p556_p10)   ;;  %v1424_v14 = vld [vmem:[%s1729_s29 + $0x50] sm:$0xff] (!%p556_p10)   ;;  %s571_s30 = scalar_lea.vmem (!%p556_p10), [#allocation3], %s1785_s24  ;;  %s605_s15 = scalar_lea.vmem (!%p556_p10), [#allocation4], %s1785_s24 }
  0x4e   : > { %v1417_v7 = vld [vmem:[%s1729_s29 + $0xc0] sm:$0xff] (!%p556_p10)   ;;  %1320 = vmatprep.subr.bf16.mxu0 (!%p556_p10), %v1416_v6  ;;  %v1421_v11 = vld [vmem:[%s1729_s29 + $0xc8] sm:$0xff] (!%p556_p10)   ;;  %v1425_v15 = vld [vmem:[%s1729_s29 + $0xd0] sm:$0xff] (!%p556_p10)  }
  0x4f   : > { %v1418_v8 = vld [vmem:[%s1729_s29] sm:$0xff] (!%p556_p10)   ;;  %1348 = vmatprep.subr.bf16.mxu1 (!%p556_p10), %v1417_v7  ;;  %v1422_v12 = vld [vmem:[%s1729_s29 + $0x8] sm:$0xff] (!%p556_p10)   ;;  %v1426_v16 = vld [vmem:[%s1729_s29 + $0x10] sm:$0xff] (!%p556_p10)  }
  0x50   : > { %v1419_v9 = vld [vmem:[%s1729_s29 + $0x80] sm:$0xff] (!%p556_p10)   ;;  %1321 = vmatpush3.bf16.msra.mxu0 (!%p556_p10), %v1418_v8  ;;  %v1423_v13 = vld [vmem:[%s1729_s29 + $0x88] sm:$0xff] (!%p556_p10)   ;;  %v1427_v17 = vld [vmem:[%s1729_s29 + $0x90] sm:$0xff] (!%p556_p10)  }
  0x51   : > { %1349 = vmatpush3.bf16.msra.mxu1 (!%p556_p10), %v1419_v9  ;;  %1322 = vmatprep.subr.bf16.mxu0 (!%p556_p10), %v1420_v10  ;;  %v1428_v18 = vld [vmem:[%s1729_s29 + $0x58] sm:$0xff] (!%p556_p10)   ;;  %v1432_v22 = vld [vmem:[%s1729_s29 + $0x60] sm:$0xff] (!%p556_p10)   ;;  %v1436_v26 = vld [vmem:[%s1729_s29 + $0x68] sm:$0xff] (!%p556_p10)  }
  0x52   : > { %1350 = vmatprep.subr.bf16.mxu1 %v1421_v11  ;;  %v1429_v19 = vld [vmem:[%s1729_s29 + $0xd8] sm:$0xff]   ;;  %v1433_v23 = vld [vmem:[%s1729_s29 + $0xe0] sm:$0xff]   ;;  %v1437_v27 = vld [vmem:[%s1729_s29 + $0xe8] sm:$0xff]   ;;  %s614_s23 = scalar_select %p613_p11, %s1490_s17, 1 }
  0x53   : > { %v1430_v20 = vld [vmem:[%s1729_s29 + $0x18] sm:$0xff]   ;;  %v1434_v24 = vld [vmem:[%s1729_s29 + $0x20] sm:$0xff]   ;;  %v1438_v28 = vld [vmem:[%s1729_s29 + $0x28] sm:$0xff]   ;;  %s1293_s21 = sshll.u32 (%p1564_p6), %s1490_s17, 2 }
  0x54   : > { %1323 = vmatpush3.bf16.msra.mxu0 %v1422_v12  ;;  %v1431_v21 = vld [vmem:[%s1729_s29 + $0x98] sm:$0xff]   ;;  %v1435_v25 = vld [vmem:[%s1729_s29 + $0xa0] sm:$0xff]   ;;  %v1439_v29 = vld [vmem:[%s1729_s29 + $0xa8] sm:$0xff]   ;;  %s1071_s7 = scalar_lea.vmem (%p1564_p6), %s1817_s4, %s1293_s21 }
  0x55   : > { %1351 = vmatpush3.bf16.msra.mxu1 %v1423_v13  ;;  %1324 = vmatprep.subr.bf16.mxu0 %v1424_v14  ;;  %v1440_v30 = vld [vmem:[%s1729_s29 + $0x70] sm:$0xff]   ;;  %v1444_v34 = vld [vmem:[%s1729_s29 + $0x78] sm:$0xff]  }
  0x56   : > { %1352 = vmatprep.subr.bf16.mxu1 %v1425_v15  ;;  %v1441_v31 = vld [vmem:[%s1729_s29 + $0xf0] sm:$0xff]   ;;  %v1445_v35 = vld [vmem:[%s1729_s29 + $0xf8] sm:$0xff]  }
  0x57   : > { %v1442_v32 = vld [vmem:[%s1729_s29 + $0x30] sm:$0xff]   ;;  %v1446_v37 = vld [vmem:[%s1729_s29 + $0x38] sm:$0xff]  }
  0x58   : > { %1325 = vmatpush3.bf16.msra.mxu0 %v1426_v16  ;;  %v1443_v33 = vld [vmem:[%s1729_s29 + $0xb0] sm:$0xff]   ;;  %v1447_v39 = vld [vmem:[%s1729_s29 + $0xb8] sm:$0xff]   ;;  %s615_s29 = scalar_lea.vmem %s1815_s2, %s614_s23 }
  0x59   : > { %1353 = vmatpush3.bf16.msra.mxu1 %v1427_v17  ;;  %1326 = vmatprep.subr.bf16.mxu0 %v1428_v18  ;;  %v1458_v42 = vld [vmem:[%s1813_s0 + $0x20] ss:$16 sps:$4 sm:$0xff]   ;;  %v1459_v43 = vld [vmem:[%s1813_s0 + $0x28] ss:$16 sps:$4 sm:$0xff]  }
  0x5a   : > { %1354 = vmatprep.subr.bf16.mxu1 %v1429_v19  ;;  %v1247_v46 = vld [vmem:[%s615_s29] ss:$0 sm:$0xff]  ;;  %v1318_v9 = vld [vmem:[%s571_s30 + $0x8] sm:$0xff]  }
  0x5b   : > { %v1301_v52 = vld [vmem:[%s571_s30] sm:$0xff]   ;;  %v1306_v18 = vunpack.c.l.bf16 %v1318_v9 }
  0x5c   : > { %1327 = vmatpush3.bf16.msra.mxu0 %v1430_v20  ;;  %v1302_v60 = vunpack.c.l.bf16 %v1301_v52  ;;  %v1303_v62 = vunpack.c.h.bf16 %v1301_v52  ;;  %v1307_v20 = vunpack.c.h.bf16 %v1318_v9 }
  0x5d   : > { %1355 = vmatpush3.bf16.msra.mxu1 %v1431_v21  ;;  %1328 = vmatprep.subr.bf16.mxu0 %v1432_v22 }
  0x5e   : > { %1356 = vmatprep.subr.bf16.mxu1 %v1433_v23 }
  0x60   : > { %1329 = vmatpush3.bf16.msra.mxu0 %v1434_v24 }
  0x61   : > { %1357 = vmatpush3.bf16.msra.mxu1 %v1435_v25  ;;  %1330 = vmatprep.subr.bf16.mxu0 %v1436_v26 }
  0x62   : > { %1358 = vmatprep.subr.bf16.mxu1 %v1437_v27 }
  0x64   : > { %1331 = vmatpush3.bf16.msra.mxu0 %v1438_v28 }
  0x65   : > { %1359 = vmatpush3.bf16.msra.mxu1 %v1439_v29  ;;  %1332 = vmatprep.subr.bf16.mxu0 %v1440_v30 }
  0x66   : > { %1360 = vmatprep.subr.bf16.mxu1 %v1441_v31 }
  0x68   : > { %1333 = vmatpush3.bf16.msra.mxu0 %v1442_v32 }
  0x69   : > { %1361 = vmatpush3.bf16.msra.mxu1 %v1443_v33  ;;  %1334 = vmatprep.subr.bf16.mxu0 %v1444_v34 }
  0x6a   : > { %1362 = vmatprep.subr.bf16.mxu1 %v1445_v35 }
  0x6c   : > { %1335 = vmatpush3.bf16.msra.mxu0 %v1446_v37 }
  0x6d   : > { %1363 = vmatpush3.bf16.msra.mxu1 %v1447_v39 }
  0x6f   : > { %963 = vmatmul.mubr.bf16.vlgmr.msra.gmra.mrb[0].mxu0 %v1448_v36 }
  0x70   : > { %1012 = vmatmul.mubr.bf16.vlgmr.msra.gmra.mrb[0].mxu1 %v1451_v38  ;;  %970 = vmatprep.mubr.bf16.mxu0 %v1454_v40 }
  0x71   : > { %1019 = vmatprep.mubr.bf16.mxu1 %v1456_v41 }
  0x77   : > { %971 = vmatmul.mubr.bf16.gmra.mrb[4].mxu0 %v1458_v42 }
  0x78   : > { %1020 = vmatmul.mubr.bf16.gmra.mrb[4].mxu1 %v1459_v43 }
 0x142   : > { %v1336_v44 = vpop.f32.mrb[0].mxu0 }
 0x143   : > { %v1364_v45 = vpop.f32.mrb[0].mxu1  ;;  %v1337_v47 = vpop.f32.mrb[1].mxu0 }
 0x144   : > { %v1338_v48 = vadd.f32 %v1337_v47, %v1336_v44  ;;  %v1365_v49 = vpop.f32.mrb[1].mxu1  ;;  %v1339_v50 = vpop.f32.mrb[2].mxu0 }
 0x145   : > { %v1366_v51 = vadd.f32 %v1365_v49, %v1364_v45  ;;  %v1367_v53 = vpop.f32.mrb[2].mxu1  ;;  %v1340_v54 = vpop.f32.mrb[3].mxu0 }
 0x146   : > { %v965_v55 = vadd.f32 %v1338_v48, %v1247_v46  ;;  %v1341_v56 = vadd.f32 %v1340_v54, %v1339_v50  ;;  %v1368_v57 = vpop.f32.mrb[3].mxu1 }
 0x147   : > { %v1369_v58 = vadd.f32 %v1368_v57, %v1367_v53 }
 0x148   : > { %v1014_v59 = vadd.f32 %v1366_v51, %v965_v55  ;;  %v968_v61 = vadd.f32 %v1341_v56, %v1247_v46 }
 0x14a   : > { %v1017_v63 = vadd.f32 %v1369_v58, %v968_v61  ;;  %v1342_v0 = vpop.f32.mrb[4].mxu0  ;;  %v1036_v3 = vadd.f32 %v1302_v60, %v1014_v59 }
 0x14b   : > { %v1370_v1 = vpop.f32.mrb[4].mxu1  ;;  %v1343_v2 = vpop.f32.mrb[5].mxu0 }
 0x14c   : > { %v1037_v4 = vadd.f32 %v1303_v62, %v1017_v63  ;;  %v1344_v5 = vadd.f32 %v1343_v2, %v1342_v0  ;;  %v1371_v6 = vpop.f32.mrb[5].mxu1  ;;  %v1345_v7 = vpop.f32.mrb[6].mxu0 }
 0x14d   : > { %v1372_v8 = vadd.f32 %v1371_v6, %v1370_v1  ;;  %v1373_v10 = vpop.f32.mrb[6].mxu1  ;;  %v1346_v11 = vpop.f32.mrb[7].mxu0 }
 0x14e   : > { %v1311_v12 = vpack.c.bf16 %v1037_v4, %v1036_v3  ;;  %v973_v13 = vadd.f32 %v1344_v5, %v1247_v46  ;;  %v1347_v14 = vadd.f32 %v1346_v11, %v1345_v7  ;;  %v1374_v15 = vpop.f32.mrb[7].mxu1 }
 0x14f   : > { %v1375_v16 = vadd.f32 %v1374_v15, %v1373_v10 }
 0x150   : > { %1312 = vst [vmem:[%s605_s15] sm:$0xff] %v1311_v12   ;;  %v1022_v17 = vadd.f32 %v1372_v8, %v973_v13  ;;  %v976_v19 = vadd.f32 %v1347_v14, %v1247_v46 }
 0x152   : > { %v1025_v21 = vadd.f32 %v1375_v16, %v976_v19  ;;  %v1038_v22 = vadd.f32 %v1306_v18, %v1022_v17  ;;  %1066 = sbr.rel (!%p1564_p6) target bundleno = 353 (0x161), region = 122 }
 0x154   : > { %v1039_v23 = vadd.f32 %v1307_v20, %v1025_v21 }
 0x156   : > { %v1316_v24 = vpack.c.bf16 %v1039_v23, %v1038_v22 }
 0x157   : > { %v1087_v25 = vld [vmem:[%s605_s15] sm:$0xf] (%p1564_p6)  ;;  %v1089_v26 = vld [vmem:[%s605_s15 + $0x4] sm:$0xf] (%p1564_p6) }
 0x158   : > { %1319 = vst [vmem:[%s605_s15 + $0x8] sm:$0xff] %v1316_v24   ;;  %1088 = vst [vmem:[%s1071_s7] sm:$0xf] (%p1564_p6), %v1087_v25 }
 0x159   : > { %1090 = vst [vmem:[%s1071_s7 + $0x8] sm:$0xf] %v1089_v26 }
 0x15f   : > { %v1091_v27 = vld [vmem:[%s605_s15 + $0x8] sm:$0xf]  ;;  %v1093_v28 = vld [vmem:[%s605_s15 + $0xc] sm:$0xf] }
 0x160   : > { %1092 = vst [vmem:[%s1071_s7 + $0x10] sm:$0xf] %v1091_v27  ;;  %1094 = vst [vmem:[%s1071_s7 + $0x18] sm:$0xf] %v1093_v28 }
 0x161 PF: > { %s14_s19 = sadd.s32 1, %s1498_s19   ;;  %s1820_s15 = smov %s1486_s16 }
 0x162   : > { %p11_p12 = scmp.ge.s32.totalorder %s14_s19, 4   ;;  %s1821_s16 = smov %s1569_s26 }
 0x163   : > { %s1822_s17 = smov %s1494_s18  ;;  %s1823_s18 = smov %s1825_s20 }
 0x164   :  { %13 = sbr.rel (!%p11_p12) target bundleno = 3 (0x3), region = 208 }

// kernel: _lambda_.27
= control target key start
LH: loop header
LB: loop body
LE: loop exit
PB: predicated region body
PF: predicated region fallthrough
CT: control target
= control target key end

     0   :  { %s1019_s9 = smov 0   ;;  %s1021_s10 = smov 0   ;;  %s1209_s0 = inlined_call_operand.vmem [shape: bf16[32,256], index: 0, kind: input, shape index: {}]   ;;  %s1210_s1 = inlined_call_operand.vmem [shape: bf16[256,768], index: 1, kind: input, shape index: {}]   ;;  %s1211_s2 = inlined_call_operand.vmem [shape: bf16[32,768], index: 2, kind: output, shape index: {}]  }
   0x1   :  { %s1023_s11 = smov 0   ;;  %s1025_s12 = smov 0  }
   0x2   :  { %s1027_s13 = smov 0  }
   0x3 LB: > { %s21_s14 = sadd.s32 1, %s998_s12  ;;  %s776_s15 = sadd.s32 4294967295, %s1002_s13   ;;  %s1002_s13 = sphi %s1027_s13, %s12_s13   ;;  %s998_s12 = sphi %s1025_s12, %s1216_s12   ;;  %s994_s11 = sphi %s1023_s11, %s1215_s11   ;;  %s990_s10 = sphi %s1021_s10, %s1214_s10   ;;  %s986_s9 = sphi %s1019_s9, %s1213_s9  }
   0x4   : > { %p22_p0 = scmp.ge.s32.totalorder %s21_s14, 3  ;;  %p64_p1 = scmp.ne.s32.totalorder %s990_s10, %s986_s9 }
   0x5   : > { %p65_p2 = scmp.eq.s32.totalorder %s1002_s13, 0  ;;  %p96_p4 = scmp.eq.s32.totalorder %s776_s15, 2 }
   0x6   : > { %s1218_s14 = smov (%p22_p0, %s21_s14), 0  ;;  %s57_s17 = sadd.s32 1, %s990_s10 }
   0x7   : > { %p66_p3 = por %p65_p2, %p64_p1  ;;  %s54_s16 = ssub.s32 %s998_s12, %s1218_s14 }
   0x8   : > { %p55_p5 = scmp.eq.s32.totalorder %s54_s16, 0  ;;  %p1054_p6 = por %p96_p4, %p64_p1 }
   0x9   : > { %p780_p7 = scmp.ge.s32.totalorder %s1002_s13, 3 }
   0xa   : > { %s1059_s19 = scalar_select %p55_p5, %s990_s10, %s57_s17  }
   0xb   : > { %128 = sbr.rel (%p780_p7) target bundleno = 38 (0x26), region = 20 }
  0x12   : > { %131 = sbr.rel (!%p66_p3) target bundleno = 38 (0x26), region = 24  ;;  %s133_s20 = sand.u32 (%p66_p3), 1, %s990_s10  }
  0x13   : > { %s832_s21 = sshll.u32 (%p66_p3), %s998_s12, 3  ;;  %s781_s22 = sshll.u32 (%p66_p3), %s133_s20, 8 }
  0x14   : > { %s1067_s25 = scalar_lea.vmem (%p66_p3), %s1210_s1, %s832_s21  ;;  %s1072_s26 = scalar_lea.vmem (%p66_p3), [#allocation2], %s781_s22 }
  0x15   : > { %v228_v0 = vld [vmem:[%s1067_s25] sm:$0xff] (%p66_p3)  ;;  %v230_v1 = vld [vmem:[%s1067_s25 + $0x18] sm:$0xff] (%p66_p3)  ;;  %v232_v2 = vld [vmem:[%s1067_s25 + $0x30] sm:$0xff] (%p66_p3) }
  0x16   : > { %229 = vst [vmem:[%s1072_s26] sm:$0xff] (%p66_p3), %v228_v0  ;;  %231 = vst [vmem:[%s1072_s26 + $0x8] sm:$0xff] (%p66_p3), %v230_v1  ;;  %v234_v3 = vld [vmem:[%s1067_s25 + $0x48] sm:$0xff] (%p66_p3)  ;;  %v236_v4 = vld [vmem:[%s1067_s25 + $0x60] sm:$0xff] (%p66_p3) }
  0x17   : > { %233 = vst [vmem:[%s1072_s26 + $0x10] sm:$0xff] (%p66_p3), %v232_v2  ;;  %v238_v5 = vld [vmem:[%s1067_s25 + $0x78] sm:$0xff] (%p66_p3)  ;;  %235 = vst [vmem:[%s1072_s26 + $0x18] sm:$0xff] (%p66_p3), %v234_v3  ;;  %v240_v6 = vld [vmem:[%s1067_s25 + $0x90] sm:$0xff] (%p66_p3) }
  0x18   : > { %237 = vst [vmem:[%s1072_s26 + $0x20] sm:$0xff] (%p66_p3), %v236_v4  ;;  %239 = vst [vmem:[%s1072_s26 + $0x28] sm:$0xff] (%p66_p3), %v238_v5  ;;  %v242_v7 = vld [vmem:[%s1067_s25 + $0xa8] sm:$0xff] (%p66_p3)  ;;  %v244_v8 = vld [vmem:[%s1067_s25 + $0xc0] sm:$0xff] (%p66_p3) }
  0x19   : > { %241 = vst [vmem:[%s1072_s26 + $0x30] sm:$0xff] %v240_v6  ;;  %243 = vst [vmem:[%s1072_s26 + $0x38] sm:$0xff] %v242_v7  ;;  %v246_v9 = vld [vmem:[%s1067_s25 + $0xd8] sm:$0xff]  ;;  %v248_v10 = vld [vmem:[%s1067_s25 + $0xf0] sm:$0xff] }
  0x1a   : > { %245 = vst [vmem:[%s1072_s26 + $0x40] sm:$0xff] %v244_v8  ;;  %v250_v11 = vld [vmem:[%s1067_s25 + $0x108] sm:$0xff]  ;;  %247 = vst [vmem:[%s1072_s26 + $0x48] sm:$0xff] %v246_v9  ;;  %v252_v12 = vld [vmem:[%s1067_s25 + $0x120] sm:$0xff] }
  0x1b   : > { %249 = vst [vmem:[%s1072_s26 + $0x50] sm:$0xff] %v248_v10  ;;  %251 = vst [vmem:[%s1072_s26 + $0x58] sm:$0xff] %v250_v11  ;;  %v254_v13 = vld [vmem:[%s1067_s25 + $0x138] sm:$0xff]  ;;  %v256_v14 = vld [vmem:[%s1067_s25 + $0x150] sm:$0xff] }
  0x1c   : > { %253 = vst [vmem:[%s1072_s26 + $0x60] sm:$0xff] %v252_v12  ;;  %255 = vst [vmem:[%s1072_s26 + $0x68] sm:$0xff] %v254_v13  ;;  %v258_v15 = vld [vmem:[%s1067_s25 + $0x168] sm:$0xff]  ;;  %v260_v16 = vld [vmem:[%s1067_s25 + $0x180] sm:$0xff] }
  0x1d   : > { %257 = vst [vmem:[%s1072_s26 + $0x70] sm:$0xff] %v256_v14  ;;  %v262_v17 = vld [vmem:[%s1067_s25 + $0x198] sm:$0xff]  ;;  %259 = vst [vmem:[%s1072_s26 + $0x78] sm:$0xff] %v258_v15  ;;  %v264_v18 = vld [vmem:[%s1067_s25 + $0x1b0] sm:$0xff] }
  0x1e   : > { %261 = vst [vmem:[%s1072_s26 + $0x80] sm:$0xff] %v260_v16  ;;  %263 = vst [vmem:[%s1072_s26 + $0x88] sm:$0xff] %v262_v17  ;;  %v266_v19 = vld [vmem:[%s1067_s25 + $0x1c8] sm:$0xff]  ;;  %v268_v20 = vld [vmem:[%s1067_s25 + $0x1e0] sm:$0xff] }
  0x1f   : > { %265 = vst [vmem:[%s1072_s26 + $0x90] sm:$0xff] %v264_v18  ;;  %267 = vst [vmem:[%s1072_s26 + $0x98] sm:$0xff] %v266_v19  ;;  %v270_v21 = vld [vmem:[%s1067_s25 + $0x1f8] sm:$0xff]  ;;  %v272_v22 = vld [vmem:[%s1067_s25 + $0x210] sm:$0xff] }
  0x20   : > { %269 = vst [vmem:[%s1072_s26 + $0xa0] sm:$0xff] %v268_v20  ;;  %v274_v23 = vld [vmem:[%s1067_s25 + $0x228] sm:$0xff]  ;;  %271 = vst [vmem:[%s1072_s26 + $0xa8] sm:$0xff] %v270_v21  ;;  %v276_v24 = vld [vmem:[%s1067_s25 + $0x240] sm:$0xff] }
  0x21   : > { %273 = vst [vmem:[%s1072_s26 + $0xb0] sm:$0xff] %v272_v22  ;;  %275 = vst [vmem:[%s1072_s26 + $0xb8] sm:$0xff] %v274_v23  ;;  %v278_v25 = vld [vmem:[%s1067_s25 + $0x258] sm:$0xff]  ;;  %v280_v26 = vld [vmem:[%s1067_s25 + $0x270] sm:$0xff] }
  0x22   : > { %277 = vst [vmem:[%s1072_s26 + $0xc0] sm:$0xff] %v276_v24  ;;  %279 = vst [vmem:[%s1072_s26 + $0xc8] sm:$0xff] %v278_v25  ;;  %v282_v27 = vld [vmem:[%s1067_s25 + $0x288] sm:$0xff]  ;;  %v284_v28 = vld [vmem:[%s1067_s25 + $0x2a0] sm:$0xff] }
  0x23   : > { %281 = vst [vmem:[%s1072_s26 + $0xd0] sm:$0xff] %v280_v26  ;;  %v286_v29 = vld [vmem:[%s1067_s25 + $0x2b8] sm:$0xff]  ;;  %283 = vst [vmem:[%s1072_s26 + $0xd8] sm:$0xff] %v282_v27  ;;  %v288_v30 = vld [vmem:[%s1067_s25 + $0x2d0] sm:$0xff] }
  0x24   : > { %285 = vst [vmem:[%s1072_s26 + $0xe0] sm:$0xff] %v284_v28  ;;  %287 = vst [vmem:[%s1072_s26 + $0xe8] sm:$0xff] %v286_v29  ;;  %v290_v31 = vld [vmem:[%s1067_s25 + $0x2e8] sm:$0xff] }
  0x25   : > { %289 = vst [vmem:[%s1072_s26 + $0xf0] sm:$0xff] %v288_v30  ;;  %291 = vst [vmem:[%s1072_s26 + $0xf8] sm:$0xff] %v290_v31 }
  0x26 PF: > { %p784_p8 = scmp.ge.s32.totalorder %s1002_s13, 1  ;;  %p296_p9 = scmp.lt.s32.totalorder %s1002_s13, 4 }
  0x28   : > { %p297_p10 = pnand %p784_p8, %p296_p9 }
  0x29   : > { %s303_s27 = sand.u32 (!%p297_p10), 1, %s986_s9   ;;  %v960_v32 = vld [vmem:[%s1209_s0 + $0x4] ss:$8 sps:$4 sm:$0xff] (!%p297_p10)   ;;  %v963_v33 = vld [vmem:[%s1209_s0 + $0x14] ss:$8 sps:$4 sm:$0xff] (!%p297_p10)  }
  0x2a   : > { %300 = sbr.rel (%p297_p10) target bundleno = 335 (0x14f), region = 62  ;;  %s785_s28 = sshll.u32 (!%p297_p10), %s303_s27, 8  ;;  %587 = vmatprep.mubr.bf16.mxu0 (!%p297_p10), %v960_v32  ;;  %597 = vmatprep.mubr.bf16.mxu1 (!%p297_p10), %v963_v33  ;;  %v958_v2 = vld [vmem:[%s1209_s0] ss:$8 sps:$4 sm:$0xff] (!%p297_p10)   ;;  %v961_v3 = vld [vmem:[%s1209_s0 + $0x10] ss:$8 sps:$4 sm:$0xff] (!%p297_p10)  }
  0x2b   : > { %s1146_s5 = scalar_lea.vmem (!%p297_p10), [#allocation2], %s785_s28  ;;  %s786_s16 = sshll.u32 (!%p297_p10), %s303_s27, 5 }
  0x2c   : > { %v910_v34 = vld [vmem:[%s1146_s5 + $0x4] ss:$8 sps:$4 sm:$0xff] (!%p297_p10)   ;;  %v912_v35 = vld [vmem:[%s1146_s5] ss:$8 sps:$4 sm:$0xff] (!%p297_p10)   ;;  %v913_v36 = vld [vmem:[%s1146_s5 + $0x14] ss:$8 sps:$4 sm:$0xff] (!%p297_p10)  }
  0x2d   : > { %555 = vmatprep.subr.bf16.mxu0 (!%p297_p10), %v910_v34  ;;  %838 = vmatprep.subr.bf16.mxu1 (!%p297_p10), %v910_v34  ;;  %v915_v37 = vld [vmem:[%s1146_s5 + $0x10] ss:$8 sps:$4 sm:$0xff] (!%p297_p10)   ;;  %v916_v38 = vld [vmem:[%s1146_s5 + $0x24] ss:$8 sps:$4 sm:$0xff] (!%p297_p10)   ;;  %v918_v39 = vld [vmem:[%s1146_s5 + $0x20] ss:$8 sps:$4 sm:$0xff] (!%p297_p10)  }
  0x2e   : > { %556 = vmatpush1.bf16.msra.mxu0 (!%p297_p10), %v912_v35  ;;  %854 = vmatpush1.bf16.msra.mxu1 (!%p297_p10), %v912_v35  ;;  %v919_v40 = vld [vmem:[%s1146_s5 + $0x34] ss:$8 sps:$4 sm:$0xff] (!%p297_p10)   ;;  %v921_v41 = vld [vmem:[%s1146_s5 + $0x30] ss:$8 sps:$4 sm:$0xff] (!%p297_p10)   ;;  %v922_v42 = vld [vmem:[%s1146_s5 + $0x44] ss:$8 sps:$4 sm:$0xff] (!%p297_p10)  }
  0x2f   : > { %557 = vmatprep.subr.bf16.mxu0 (!%p297_p10), %v913_v36  ;;  %839 = vmatprep.subr.bf16.mxu1 (!%p297_p10), %v913_v36  ;;  %v924_v43 = vld [vmem:[%s1146_s5 + $0x40] ss:$8 sps:$4 sm:$0xff] (!%p297_p10)   ;;  %v925_v44 = vld [vmem:[%s1146_s5 + $0x54] ss:$8 sps:$4 sm:$0xff] (!%p297_p10)   ;;  %v927_v45 = vld [vmem:[%s1146_s5 + $0x50] ss:$8 sps:$4 sm:$0xff] (!%p297_p10)  }
  0x30   : > { %v928_v46 = vld [vmem:[%s1146_s5 + $0x64] ss:$8 sps:$4 sm:$0xff] (!%p297_p10)   ;;  %v930_v47 = vld [vmem:[%s1146_s5 + $0x60] ss:$8 sps:$4 sm:$0xff] (!%p297_p10)   ;;  %v931_v48 = vld [vmem:[%s1146_s5 + $0x74] ss:$8 sps:$4 sm:$0xff] (!%p297_p10)  }
  0x31   : > { %v933_v49 = vld [vmem:[%s1146_s5 + $0x70] ss:$8 sps:$4 sm:$0xff]   ;;  %v934_v50 = vld [vmem:[%s1146_s5 + $0x84] ss:$8 sps:$4 sm:$0xff]   ;;  %v936_v51 = vld [vmem:[%s1146_s5 + $0x80] ss:$8 sps:$4 sm:$0xff]  }
  0x32   : > { %558 = vmatpush1.bf16.msra.mxu0 %v915_v37  ;;  %855 = vmatpush1.bf16.msra.mxu1 %v915_v37  ;;  %v937_v52 = vld [vmem:[%s1146_s5 + $0x94] ss:$8 sps:$4 sm:$0xff]   ;;  %v939_v53 = vld [vmem:[%s1146_s5 + $0x90] ss:$8 sps:$4 sm:$0xff]   ;;  %v940_v54 = vld [vmem:[%s1146_s5 + $0xa4] ss:$8 sps:$4 sm:$0xff]  }
  0x33   : > { %559 = vmatprep.subr.bf16.mxu0 %v916_v38  ;;  %840 = vmatprep.subr.bf16.mxu1 %v916_v38  ;;  %v942_v55 = vld [vmem:[%s1146_s5 + $0xa0] ss:$8 sps:$4 sm:$0xff]   ;;  %v943_v56 = vld [vmem:[%s1146_s5 + $0xb4] ss:$8 sps:$4 sm:$0xff]   ;;  %v945_v57 = vld [vmem:[%s1146_s5 + $0xb0] ss:$8 sps:$4 sm:$0xff]  }
  0x34   : > { %v946_v58 = vld [vmem:[%s1146_s5 + $0xc4] ss:$8 sps:$4 sm:$0xff]   ;;  %v948_v59 = vld [vmem:[%s1146_s5 + $0xc0] ss:$8 sps:$4 sm:$0xff]   ;;  %v949_v60 = vld [vmem:[%s1146_s5 + $0xd4] ss:$8 sps:$4 sm:$0xff]  }
  0x35   : > { %v951_v61 = vld [vmem:[%s1146_s5 + $0xd0] ss:$8 sps:$4 sm:$0xff]   ;;  %v952_v62 = vld [vmem:[%s1146_s5 + $0xe4] ss:$8 sps:$4 sm:$0xff]   ;;  %v954_v63 = vld [vmem:[%s1146_s5 + $0xe0] ss:$8 sps:$4 sm:$0xff]  }
  0x36   : > { %560 = vmatpush1.bf16.msra.mxu0 %v918_v39  ;;  %856 = vmatpush1.bf16.msra.mxu1 %v918_v39  ;;  %v955_v0 = vld [vmem:[%s1146_s5 + $0xf4] ss:$8 sps:$4 sm:$0xff]   ;;  %v957_v1 = vld [vmem:[%s1146_s5 + $0xf0] ss:$8 sps:$4 sm:$0xff]   ;;  %s328_s17 = scalar_lea.vmem [#allocation3], %s786_s16  ;;  %s837_s9 = sshll.u32 (%p1054_p6), %s994_s11, 3 }
  0x37   : > { %561 = vmatprep.subr.bf16.mxu0 %v919_v40  ;;  %841 = vmatprep.subr.bf16.mxu1 %v919_v40  ;;  %s648_s22 = scalar_lea.vmem (%p1054_p6), %s1211_s2, %s837_s9 }
  0x3a   : > { %562 = vmatpush1.bf16.msra.mxu0 %v921_v41  ;;  %857 = vmatpush1.bf16.msra.mxu1 %v921_v41 }
  0x3b   : > { %563 = vmatprep.subr.bf16.mxu0 %v922_v42  ;;  %842 = vmatprep.subr.bf16.mxu1 %v922_v42 }
  0x3e   : > { %564 = vmatpush1.bf16.msra.mxu0 %v924_v43  ;;  %858 = vmatpush1.bf16.msra.mxu1 %v924_v43 }
  0x3f   : > { %565 = vmatprep.subr.bf16.mxu0 %v925_v44  ;;  %843 = vmatprep.subr.bf16.mxu1 %v925_v44 }
  0x42   : > { %566 = vmatpush1.bf16.msra.mxu0 %v927_v45  ;;  %859 = vmatpush1.bf16.msra.mxu1 %v927_v45 }
  0x43   : > { %567 = vmatprep.subr.bf16.mxu0 %v928_v46  ;;  %844 = vmatprep.subr.bf16.mxu1 %v928_v46 }
  0x46   : > { %568 = vmatpush1.bf16.msra.mxu0 %v930_v47  ;;  %860 = vmatpush1.bf16.msra.mxu1 %v930_v47 }
  0x47   : > { %569 = vmatprep.subr.bf16.mxu0 %v931_v48  ;;  %845 = vmatprep.subr.bf16.mxu1 %v931_v48 }
  0x4a   : > { %570 = vmatpush1.bf16.msra.mxu0 %v933_v49  ;;  %861 = vmatpush1.bf16.msra.mxu1 %v933_v49 }
  0x4b   : > { %571 = vmatprep.subr.bf16.mxu0 %v934_v50  ;;  %846 = vmatprep.subr.bf16.mxu1 %v934_v50 }
  0x4e   : > { %572 = vmatpush1.bf16.msra.mxu0 %v936_v51  ;;  %862 = vmatpush1.bf16.msra.mxu1 %v936_v51 }
  0x4f   : > { %573 = vmatprep.subr.bf16.mxu0 %v937_v52  ;;  %847 = vmatprep.subr.bf16.mxu1 %v937_v52 }
  0x52   : > { %574 = vmatpush1.bf16.msra.mxu0 %v939_v53  ;;  %863 = vmatpush1.bf16.msra.mxu1 %v939_v53 }
  0x53   : > { %575 = vmatprep.subr.bf16.mxu0 %v940_v54  ;;  %848 = vmatprep.subr.bf16.mxu1 %v940_v54 }
  0x56   : > { %576 = vmatpush1.bf16.msra.mxu0 %v942_v55  ;;  %864 = vmatpush1.bf16.msra.mxu1 %v942_v55 }
  0x57   : > { %577 = vmatprep.subr.bf16.mxu0 %v943_v56  ;;  %849 = vmatprep.subr.bf16.mxu1 %v943_v56 }
  0x5a   : > { %578 = vmatpush1.bf16.msra.mxu0 %v945_v57  ;;  %865 = vmatpush1.bf16.msra.mxu1 %v945_v57 }
  0x5b   : > { %579 = vmatprep.subr.bf16.mxu0 %v946_v58  ;;  %850 = vmatprep.subr.bf16.mxu1 %v946_v58 }
  0x5e   : > { %580 = vmatpush1.bf16.msra.mxu0 %v948_v59  ;;  %866 = vmatpush1.bf16.msra.mxu1 %v948_v59 }
  0x5f   : > { %581 = vmatprep.subr.bf16.mxu0 %v949_v60  ;;  %851 = vmatprep.subr.bf16.mxu1 %v949_v60 }
  0x62   : > { %582 = vmatpush1.bf16.msra.mxu0 %v951_v61  ;;  %867 = vmatpush1.bf16.msra.mxu1 %v951_v61 }
  0x63   : > { %583 = vmatprep.subr.bf16.mxu0 %v952_v62  ;;  %852 = vmatprep.subr.bf16.mxu1 %v952_v62 }
  0x66   : > { %584 = vmatpush1.bf16.msra.mxu0 %v954_v63  ;;  %868 = vmatpush1.bf16.msra.mxu1 %v954_v63 }
  0x67   : > { %585 = vmatprep.subr.bf16.mxu0 %v955_v0  ;;  %853 = vmatprep.subr.bf16.mxu1 %v955_v0 }
  0x6a   : > { %586 = vmatpush1.bf16.msra.mxu0 %v957_v1  ;;  %869 = vmatpush1.bf16.msra.mxu1 %v957_v1 }
  0x6d   : > { %588 = vmatmul.mubr.bf16.vlgmr.msra.gmra.mrb[0].mxu0 %v958_v2  ;;  %598 = vmatmul.mubr.bf16.vlgmr.msra.gmra.mrb[0].mxu1 %v961_v3 }
 0x140   : > { %v589_v4 = vpop.f32.mrb[0].mxu0  ;;  %v599_v5 = vpop.f32.mrb[0].mxu1  ;;  %642 = sbr.rel (!%p1054_p6) target bundleno = 335 (0x14f), region = 70 }
 0x141   : > { %v591_v6 = vpop.f32.mrb[1].mxu0  ;;  %v601_v7 = vpop.f32.mrb[1].mxu1 }
 0x142   : > { %v833_v8 = vpack.c.bf16 %v591_v6, %v589_v4  ;;  %v835_v9 = vpack.c.bf16 %v601_v7, %v599_v5  ;;  %v593_v10 = vpop.f32.mrb[2].mxu0  ;;  %v603_v11 = vpop.f32.mrb[2].mxu1 }
 0x143   : > { %v595_v12 = vpop.f32.mrb[3].mxu0  ;;  %v605_v13 = vpop.f32.mrb[3].mxu1 }
 0x144   : > { %632 = vst [vmem:[%s328_s17] sm:$0xff] %v833_v8  ;;  %634 = vst [vmem:[%s328_s17 + $0x10] sm:$0xff] %v835_v9  ;;  %v834_v14 = vpack.c.bf16 %v595_v12, %v593_v10  ;;  %v836_v15 = vpack.c.bf16 %v605_v13, %v603_v11 }
 0x146   : > { %633 = vst [vmem:[%s328_s17 + $0x8] sm:$0xff] %v834_v14  ;;  %635 = vst [vmem:[%s328_s17 + $0x18] sm:$0xff] %v836_v15 }
 0x14b   : > { %v682_v16 = vld [vmem:[%s328_s17] sm:$0xff]  ;;  %v686_v18 = vld [vmem:[%s328_s17 + $0x10] sm:$0xff] }
 0x14c   : > { %683 = vst [vmem:[%s648_s22] sm:$0xff] %v682_v16  ;;  %687 = vst [vmem:[%s648_s22 + $0x30] sm:$0xff] %v686_v18 }
 0x14d   : > { %v684_v17 = vld [vmem:[%s328_s17 + $0x8] sm:$0xff]  ;;  %v688_v19 = vld [vmem:[%s328_s17 + $0x18] sm:$0xff] }
 0x14e   : > { %685 = vst [vmem:[%s648_s22 + $0x18] sm:$0xff] %v684_v17  ;;  %689 = vst [vmem:[%s648_s22 + $0x48] sm:$0xff] %v688_v19 }
 0x14f PF: > { %s12_s13 = sadd.s32 1, %s1002_s13   ;;  %s1213_s9 = smov %s990_s10 }
 0x150   : > { %p9_p11 = scmp.ge.s32.totalorder %s12_s13, 5   ;;  %s1214_s10 = smov %s1059_s19 }
 0x151   : > { %s1215_s11 = smov %s998_s12  ;;  %s1216_s12 = smov %s1218_s14 }
 0x152   :  { %11 = sbr.rel (!%p9_p11) target bundleno = 3 (0x3), region = 142 }

// kernel: _lambda_.28
= control target key start
LH: loop header
LB: loop body
LE: loop exit
PB: predicated region body
PF: predicated region fallthrough
CT: control target
= control target key end

     0   :  { %s1162_s0 = inlined_call_operand.vmem [shape: bf16[32,768], index: 0, kind: input, shape index: {}, may-alias: {0,1,2}]   ;;  %s1163_s1 = inlined_call_operand.vmem [shape: bf16[32,768], index: 1, kind: input, shape index: {}, may-alias: {0,1,2}]   ;;  %s1164_s2 = inlined_call_operand.vmem [shape: bf16[32,768], index: 2, kind: input, shape index: {}, may-alias: {0,1,2}]   ;;  %s1165_s3 = inlined_call_operand.vmem [shape: bf16[32,256], index: 3, kind: output, shape index: {}]  }
   0x1   :  { %1168 = sst [smem:[#allocation9_spill]] %s1165_s3 }
   0x2   :  { %s963_s12 = smov 0   ;;  %s965_s13 = smov 0  }
   0x3   :  { %s967_s14 = smov 0   ;;  %s969_s15 = smov 0  }
   0x4   :  { %s971_s16 = smov 0   ;;  %s973_s17 = smov 0  }
   0x5   :  { %s975_s18 = smov 0   ;;  %s977_s19 = smov 0  }
   0x6   :  { %s979_s20 = smov 0   ;;  %s981_s21 = smov 0  }
   0x7   :  { %s983_s22 = smov 0  }
   0x8 LB: > { %s22_s24 = sadd.s32 1, %s931_s20  ;;  %s25_s25 = sadd.s32 1, %s935_s21  ;;  %s939_s22 = sphi %s983_s22, %s13_s22   ;;  %s935_s21 = sphi %s981_s21, %s1190_s21   ;;  %s931_s20 = sphi %s979_s20, %s1189_s20   ;;  %s927_s19 = sphi %s977_s19, %s1188_s19   ;;  %s923_s18 = sphi %s975_s18, %s1187_s18   ;;  %s919_s17 = sphi %s973_s17, %s1186_s17   ;;  %s915_s16 = sphi %s971_s16, %s1185_s16   ;;  %s911_s15 = sphi %s969_s15, %s1184_s15   ;;  %s907_s14 = sphi %s967_s14, %s1183_s14   ;;  %s903_s13 = sphi %s965_s13, %s1182_s13   ;;  %s899_s12 = sphi %s963_s12, %s1181_s12  }
   0x9   : > { %p23_p0 = scmp.ge.s32.totalorder %s22_s24, 2  ;;  %s34_s26 = sadd.s32 1, %s919_s17 }
   0xa   : > { %p41_p1 = scmp.ne.s32.totalorder %s919_s17, %s915_s16  ;;  %p42_p2 = scmp.eq.s32.totalorder %s939_s22, 0 }
   0xb   : > { %s1192_s24 = smov (%p23_p0, %s22_s24), 0  ;;  %s1194_s25 = smov (!%p23_p0, %s25_s25), %s935_s21 }
   0xc   : > { %1169 = sst [smem:[#allocation6_spill]] %s1192_s24  ;;  %s30_s27 = ssub.s32 %s931_s20, %s1192_s24 }
   0xd   : > { %p27_p3 = scmp.ge.s32.totalorder %s1194_s25, 2  ;;  %s57_s28 = sadd.s32 2, %s931_s20 }
   0xe   : > { %p1036_p4 = por %p42_p2, %p41_p1  ;;  %s58_s30 = sadd.s32 2, %s1192_s24 }
   0xf   : > { %s1196_s25 = smov (%p27_p3, %s1194_s25), 0  ;;  %s60_s4 = ssub.s32 %s57_s28, %s58_s30 }
  0x10   : > { %1171 = sst [smem:[#allocation7_spill]] %s1196_s25  ;;  %s64_s5 = sadd.s32 1, %s911_s15 }
  0x11   : > { %s29_s6 = ssub.s32 %s935_s21, %s1196_s25  ;;  %p71_p5 = scmp.ne.s32.totalorder %s911_s15, %s907_s14 }
  0x12   : > { %s31_s7 = sor.u32 %s30_s27, %s29_s6  ;;  %s61_s8 = sor.u32 %s60_s4, %s29_s6 }
  0x13   : > { %p32_p6 = scmp.eq.s32.totalorder %s31_s7, 0  ;;  %p62_p7 = scmp.eq.s32.totalorder %s61_s8, 0 }
  0x14   : > { %p1050_p8 = por %p71_p5, %p42_p2  ;;  %s87_s10 = sadd.s32 4, %s931_s20 }
  0x15   : > { %s1056_s11 = scalar_select %p32_p6, %s919_s17, %s34_s26  }
  0x16   : > { %s1059_s28 = scalar_select %p62_p7, %s911_s15, %s64_s5  }
  0x17   : > { %1173 = sst [smem:[#allocation8_spill]] %s1056_s11  ;;  %s88_s30 = sadd.s32 4, %s1192_s24 }
  0x18   : > { %s94_s23 = sadd.s32 1, %s903_s13  ;;  %s90_s25 = ssub.s32 %s87_s10, %s88_s30 }
  0x19   : > { %p101_p9 = scmp.ne.s32.totalorder %s903_s13, %s899_s12  ;;  %s91_s27 = sor.u32 %s90_s25, %s29_s6 }
  0x1a   : > { %s1174_s3 = sadd.s32 4294967295, %s939_s22   ;;  %p92_p11 = scmp.eq.s32.totalorder %s91_s27, 0 }
  0x1b   : > { %p133_p10 = scmp.eq.s32.totalorder %s1174_s3, 3  ;;  %p1069_p12 = por %p101_p9, %p42_p2 }
  0x1c   : > { %s1081_s26 = scalar_select %p92_p11, %s903_s13, %s94_s23  }
  0x1d   : > { %p1076_p13 = por %p133_p10, %p41_p1  ;;  %p697_p0 = scmp.ge.s32.totalorder %s939_s22, 4 }
  0x1f   : > { %155 = sbr.rel (%p697_p0) target bundleno = 62 (0x3e), region = 16 }
  0x26   : > { %158 = sbr.rel (!%p1036_p4) target bundleno = 46 (0x2e), region = 20  ;;  %s160_s3 = sand.u32 (%p1036_p4), 1, %s919_s17  }
  0x27   : > { %s751_s25 = smul.u32 (%p1036_p4), 12, %s935_s21  ;;  %s698_s5 = sshll.u32 (%p1036_p4), %s160_s3, 3 }
  0x28   : > { %s162_s23 = scalar_lea.vmem (%p1036_p4), [#allocation2], %s698_s5 }
  0x29   : > { %s165_s6 = sadd.s32 (%p1036_p4), %s931_s20, %s751_s25 }
  0x2a   : > { %s701_s8 = sshll.u32 (%p1036_p4), %s165_s6, 2 }
  0x2b   : > { %s167_s27 = scalar_lea.vmem (%p1036_p4), %s1162_s0, %s701_s8 }
  0x2c   : > { %v183_v0 = vld [vmem:[%s167_s27] sm:$0xf] (%p1036_p4)  ;;  %v185_v1 = vld [vmem:[%s167_s27 + $0x18] sm:$0xf] (%p1036_p4) }
  0x2d   : > { %184 = vst [vmem:[%s162_s23] sm:$0xf] %v183_v0  ;;  %186 = vst [vmem:[%s162_s23 + $0x4] sm:$0xf] %v185_v1 }
  0x2e PF: > { %213 = sbr.rel (!%p1050_p8) target bundleno = 54 (0x36), region = 61  ;;  %s215_s29 = sand.u32 (%p1050_p8), 1, %s911_s15  }
  0x2f   : > { %s600_s3 = smul.u32 (%p1050_p8), 12, %s935_s21  ;;  %s702_s25 = sshll.u32 (%p1050_p8), %s215_s29, 3 }
  0x30   : > { %s217_s5 = scalar_lea.vmem (%p1050_p8), [#allocation3], %s702_s25 }
  0x31   : > { %s601_s6 = sadd.s32 (%p1050_p8), %s931_s20, %s600_s3 }
  0x32   : > { %s703_s24 = sshll.u32 (%p1050_p8), %s601_s6, 2 }
  0x33   : > { %s603_s8 = scalar_lea.vmem (%p1050_p8), %s1163_s1, %s703_s24 }
  0x34   : > { %v704_v2 = vld [vmem:[%s603_s8 + $0x8] sm:$0xf] (%p1050_p8)  ;;  %v705_v3 = vld [vmem:[%s603_s8 + $0x20] sm:$0xf] (%p1050_p8) }
  0x35   : > { %240 = vst [vmem:[%s217_s5] sm:$0xf] %v704_v2  ;;  %242 = vst [vmem:[%s217_s5 + $0x4] sm:$0xf] %v705_v3 }
  0x36 PF: > { %269 = sbr.rel (!%p1069_p12) target bundleno = 62 (0x3e), region = 102  ;;  %s271_s9 = sand.u32 (%p1069_p12), 1, %s903_s13  }
  0x37   : > { %s607_s30 = smul.u32 (%p1069_p12), 12, %s935_s21  ;;  %s706_s27 = sshll.u32 (%p1069_p12), %s271_s9, 3 }
  0x38   : > { %s273_s25 = scalar_lea.vmem (%p1069_p12), [#allocation4], %s706_s27 }
  0x39   : > { %s608_s23 = sadd.s32 (%p1069_p12), %s931_s20, %s607_s30 }
  0x3a   : > { %s707_s29 = sshll.u32 (%p1069_p12), %s608_s23, 2 }
  0x3b   : > { %s610_s24 = scalar_lea.vmem (%p1069_p12), %s1164_s2, %s707_s29 }
  0x3c   : > { %v708_v4 = vld [vmem:[%s610_s24 + $0x10] sm:$0xf] (%p1069_p12)  ;;  %v709_v5 = vld [vmem:[%s610_s24 + $0x28] sm:$0xf] (%p1069_p12) }
  0x3d   : > { %296 = vst [vmem:[%s273_s25] sm:$0xf] %v708_v4  ;;  %298 = vst [vmem:[%s273_s25 + $0x4] sm:$0xf] %v709_v5 }
  0x3e PF: > { %p710_p1 = scmp.ge.s32.totalorder %s939_s22, 1  ;;  %p324_p2 = scmp.lt.s32.totalorder %s939_s22, 5 }
  0x40   : > { %p325_p3 = pnand %p710_p1, %p324_p2 }
  0x41   : > { %s338_s4 = sand.u32 (!%p325_p3), 1, %s907_s14   ;;  %s331_s6 = sand.u32 (!%p325_p3), 1, %s915_s16   ;;  %v941_v6 = vmov (!%p325_p3), 0.0   ;;  %vm942_vm0 = vmmov (!%p325_p3), 0   ;;  %vm439_vm1 = vcmask (!%p325_p3), 130048  }
  0x42   : > { %328 = sbr.rel (%p325_p3) target bundleno = 679 (0x2a7), region = 143  ;;  %739 = vmatprep.subr.bf16.mxu0 (!%p325_p3), %v941_v6  ;;  %s712_s10 = sshll.u32 (!%p325_p3), %s338_s4, 3  ;;  %741 = vmatprep.mubr.msk.bf16.mxu0 (!%p325_p3), %vm942_vm0, %v941_v6 }
  0x43   : > { %s1112_s8 = sshll.u32 (!%p325_p3), %s331_s6, 3  ;;  %745 = vmatprep.subr.bf16.mxu1 (!%p325_p3), %v941_v6  ;;  %747 = vmatprep.mubr.msk.bf16.mxu1 (!%p325_p3), %vm942_vm0, %v941_v6  ;;  %s340_s5 = scalar_lea.vmem (!%p325_p3), [#allocation3], %s712_s10 }
  0x44   : > { %v842_v7 = vld [vmem:[%s340_s5] sm:$0xff] (!%p325_p3)   ;;  %s333_s9 = scalar_lea.vmem (!%p325_p3), [#allocation2], %s1112_s8  ;;  %s345_s14 = sand.u32 (!%p325_p3), 1, %s899_s12  }
  0x45   : > { %740 = vmatpush3.bf16.xpose.msra.mxu0 (!%p325_p3), %v842_v7  ;;  %v843_v8 = vld [vmem:[%s333_s9] sm:$0xff] (!%p325_p3)   ;;  %s713_s16 = sshll.u32 (!%p325_p3), %s345_s14, 3  ;;  %s374_s12 = scalar_lea.vmem (!%p325_p3), [#allocation5], %s1112_s8 }
  0x46   : > { %s347_s30 = scalar_lea.vmem (!%p325_p3), [#allocation4], %s713_s16 }
  0x47   : > { %v844_v15 = vld [vmem:[%s347_s30] sm:$0xff] (!%p325_p3)  }
  0x48   : > { %746 = vmatpush3.bf16.msra.mxu1 (!%p325_p3), %v844_v15 }
  0x49   : > { %s729_s27 = sshll.u32 (%p1076_p13), %s927_s19, 2  ;;  %s1177_s24 = sld [smem:[#allocation9_spill]] (%p1076_p13) }
  0x4a   : > { %s534_s23 = sadd.s32 (%p1076_p13), %s923_s18, %s729_s27 }
  0x4b   : > { %s724_s29 = sshll.u32 (%p1076_p13), %s534_s23, 2 }
  0x4c   : > { %742 = vmatmul.mubr.bf16.vlgmr.msra.gmra.mrb[0].mxu0 %v843_v8 }
  0x4f   : > { %s536_s25 = scalar_lea.vmem (%p1076_p13), %s1177_s24, %s724_s29 }
 0x11f   : > { %v432_v9 = vpop.f32.mrb[0].mxu0 }
 0x120   : > { %v743_v10 = vpop.f32.mrb[1].mxu0  ;;  %v440_v11 = vsel %vm439_vm1, %v432_v9, -inf }
 0x121   : > { %441 = vmax.xlane.f32.xlu0 %v440_v11  ;;  %v435_v12 = vpop.f32.mrb[2].mxu0 }
 0x122   : > { %v744_v13 = vpop.f32.mrb[3].mxu0  ;;  %v443_v14 = vsel %vm439_vm1, %v435_v12, -inf }
 0x125   : > { %444 = vmax.xlane.f32.xlu0 %v443_v14 }
 0x1ae   : > { %v442_v16 = vpop.xlane.xlu0 %441 }
 0x1af   : > { %v446_v17 = vsub.f32 %v432_v9, %v442_v16 }
 0x1b1   : > { %v448_v18 = vmul.f32 1.442695, %v446_v17 }
 0x1b2   : > { %v445_v19 = vpop.xlane.xlu0 %444 }
 0x1b3   : > { %845 = vpow2.f32 %v448_v18  ;;  %v447_v20 = vsub.f32 %v435_v12, %v445_v19 }
 0x1b5   : > { %v450_v21 = vmul.f32 1.442695, %v447_v20 }
 0x1b7   : > { %847 = vpow2.f32 %v450_v21 }
 0x1bd   : > { %v846_v22 = vpop.eup %845 }
 0x1be   : > { %v452_v23 = vsel %vm439_vm1, %v846_v22, 0.0 }
 0x1bf   : > { %453 = vadd.xlane.f32.xlu1 %v452_v23 }
 0x1c1   : > { %v848_v24 = vpop.eup %847 }
 0x1c2   : > { %v455_v25 = vsel %vm439_vm1, %v848_v24, 0.0  ;;  %v458_v26 = vpack.c.bf16 %v848_v24, %v846_v22 }
 0x1c3   : > { %456 = vadd.xlane.f32.xlu1 %v455_v25 }
 0x1c4   : > { %748 = vmatmul.mubr.msk.bf16.vlgmr.msra.gmra.mrb[0].mxu1 %vm439_vm1, %v458_v26 }
 0x24c   : > { %v454_v27 = vpop.xlane.xlu1 %453 }
 0x24d   : > { %849 = vrcp.f32 %v454_v27 }
 0x250   : > { %v457_v28 = vpop.xlane.xlu1 %456 }
 0x251   : > { %851 = vrcp.f32 %v457_v28 }
 0x257   : > { %v850_v30 = vpop.eup %849 }
 0x25b   : > { %v852_v32 = vpop.eup %851 }
 0x297   : > { %v504_v29 = vpop.f32.mrb[0].mxu1 }
 0x298   : > { %v749_v31 = vpop.f32.mrb[1].mxu1  ;;  %v513_v34 = vmul.f32 %v850_v30, %v504_v29  ;;  %531 = sbr.rel (!%p1076_p13) target bundleno = 679 (0x2a7), region = 159 }
 0x299   : > { %v507_v33 = vpop.f32.mrb[2].mxu1 }
 0x29a   : > { %v514_v35 = vmul.f32 %v852_v32, %v507_v33  ;;  %v750_v36 = vpop.f32.mrb[3].mxu1 }
 0x29c   : > { %v733_v37 = vpack.c.bf16 %v514_v35, %v513_v34 }
 0x29e   : > { %734 = vst [vmem:[%s374_s12] sm:$0xff] %v733_v37  }
 0x2a5   : > { %v552_v38 = vld [vmem:[%s374_s12] sm:$0xf]  ;;  %v554_v39 = vld [vmem:[%s374_s12 + $0x4] sm:$0xf] }
 0x2a6   : > { %553 = vst [vmem:[%s536_s25] sm:$0xf] %v552_v38  ;;  %555 = vst [vmem:[%s536_s25 + $0x8] sm:$0xf] %v554_v39 }
 0x2a7 PF: > { %s13_s22 = sadd.s32 1, %s939_s22   ;;  %s1178_s18 = sld [smem:[#allocation8_spill]] }
 0x2a8   : > { %p10_p4 = scmp.ge.s32.totalorder %s13_s22, 6   ;;  %s1179_s7 = sld [smem:[#allocation6_spill]] }
 0x2a9   : > { %s1180_s4 = sld [smem:[#allocation7_spill]]  ;;  %s1181_s12 = smov %s903_s13 }
 0x2aa   : > { %s1182_s13 = smov %s1081_s26  ;;  %s1183_s14 = smov %s911_s15 }
 0x2ab   : > { %s1184_s15 = smov %s1059_s28  ;;  %s1185_s16 = smov %s919_s17 }
 0x2ac   : > { %s1188_s19 = smov %s935_s21  ;;  %12 = sbr.rel (!%p10_p4) target bundleno = 8 (0x8), region = 247 }
 0x2ad   : > { %s1186_s17 = smov %s1178_s18  ;;  %s1187_s18 = smov %s931_s20 }
 0x2ae   : > { %s1189_s20 = smov %s1179_s7 }
 0x2af   : > { %s1190_s21 = smov %s1180_s4 }

</bundles_post_ra>
